<compile_context>
chip_gen: v7x
topology: tpu7x:2x2x1
jax: 0.10.0
libtpu: 0.0.40
codegen_flags: <defaults>
</compile_context>

<pallas_src>
import jax
import jax.numpy as jnp
from jax.experimental import pallas as pl
from jax.experimental.pallas import tpu as pltpu


def make_net_kernel(H, W):
    """Build the fused 4-block kernel for a (H, W) input (H, W multiples of 16)."""
    H1, W1 = H, W
    H2, W2 = H // 2, W // 2
    H3, W3 = H // 4, W // 4
    H4, W4 = H // 8, W // 8
    Hf, Wf = H // 16, W // 16

    def net_kernel(x1_ref, w1_ref, w2_ref, w3_ref, w4_ref, sc_ref, bi_ref, o_ref,
                   pad2, col2, pad3, col3, pad4, col4):
        # x1_ref : (1, H*W, 32)  bf16  layer-1 im2col patch (K=27 zero-padded to 32)
        # w1_ref : (32, 64)      bf16
        # w2..w4 : (576, 64)     bf16  (dy, dx, cin) flattened along K
        # sc/bi  : (4, 64)       f32   folded BN scale / bias per layer
        # o_ref  : (1, Hf*Wf, 64) f32
        # padX   : f32 zero-padded activation scratch, colX: bf16 im2col scratch.

        def bn_relu(y, l):
            return jnp.maximum(y * sc_ref[l:l + 1, :] + bi_ref[l:l + 1, :], 0.0)

        def pool2(y, h, w):
            # MaxPool2d(2, stride=2); y is (h*w, 64) or (h, w, 64).
            y = y.reshape(h, w, 64).reshape(h // 2, 2, w // 2, 2, 64)
            return jnp.max(jnp.max(y, axis=3), axis=1)            # (h//2, w//2, 64)

        def conv_im2col(a, h, w, pad_ref, col_ref, w_ref):
            # a: (h, w, 64) f32.  Zero-pad in VMEM, build the (h*w, 576) patch,
            # then a single K=576 bf16 matmul with f32 accumulation.
            pad_ref[...] = jnp.zeros_like(pad_ref)
            pad_ref[1:h + 1, 1:w + 1, :] = a
            for dy in range(3):
                for dx in range(3):
                    t = dy * 3 + dx
                    col_ref[:, t * 64:(t + 1) * 64] = (
                        pad_ref[dy:dy + h, dx:dx + w, :]
                        .reshape(h * w, 64).astype(jnp.bfloat16))
            return jnp.dot(col_ref[...], w_ref[...],
                           preferred_element_type=jnp.float32)     # (h*w, 64) f32

        # ---- Layer 1: one (H*W, 32) x (32, 64) matmul on the pre-built im2col.
        a = jnp.dot(x1_ref[0], w1_ref[...], preferred_element_type=jnp.float32)
        a = pool2(bn_relu(a, 0), H1, W1)                           # (H2, W2, 64)

        # ---- Layers 2-4: K=576 im2col matmuls, everything stays in VMEM.
        a = pool2(bn_relu(conv_im2col(a, H2, W2, pad2, col2, w2_ref), 1), H2, W2)
        a = pool2(bn_relu(conv_im2col(a, H3, W3, pad3, col3, w3_ref), 2), H3, W3)
        a = bn_relu(conv_im2col(a, H4, W4, pad4, col4, w4_ref), 3)  # (H4*W4, 64)
        a = pool2(a, H4, W4)                                        # (Hf, Wf, 64)

        o_ref[0] = a.reshape(Hf * Wf, 64)

    return net_kernel


def init_params(key, cins=(3, 64, 64, 64), cout=64, k=3):
    """Deterministic init matching the module shapes (PyTorch-style fan-in bound)."""
    params = []
    for cin in cins:
        key, kw, kb = jax.random.split(key, 3)
        bound = 1.0 / jnp.sqrt(cin * k * k)
        w = jax.random.uniform(kw, (k, k, cin, cout), jnp.float32, -bound, bound)
        b = jax.random.uniform(kb, (cout,), jnp.float32, -bound, bound)
        gamma = jnp.ones((cout,), jnp.float32)   # BatchNorm2d defaults
        beta = jnp.zeros((cout,), jnp.float32)
        mean = jnp.zeros((cout,), jnp.float32)
        var = jnp.ones((cout,), jnp.float32)
        params.append((w, b, gamma, beta, mean, var))
    return params


def net_forward(x_nchw, params, eps=1e-5):
    N, _, H, W = x_nchw.shape
    assert H % 16 == 0 and W % 16 == 0, "need 4 clean 2x2 pools"
    x = jnp.transpose(x_nchw, (0, 2, 3, 1)).astype(jnp.float32)      # NCHW -> NHWC

    # Layer-1 im2col in the wrapper (tiny: N*H*W*27 values), K padded 27 -> 32, bf16.
    xp = jnp.pad(x, ((0, 0), (1, 1), (1, 1), (0, 0)))
    taps = [xp[:, dy:dy + H, dx:dx + W, :] for dy in range(3) for dx in range(3)]
    col1 = jnp.concatenate(taps, axis=-1).reshape(N, H * W, 27)
    col1 = jnp.pad(col1, ((0, 0), (0, 0), (0, 5))).astype(jnp.bfloat16)   # (N,H*W,32)

    # Fold inference BatchNorm + conv bias into per-channel scale/bias; pack weights.
    ws, scales, biases = [], [], []
    for (w, b, gamma, beta, mean, var) in params:
        s = gamma / jnp.sqrt(var + eps)
        scales.append(s)
        biases.append(beta + s * (b - mean))
        ws.append(w.reshape(-1, w.shape[-1]))          # (k*k*cin, 64), (dy,dx,c) in K
    w1 = jnp.pad(ws[0], ((0, 5), (0, 0))).astype(jnp.bfloat16)            # (32, 64)
    w2, w3, w4 = (w.astype(jnp.bfloat16) for w in ws[1:])                 # (576, 64)
    sc = jnp.stack(scales).astype(jnp.float32)                            # (4, 64)
    bi = jnp.stack(biases).astype(jnp.float32)                            # (4, 64)

    H2, W2 = H // 2, W // 2
    H3, W3 = H // 4, W // 4
    H4, W4 = H // 8, W // 8
    Hf, Wf = H // 16, W // 16

    out = pl.pallas_call(
        make_net_kernel(H, W),
        out_shape=jax.ShapeDtypeStruct((N, Hf * Wf, 64), jnp.float32),
        grid_spec=pltpu.PrefetchScalarGridSpec(
            num_scalar_prefetch=0,
            grid=(N,),
            in_specs=[
                pl.BlockSpec((1, H * W, 32), lambda n: (n, 0, 0)),   # layer-1 im2col
                pl.BlockSpec((32, 64), lambda n: (0, 0)),            # w1
                pl.BlockSpec((576, 64), lambda n: (0, 0)),           # w2
                pl.BlockSpec((576, 64), lambda n: (0, 0)),           # w3
                pl.BlockSpec((576, 64), lambda n: (0, 0)),           # w4
                pl.BlockSpec((4, 64), lambda n: (0, 0)),             # BN scales
                pl.BlockSpec((4, 64), lambda n: (0, 0)),             # BN biases
            ],
            out_specs=pl.BlockSpec((1, Hf * Wf, 64), lambda n: (n, 0, 0)),
            scratch_shapes=[
                pltpu.VMEM((H2 + 2, W2 + 2, 64), jnp.float32),   # pad2
                pltpu.VMEM((H2 * W2, 576), jnp.bfloat16),        # col2
                pltpu.VMEM((H3 + 2, W3 + 2, 64), jnp.float32),   # pad3
                pltpu.VMEM((H3 * W3, 576), jnp.bfloat16),        # col3
                pltpu.VMEM((H4 + 2, W4 + 2, 64), jnp.float32),   # pad4
                pltpu.VMEM((H4 * W4, 576), jnp.bfloat16),        # col4
            ],
        ),
        compiler_params=pltpu.CompilerParams(
            dimension_semantics=("parallel",)),       # batch -> both v7x TensorCores
    )(col1, w1, w2, w3, w4, sc, bi)

    # Back to NCHW flatten ordering (trivial when final spatial is 1x1).
    out = out.reshape(N, Hf, Wf, 64).transpose(0, 3, 1, 2)
    return out.reshape(N, -1)


if __name__ == "__main__":
    key = jax.random.PRNGKey(0)
    kx, kp = jax.random.split(key)
    # batch=2, channels=3, spatial=16 (16 -> 8 -> 4 -> 2 -> 1 through the 4 pools)
    x = jax.random.normal(kx, (2, 3, 16, 16), jnp.float32)   # NCHW like PyTorch
    params = init_params(kp)
    fwd = jax.jit(net_forward)
    out = jax.block_until_ready(fwd(x, params))
    assert out.shape == (2, 64), out.shape
    assert bool(jnp.all(jnp.isfinite(out)))
    print("KERNEL_OK")
</pallas_src>

<mosaic_0001>
module attributes {stable_mosaic.version = 11 : i64} {
  func.func @net_kernel(%arg0: i32, %arg1: memref<1x256x32xbf16, #tpu.memory_space<vmem>>, %arg2: memref<32x64xbf16, #tpu.memory_space<vmem>>, %arg3: memref<576x64xbf16, #tpu.memory_space<vmem>>, %arg4: memref<576x64xbf16, #tpu.memory_space<vmem>>, %arg5: memref<576x64xbf16, #tpu.memory_space<vmem>>, %arg6: memref<4x64xf32, #tpu.memory_space<vmem>>, %arg7: memref<4x64xf32, #tpu.memory_space<vmem>>, %arg8: memref<1x1x64xf32, #tpu.memory_space<vmem>>, %arg9: memref<10x10x64xf32, #tpu.memory_space<vmem>>, %arg10: memref<64x576xbf16, #tpu.memory_space<vmem>>, %arg11: memref<6x6x64xf32, #tpu.memory_space<vmem>>, %arg12: memref<16x576xbf16, #tpu.memory_space<vmem>>, %arg13: memref<4x4x64xf32, #tpu.memory_space<vmem>>, %arg14: memref<4x576xbf16, #tpu.memory_space<vmem>>) attributes {dimension_semantics = [#tpu.dimension_semantics<parallel>], iteration_bounds = array<i64: 2>, scalar_prefetch = 0 : i64, scratch_operands = 6 : i64, tpu.core_type = #tpu.core_type<tc>, window_params = [{transform_indices = @transform_0, window_bounds = array<i64: 1, 256, 32>}, {pipeline_mode = #tpu.pipeline_mode<synchronous>, transform_indices = @transform_1, window_bounds = array<i64: 32, 64>}, {pipeline_mode = #tpu.pipeline_mode<synchronous>, transform_indices = @transform_2, window_bounds = array<i64: 576, 64>}, {pipeline_mode = #tpu.pipeline_mode<synchronous>, transform_indices = @transform_3, window_bounds = array<i64: 576, 64>}, {pipeline_mode = #tpu.pipeline_mode<synchronous>, transform_indices = @transform_4, window_bounds = array<i64: 576, 64>}, {pipeline_mode = #tpu.pipeline_mode<synchronous>, transform_indices = @transform_5, window_bounds = array<i64: 4, 64>}, {pipeline_mode = #tpu.pipeline_mode<synchronous>, transform_indices = @transform_6, window_bounds = array<i64: 4, 64>}, {transform_indices = @transform_7, window_bounds = array<i64: 1, 1, 64>}]} {
    %c0 = arith.constant 0 : index
    %c0_0 = arith.constant 0 : index
    %c0_1 = arith.constant 0 : index
    %0 = vector.load %arg1[%c0, %c0_0, %c0_1] : memref<1x256x32xbf16, #tpu.memory_space<vmem>>, vector<1x256x32xbf16>
    %1 = vector.shape_cast %0 : vector<1x256x32xbf16> to vector<256x32xbf16>
    %c0_2 = arith.constant 0 : index
    %c0_3 = arith.constant 0 : index
    %2 = vector.load %arg2[%c0_2, %c0_3] : memref<32x64xbf16, #tpu.memory_space<vmem>>, vector<32x64xbf16>
    %cst = arith.constant dense<0.000000e+00> : vector<256x64xf32>
    %3 = tpu.matmul %1, %2, %cst {dimension_numbers = #tpu.dot_dimension_numbers<[1], [0], [0], [1], [0, 0, 1, 1], [], []>} : vector<256x32xbf16>, vector<32x64xbf16>, vector<256x64xf32> -> vector<256x64xf32>
    %c0_4 = arith.constant 0 : index
    %c0_5 = arith.constant 0 : index
    %4 = vector.load %arg6[%c0_4, %c0_5] : memref<4x64xf32, #tpu.memory_space<vmem>>, vector<1x64xf32>
    %5 = vector.broadcast %4 : vector<1x64xf32> to vector<256x64xf32>
    %6 = arith.mulf %3, %5 : vector<256x64xf32>
    %c0_6 = arith.constant 0 : index
    %c0_7 = arith.constant 0 : index
    %7 = vector.load %arg7[%c0_6, %c0_7] : memref<4x64xf32, #tpu.memory_space<vmem>>, vector<1x64xf32>
    %8 = vector.broadcast %7 : vector<1x64xf32> to vector<256x64xf32>
    %9 = arith.addf %6, %8 : vector<256x64xf32>
    %cst_8 = arith.constant 0.000000e+00 : f32
    %10 = vector.broadcast %cst_8 : f32 to vector<256x64xf32>
    %11 = arith.maximumf %9, %10 : vector<256x64xf32>
    %12 = vector.shape_cast %11 : vector<256x64xf32> to vector<16x16x64xf32>
    %13 = vector.shape_cast %12 : vector<16x16x64xf32> to vector<8x2x8x2x64xf32>
    %cst_9 = arith.constant dense<0xFF800000> : vector<8x2x8x64xf32>
    %14 = vector.multi_reduction <maximumf>, %13, %cst_9 [3] : vector<8x2x8x2x64xf32> to vector<8x2x8x64xf32>
    %cst_10 = arith.constant dense<0xFF800000> : vector<8x8x64xf32>
    %15 = vector.multi_reduction <maximumf>, %14, %cst_10 [1] : vector<8x2x8x64xf32> to vector<8x8x64xf32>
    %cst_11 = arith.constant 0.000000e+00 : f32
    %16 = vector.broadcast %cst_11 : f32 to vector<10x10x64xf32>
    %c0_12 = arith.constant 0 : index
    %c0_13 = arith.constant 0 : index
    %c0_14 = arith.constant 0 : index
    %17 = vector.load %arg9[%c0_12, %c0_13, %c0_14] : memref<10x10x64xf32, #tpu.memory_space<vmem>>, vector<10x10x64xf32>
    tpu.vector_store %arg9[%c0_12, %c0_13, %c0_14], %16 {strides = array<i32>} : memref<10x10x64xf32, #tpu.memory_space<vmem>>, vector<10x10x64xf32>,
    %c1 = arith.constant 1 : index
    %c1_15 = arith.constant 1 : index
    %c0_16 = arith.constant 0 : index
    %18 = vector.load %arg9[%c1, %c1_15, %c0_16] : memref<10x10x64xf32, #tpu.memory_space<vmem>>, vector<8x8x64xf32>
    tpu.vector_store %arg9[%c1, %c1_15, %c0_16], %15 {strides = array<i32>} : memref<10x10x64xf32, #tpu.memory_space<vmem>>, vector<8x8x64xf32>,
    %c0_17 = arith.constant 0 : index
    %c0_18 = arith.constant 0 : index
    %c0_19 = arith.constant 0 : index
    %19 = vector.load %arg9[%c0_17, %c0_18, %c0_19] : memref<10x10x64xf32, #tpu.memory_space<vmem>>, vector<8x8x64xf32>
    %20 = vector.shape_cast %19 : vector<8x8x64xf32> to vector<64x64xf32>
    %21 = arith.truncf %20 : vector<64x64xf32> to vector<64x64xbf16>
    %c0_20 = arith.constant 0 : index
    %c0_21 = arith.constant 0 : index
    %22 = vector.load %arg10[%c0_20, %c0_21] : memref<64x576xbf16, #tpu.memory_space<vmem>>, vector<64x64xbf16>
    tpu.vector_store %arg10[%c0_20, %c0_21], %21 {strides = array<i32>} : memref<64x576xbf16, #tpu.memory_space<vmem>>, vector<64x64xbf16>,
    %c0_22 = arith.constant 0 : index
    %c1_23 = arith.constant 1 : index
    %c0_24 = arith.constant 0 : index
    %23 = vector.load %arg9[%c0_22, %c1_23, %c0_24] : memref<10x10x64xf32, #tpu.memory_space<vmem>>, vector<8x8x64xf32>
    %24 = vector.shape_cast %23 : vector<8x8x64xf32> to vector<64x64xf32>
    %25 = arith.truncf %24 : vector<64x64xf32> to vector<64x64xbf16>
    %c0_25 = arith.constant 0 : index
    %c64 = arith.constant 64 : index
    %26 = vector.load %arg10[%c0_25, %c64] : memref<64x576xbf16, #tpu.memory_space<vmem>>, vector<64x64xbf16>
    tpu.vector_store %arg10[%c0_25, %c64], %25 {strides = array<i32>} : memref<64x576xbf16, #tpu.memory_space<vmem>>, vector<64x64xbf16>,
    %c0_26 = arith.constant 0 : index
    %c2 = arith.constant 2 : index
    %c0_27 = arith.constant 0 : index
    %27 = vector.load %arg9[%c0_26, %c2, %c0_27] : memref<10x10x64xf32, #tpu.memory_space<vmem>>, vector<8x8x64xf32>
    %28 = vector.shape_cast %27 : vector<8x8x64xf32> to vector<64x64xf32>
    %29 = arith.truncf %28 : vector<64x64xf32> to vector<64x64xbf16>
    %c0_28 = arith.constant 0 : index
    %c128 = arith.constant 128 : index
    %30 = vector.load %arg10[%c0_28, %c128] : memref<64x576xbf16, #tpu.memory_space<vmem>>, vector<64x64xbf16>
    tpu.vector_store %arg10[%c0_28, %c128], %29 {strides = array<i32>} : memref<64x576xbf16, #tpu.memory_space<vmem>>, vector<64x64xbf16>,
    %c1_29 = arith.constant 1 : index
    %c0_30 = arith.constant 0 : index
    %c0_31 = arith.constant 0 : index
    %31 = vector.load %arg9[%c1_29, %c0_30, %c0_31] : memref<10x10x64xf32, #tpu.memory_space<vmem>>, vector<8x8x64xf32>
    %32 = vector.shape_cast %31 : vector<8x8x64xf32> to vector<64x64xf32>
    %33 = arith.truncf %32 : vector<64x64xf32> to vector<64x64xbf16>
    %c0_32 = arith.constant 0 : index
    %c192 = arith.constant 192 : index
    %34 = vector.load %arg10[%c0_32, %c192] : memref<64x576xbf16, #tpu.memory_space<vmem>>, vector<64x64xbf16>
    tpu.vector_store %arg10[%c0_32, %c192], %33 {strides = array<i32>} : memref<64x576xbf16, #tpu.memory_space<vmem>>, vector<64x64xbf16>,
    %c1_33 = arith.constant 1 : index
    %c1_34 = arith.constant 1 : index
    %c0_35 = arith.constant 0 : index
    %35 = vector.load %arg9[%c1_33, %c1_34, %c0_35] : memref<10x10x64xf32, #tpu.memory_space<vmem>>, vector<8x8x64xf32>
    %36 = vector.shape_cast %35 : vector<8x8x64xf32> to vector<64x64xf32>
    %37 = arith.truncf %36 : vector<64x64xf32> to vector<64x64xbf16>
    %c0_36 = arith.constant 0 : index
    %c256 = arith.constant 256 : index
    %38 = vector.load %arg10[%c0_36, %c256] : memref<64x576xbf16, #tpu.memory_space<vmem>>, vector<64x64xbf16>
    tpu.vector_store %arg10[%c0_36, %c256], %37 {strides = array<i32>} : memref<64x576xbf16, #tpu.memory_space<vmem>>, vector<64x64xbf16>,
    %c1_37 = arith.constant 1 : index
    %c2_38 = arith.constant 2 : index
    %c0_39 = arith.constant 0 : index
    %39 = vector.load %arg9[%c1_37, %c2_38, %c0_39] : memref<10x10x64xf32, #tpu.memory_space<vmem>>, vector<8x8x64xf32>
    %40 = vector.shape_cast %39 : vector<8x8x64xf32> to vector<64x64xf32>
    %41 = arith.truncf %40 : vector<64x64xf32> to vector<64x64xbf16>
    %c0_40 = arith.constant 0 : index
    %c320 = arith.constant 320 : index
    %42 = vector.load %arg10[%c0_40, %c320] : memref<64x576xbf16, #tpu.memory_space<vmem>>, vector<64x64xbf16>
    tpu.vector_store %arg10[%c0_40, %c320], %41 {strides = array<i32>} : memref<64x576xbf16, #tpu.memory_space<vmem>>, vector<64x64xbf16>,
    %c2_41 = arith.constant 2 : index
    %c0_42 = arith.constant 0 : index
    %c0_43 = arith.constant 0 : index
    %43 = vector.load %arg9[%c2_41, %c0_42, %c0_43] : memref<10x10x64xf32, #tpu.memory_space<vmem>>, vector<8x8x64xf32>
    %44 = vector.shape_cast %43 : vector<8x8x64xf32> to vector<64x64xf32>
    %45 = arith.truncf %44 : vector<64x64xf32> to vector<64x64xbf16>
    %c0_44 = arith.constant 0 : index
    %c384 = arith.constant 384 : index
    %46 = vector.load %arg10[%c0_44, %c384] : memref<64x576xbf16, #tpu.memory_space<vmem>>, vector<64x64xbf16>
    tpu.vector_store %arg10[%c0_44, %c384], %45 {strides = array<i32>} : memref<64x576xbf16, #tpu.memory_space<vmem>>, vector<64x64xbf16>,
    %c2_45 = arith.constant 2 : index
    %c1_46 = arith.constant 1 : index
    %c0_47 = arith.constant 0 : index
    %47 = vector.load %arg9[%c2_45, %c1_46, %c0_47] : memref<10x10x64xf32, #tpu.memory_space<vmem>>, vector<8x8x64xf32>
    %48 = vector.shape_cast %47 : vector<8x8x64xf32> to vector<64x64xf32>
    %49 = arith.truncf %48 : vector<64x64xf32> to vector<64x64xbf16>
    %c0_48 = arith.constant 0 : index
    %c448 = arith.constant 448 : index
    %50 = vector.load %arg10[%c0_48, %c448] : memref<64x576xbf16, #tpu.memory_space<vmem>>, vector<64x64xbf16>
    tpu.vector_store %arg10[%c0_48, %c448], %49 {strides = array<i32>} : memref<64x576xbf16, #tpu.memory_space<vmem>>, vector<64x64xbf16>,
    %c2_49 = arith.constant 2 : index
    %c2_50 = arith.constant 2 : index
    %c0_51 = arith.constant 0 : index
    %51 = vector.load %arg9[%c2_49, %c2_50, %c0_51] : memref<10x10x64xf32, #tpu.memory_space<vmem>>, vector<8x8x64xf32>
    %52 = vector.shape_cast %51 : vector<8x8x64xf32> to vector<64x64xf32>
    %53 = arith.truncf %52 : vector<64x64xf32> to vector<64x64xbf16>
    %c0_52 = arith.constant 0 : index
    %c512 = arith.constant 512 : index
    %54 = vector.load %arg10[%c0_52, %c512] : memref<64x576xbf16, #tpu.memory_space<vmem>>, vector<64x64xbf16>
    tpu.vector_store %arg10[%c0_52, %c512], %53 {strides = array<i32>} : memref<64x576xbf16, #tpu.memory_space<vmem>>, vector<64x64xbf16>,
    %c0_53 = arith.constant 0 : index
    %c0_54 = arith.constant 0 : index
    %55 = vector.load %arg10[%c0_53, %c0_54] : memref<64x576xbf16, #tpu.memory_space<vmem>>, vector<64x576xbf16>
    %c0_55 = arith.constant 0 : index
    %c0_56 = arith.constant 0 : index
    %56 = vector.load %arg3[%c0_55, %c0_56] : memref<576x64xbf16, #tpu.memory_space<vmem>>, vector<576x64xbf16>
    %cst_57 = arith.constant dense<0.000000e+00> : vector<64x64xf32>
    %57 = tpu.matmul %55, %56, %cst_57 {dimension_numbers = #tpu.dot_dimension_numbers<[1], [0], [0], [1], [0, 0, 1, 1], [], []>} : vector<64x576xbf16>, vector<576x64xbf16>, vector<64x64xf32> -> vector<64x64xf32>
    %c1_58 = arith.constant 1 : index
    %c0_59 = arith.constant 0 : index
    %58 = vector.load %arg6[%c1_58, %c0_59] : memref<4x64xf32, #tpu.memory_space<vmem>>, vector<1x64xf32>
    %59 = vector.broadcast %58 : vector<1x64xf32> to vector<64x64xf32>
    %60 = arith.mulf %57, %59 : vector<64x64xf32>
    %c1_60 = arith.constant 1 : index
    %c0_61 = arith.constant 0 : index
    %61 = vector.load %arg7[%c1_60, %c0_61] : memref<4x64xf32, #tpu.memory_space<vmem>>, vector<1x64xf32>
    %62 = vector.broadcast %61 : vector<1x64xf32> to vector<64x64xf32>
    %63 = arith.addf %60, %62 : vector<64x64xf32>
    %cst_62 = arith.constant 0.000000e+00 : f32
    %64 = vector.broadcast %cst_62 : f32 to vector<64x64xf32>
    %65 = arith.maximumf %63, %64 : vector<64x64xf32>
    %66 = vector.shape_cast %65 : vector<64x64xf32> to vector<8x8x64xf32>
    %67 = vector.shape_cast %66 : vector<8x8x64xf32> to vector<4x2x4x2x64xf32>
    %cst_63 = arith.constant dense<0xFF800000> : vector<4x2x4x64xf32>
    %68 = vector.multi_reduction <maximumf>, %67, %cst_63 [3] : vector<4x2x4x2x64xf32> to vector<4x2x4x64xf32>
    %cst_64 = arith.constant dense<0xFF800000> : vector<4x4x64xf32>
    %69 = vector.multi_reduction <maximumf>, %68, %cst_64 [1] : vector<4x2x4x64xf32> to vector<4x4x64xf32>
    %cst_65 = arith.constant 0.000000e+00 : f32
    %70 = vector.broadcast %cst_65 : f32 to vector<6x6x64xf32>
    %c0_66 = arith.constant 0 : index
    %c0_67 = arith.constant 0 : index
    %c0_68 = arith.constant 0 : index
    %71 = vector.load %arg11[%c0_66, %c0_67, %c0_68] : memref<6x6x64xf32, #tpu.memory_space<vmem>>, vector<6x6x64xf32>
    tpu.vector_store %arg11[%c0_66, %c0_67, %c0_68], %70 {strides = array<i32>} : memref<6x6x64xf32, #tpu.memory_space<vmem>>, vector<6x6x64xf32>,
    %c1_69 = arith.constant 1 : index
    %c1_70 = arith.constant 1 : index
    %c0_71 = arith.constant 0 : index
    %72 = vector.load %arg11[%c1_69, %c1_70, %c0_71] : memref<6x6x64xf32, #tpu.memory_space<vmem>>, vector<4x4x64xf32>
    tpu.vector_store %arg11[%c1_69, %c1_70, %c0_71], %69 {strides = array<i32>} : memref<6x6x64xf32, #tpu.memory_space<vmem>>, vector<4x4x64xf32>,
    %c0_72 = arith.constant 0 : index
    %c0_73 = arith.constant 0 : index
    %c0_74 = arith.constant 0 : index
    %73 = vector.load %arg11[%c0_72, %c0_73, %c0_74] : memref<6x6x64xf32, #tpu.memory_space<vmem>>, vector<4x4x64xf32>
    %74 = vector.shape_cast %73 : vector<4x4x64xf32> to vector<16x64xf32>
    %75 = arith.truncf %74 : vector<16x64xf32> to vector<16x64xbf16>
    %c0_75 = arith.constant 0 : index
    %c0_76 = arith.constant 0 : index
    %76 = vector.load %arg12[%c0_75, %c0_76] : memref<16x576xbf16, #tpu.memory_space<vmem>>, vector<16x64xbf16>
    tpu.vector_store %arg12[%c0_75, %c0_76], %75 {strides = array<i32>} : memref<16x576xbf16, #tpu.memory_space<vmem>>, vector<16x64xbf16>,
    %c0_77 = arith.constant 0 : index
    %c1_78 = arith.constant 1 : index
    %c0_79 = arith.constant 0 : index
    %77 = vector.load %arg11[%c0_77, %c1_78, %c0_79] : memref<6x6x64xf32, #tpu.memory_space<vmem>>, vector<4x4x64xf32>
    %78 = vector.shape_cast %77 : vector<4x4x64xf32> to vector<16x64xf32>
    %79 = arith.truncf %78 : vector<16x64xf32> to vector<16x64xbf16>
    %c0_80 = arith.constant 0 : index
    %c64_81 = arith.constant 64 : index
    %80 = vector.load %arg12[%c0_80, %c64_81] : memref<16x576xbf16, #tpu.memory_space<vmem>>, vector<16x64xbf16>
    tpu.vector_store %arg12[%c0_80, %c64_81], %79 {strides = array<i32>} : memref<16x576xbf16, #tpu.memory_space<vmem>>, vector<16x64xbf16>,
    %c0_82 = arith.constant 0 : index
    %c2_83 = arith.constant 2 : index
    %c0_84 = arith.constant 0 : index
    %81 = vector.load %arg11[%c0_82, %c2_83, %c0_84] : memref<6x6x64xf32, #tpu.memory_space<vmem>>, vector<4x4x64xf32>
    %82 = vector.shape_cast %81 : vector<4x4x64xf32> to vector<16x64xf32>
    %83 = arith.truncf %82 : vector<16x64xf32> to vector<16x64xbf16>
    %c0_85 = arith.constant 0 : index
    %c128_86 = arith.constant 128 : index
    %84 = vector.load %arg12[%c0_85, %c128_86] : memref<16x576xbf16, #tpu.memory_space<vmem>>, vector<16x64xbf16>
    tpu.vector_store %arg12[%c0_85, %c128_86], %83 {strides = array<i32>} : memref<16x576xbf16, #tpu.memory_space<vmem>>, vector<16x64xbf16>,
    %c1_87 = arith.constant 1 : index
    %c0_88 = arith.constant 0 : index
    %c0_89 = arith.constant 0 : index
    %85 = vector.load %arg11[%c1_87, %c0_88, %c0_89] : memref<6x6x64xf32, #tpu.memory_space<vmem>>, vector<4x4x64xf32>
    %86 = vector.shape_cast %85 : vector<4x4x64xf32> to vector<16x64xf32>
    %87 = arith.truncf %86 : vector<16x64xf32> to vector<16x64xbf16>
    %c0_90 = arith.constant 0 : index
    %c192_91 = arith.constant 192 : index
    %88 = vector.load %arg12[%c0_90, %c192_91] : memref<16x576xbf16, #tpu.memory_space<vmem>>, vector<16x64xbf16>
    tpu.vector_store %arg12[%c0_90, %c192_91], %87 {strides = array<i32>} : memref<16x576xbf16, #tpu.memory_space<vmem>>, vector<16x64xbf16>,
    %c1_92 = arith.constant 1 : index
    %c1_93 = arith.constant 1 : index
    %c0_94 = arith.constant 0 : index
    %89 = vector.load %arg11[%c1_92, %c1_93, %c0_94] : memref<6x6x64xf32, #tpu.memory_space<vmem>>, vector<4x4x64xf32>
    %90 = vector.shape_cast %89 : vector<4x4x64xf32> to vector<16x64xf32>
    %91 = arith.truncf %90 : vector<16x64xf32> to vector<16x64xbf16>
    %c0_95 = arith.constant 0 : index
    %c256_96 = arith.constant 256 : index
    %92 = vector.load %arg12[%c0_95, %c256_96] : memref<16x576xbf16, #tpu.memory_space<vmem>>, vector<16x64xbf16>
    tpu.vector_store %arg12[%c0_95, %c256_96], %91 {strides = array<i32>} : memref<16x576xbf16, #tpu.memory_space<vmem>>, vector<16x64xbf16>,
    %c1_97 = arith.constant 1 : index
    %c2_98 = arith.constant 2 : index
    %c0_99 = arith.constant 0 : index
    %93 = vector.load %arg11[%c1_97, %c2_98, %c0_99] : memref<6x6x64xf32, #tpu.memory_space<vmem>>, vector<4x4x64xf32>
    %94 = vector.shape_cast %93 : vector<4x4x64xf32> to vector<16x64xf32>
    %95 = arith.truncf %94 : vector<16x64xf32> to vector<16x64xbf16>
    %c0_100 = arith.constant 0 : index
    %c320_101 = arith.constant 320 : index
    %96 = vector.load %arg12[%c0_100, %c320_101] : memref<16x576xbf16, #tpu.memory_space<vmem>>, vector<16x64xbf16>
    tpu.vector_store %arg12[%c0_100, %c320_101], %95 {strides = array<i32>} : memref<16x576xbf16, #tpu.memory_space<vmem>>, vector<16x64xbf16>,
    %c2_102 = arith.constant 2 : index
    %c0_103 = arith.constant 0 : index
    %c0_104 = arith.constant 0 : index
    %97 = vector.load %arg11[%c2_102, %c0_103, %c0_104] : memref<6x6x64xf32, #tpu.memory_space<vmem>>, vector<4x4x64xf32>
    %98 = vector.shape_cast %97 : vector<4x4x64xf32> to vector<16x64xf32>
    %99 = arith.truncf %98 : vector<16x64xf32> to vector<16x64xbf16>
    %c0_105 = arith.constant 0 : index
    %c384_106 = arith.constant 384 : index
    %100 = vector.load %arg12[%c0_105, %c384_106] : memref<16x576xbf16, #tpu.memory_space<vmem>>, vector<16x64xbf16>
    tpu.vector_store %arg12[%c0_105, %c384_106], %99 {strides = array<i32>} : memref<16x576xbf16, #tpu.memory_space<vmem>>, vector<16x64xbf16>,
    %c2_107 = arith.constant 2 : index
    %c1_108 = arith.constant 1 : index
    %c0_109 = arith.constant 0 : index
    %101 = vector.load %arg11[%c2_107, %c1_108, %c0_109] : memref<6x6x64xf32, #tpu.memory_space<vmem>>, vector<4x4x64xf32>
    %102 = vector.shape_cast %101 : vector<4x4x64xf32> to vector<16x64xf32>
    %103 = arith.truncf %102 : vector<16x64xf32> to vector<16x64xbf16>
    %c0_110 = arith.constant 0 : index
    %c448_111 = arith.constant 448 : index
    %104 = vector.load %arg12[%c0_110, %c448_111] : memref<16x576xbf16, #tpu.memory_space<vmem>>, vector<16x64xbf16>
    tpu.vector_store %arg12[%c0_110, %c448_111], %103 {strides = array<i32>} : memref<16x576xbf16, #tpu.memory_space<vmem>>, vector<16x64xbf16>,
    %c2_112 = arith.constant 2 : index
    %c2_113 = arith.constant 2 : index
    %c0_114 = arith.constant 0 : index
    %105 = vector.load %arg11[%c2_112, %c2_113, %c0_114] : memref<6x6x64xf32, #tpu.memory_space<vmem>>, vector<4x4x64xf32>
    %106 = vector.shape_cast %105 : vector<4x4x64xf32> to vector<16x64xf32>
    %107 = arith.truncf %106 : vector<16x64xf32> to vector<16x64xbf16>
    %c0_115 = arith.constant 0 : index
    %c512_116 = arith.constant 512 : index
    %108 = vector.load %arg12[%c0_115, %c512_116] : memref<16x576xbf16, #tpu.memory_space<vmem>>, vector<16x64xbf16>
    tpu.vector_store %arg12[%c0_115, %c512_116], %107 {strides = array<i32>} : memref<16x576xbf16, #tpu.memory_space<vmem>>, vector<16x64xbf16>,
    %c0_117 = arith.constant 0 : index
    %c0_118 = arith.constant 0 : index
    %109 = vector.load %arg12[%c0_117, %c0_118] : memref<16x576xbf16, #tpu.memory_space<vmem>>, vector<16x576xbf16>
    %c0_119 = arith.constant 0 : index
    %c0_120 = arith.constant 0 : index
    %110 = vector.load %arg4[%c0_119, %c0_120] : memref<576x64xbf16, #tpu.memory_space<vmem>>, vector<576x64xbf16>
    %cst_121 = arith.constant dense<0.000000e+00> : vector<16x64xf32>
    %111 = tpu.matmul %109, %110, %cst_121 {dimension_numbers = #tpu.dot_dimension_numbers<[1], [0], [0], [1], [0, 0, 1, 1], [], []>} : vector<16x576xbf16>, vector<576x64xbf16>, vector<16x64xf32> -> vector<16x64xf32>
    %c2_122 = arith.constant 2 : index
    %c0_123 = arith.constant 0 : index
    %112 = vector.load %arg6[%c2_122, %c0_123] : memref<4x64xf32, #tpu.memory_space<vmem>>, vector<1x64xf32>
    %113 = vector.broadcast %112 : vector<1x64xf32> to vector<16x64xf32>
    %114 = arith.mulf %111, %113 : vector<16x64xf32>
    %c2_124 = arith.constant 2 : index
    %c0_125 = arith.constant 0 : index
    %115 = vector.load %arg7[%c2_124, %c0_125] : memref<4x64xf32, #tpu.memory_space<vmem>>, vector<1x64xf32>
    %116 = vector.broadcast %115 : vector<1x64xf32> to vector<16x64xf32>
    %117 = arith.addf %114, %116 : vector<16x64xf32>
    %cst_126 = arith.constant 0.000000e+00 : f32
    %118 = vector.broadcast %cst_126 : f32 to vector<16x64xf32>
    %119 = arith.maximumf %117, %118 : vector<16x64xf32>
    %120 = vector.shape_cast %119 : vector<16x64xf32> to vector<4x4x64xf32>
    %121 = vector.shape_cast %120 : vector<4x4x64xf32> to vector<2x2x2x2x64xf32>
    %cst_127 = arith.constant dense<0xFF800000> : vector<2x2x2x64xf32>
    %122 = vector.multi_reduction <maximumf>, %121, %cst_127 [3] : vector<2x2x2x2x64xf32> to vector<2x2x2x64xf32>
    %cst_128 = arith.constant dense<0xFF800000> : vector<2x2x64xf32>
    %123 = vector.multi_reduction <maximumf>, %122, %cst_128 [1] : vector<2x2x2x64xf32> to vector<2x2x64xf32>
    %cst_129 = arith.constant 0.000000e+00 : f32
    %124 = vector.broadcast %cst_129 : f32 to vector<4x4x64xf32>
    %c0_130 = arith.constant 0 : index
    %c0_131 = arith.constant 0 : index
    %c0_132 = arith.constant 0 : index
    %125 = vector.load %arg13[%c0_130, %c0_131, %c0_132] : memref<4x4x64xf32, #tpu.memory_space<vmem>>, vector<4x4x64xf32>
    tpu.vector_store %arg13[%c0_130, %c0_131, %c0_132], %124 {strides = array<i32>} : memref<4x4x64xf32, #tpu.memory_space<vmem>>, vector<4x4x64xf32>,
    %c1_133 = arith.constant 1 : index
    %c1_134 = arith.constant 1 : index
    %c0_135 = arith.constant 0 : index
    %126 = vector.load %arg13[%c1_133, %c1_134, %c0_135] : memref<4x4x64xf32, #tpu.memory_space<vmem>>, vector<2x2x64xf32>
    tpu.vector_store %arg13[%c1_133, %c1_134, %c0_135], %123 {strides = array<i32>} : memref<4x4x64xf32, #tpu.memory_space<vmem>>, vector<2x2x64xf32>,
    %c0_136 = arith.constant 0 : index
    %c0_137 = arith.constant 0 : index
    %c0_138 = arith.constant 0 : index
    %127 = vector.load %arg13[%c0_136, %c0_137, %c0_138] : memref<4x4x64xf32, #tpu.memory_space<vmem>>, vector<2x2x64xf32>
    %128 = vector.shape_cast %127 : vector<2x2x64xf32> to vector<4x64xf32>
    %129 = arith.truncf %128 : vector<4x64xf32> to vector<4x64xbf16>
    %c0_139 = arith.constant 0 : index
    %c0_140 = arith.constant 0 : index
    %130 = vector.load %arg14[%c0_139, %c0_140] : memref<4x576xbf16, #tpu.memory_space<vmem>>, vector<4x64xbf16>
    tpu.vector_store %arg14[%c0_139, %c0_140], %129 {strides = array<i32>} : memref<4x576xbf16, #tpu.memory_space<vmem>>, vector<4x64xbf16>,
    %c0_141 = arith.constant 0 : index
    %c1_142 = arith.constant 1 : index
    %c0_143 = arith.constant 0 : index
    %131 = vector.load %arg13[%c0_141, %c1_142, %c0_143] : memref<4x4x64xf32, #tpu.memory_space<vmem>>, vector<2x2x64xf32>
    %132 = vector.shape_cast %131 : vector<2x2x64xf32> to vector<4x64xf32>
    %133 = arith.truncf %132 : vector<4x64xf32> to vector<4x64xbf16>
    %c0_144 = arith.constant 0 : index
    %c64_145 = arith.constant 64 : index
    %134 = vector.load %arg14[%c0_144, %c64_145] : memref<4x576xbf16, #tpu.memory_space<vmem>>, vector<4x64xbf16>
    tpu.vector_store %arg14[%c0_144, %c64_145], %133 {strides = array<i32>} : memref<4x576xbf16, #tpu.memory_space<vmem>>, vector<4x64xbf16>,
    %c0_146 = arith.constant 0 : index
    %c2_147 = arith.constant 2 : index
    %c0_148 = arith.constant 0 : index
    %135 = vector.load %arg13[%c0_146, %c2_147, %c0_148] : memref<4x4x64xf32, #tpu.memory_space<vmem>>, vector<2x2x64xf32>
    %136 = vector.shape_cast %135 : vector<2x2x64xf32> to vector<4x64xf32>
    %137 = arith.truncf %136 : vector<4x64xf32> to vector<4x64xbf16>
    %c0_149 = arith.constant 0 : index
    %c128_150 = arith.constant 128 : index
    %138 = vector.load %arg14[%c0_149, %c128_150] : memref<4x576xbf16, #tpu.memory_space<vmem>>, vector<4x64xbf16>
    tpu.vector_store %arg14[%c0_149, %c128_150], %137 {strides = array<i32>} : memref<4x576xbf16, #tpu.memory_space<vmem>>, vector<4x64xbf16>,
    %c1_151 = arith.constant 1 : index
    %c0_152 = arith.constant 0 : index
    %c0_153 = arith.constant 0 : index
    %139 = vector.load %arg13[%c1_151, %c0_152, %c0_153] : memref<4x4x64xf32, #tpu.memory_space<vmem>>, vector<2x2x64xf32>
    %140 = vector.shape_cast %139 : vector<2x2x64xf32> to vector<4x64xf32>
    %141 = arith.truncf %140 : vector<4x64xf32> to vector<4x64xbf16>
    %c0_154 = arith.constant 0 : index
    %c192_155 = arith.constant 192 : index
    %142 = vector.load %arg14[%c0_154, %c192_155] : memref<4x576xbf16, #tpu.memory_space<vmem>>, vector<4x64xbf16>
    tpu.vector_store %arg14[%c0_154, %c192_155], %141 {strides = array<i32>} : memref<4x576xbf16, #tpu.memory_space<vmem>>, vector<4x64xbf16>,
    %c1_156 = arith.constant 1 : index
    %c1_157 = arith.constant 1 : index
    %c0_158 = arith.constant 0 : index
    %143 = vector.load %arg13[%c1_156, %c1_157, %c0_158] : memref<4x4x64xf32, #tpu.memory_space<vmem>>, vector<2x2x64xf32>
    %144 = vector.shape_cast %143 : vector<2x2x64xf32> to vector<4x64xf32>
    %145 = arith.truncf %144 : vector<4x64xf32> to vector<4x64xbf16>
    %c0_159 = arith.constant 0 : index
    %c256_160 = arith.constant 256 : index
    %146 = vector.load %arg14[%c0_159, %c256_160] : memref<4x576xbf16, #tpu.memory_space<vmem>>, vector<4x64xbf16>
    tpu.vector_store %arg14[%c0_159, %c256_160], %145 {strides = array<i32>} : memref<4x576xbf16, #tpu.memory_space<vmem>>, vector<4x64xbf16>,
    %c1_161 = arith.constant 1 : index
    %c2_162 = arith.constant 2 : index
    %c0_163 = arith.constant 0 : index
    %147 = vector.load %arg13[%c1_161, %c2_162, %c0_163] : memref<4x4x64xf32, #tpu.memory_space<vmem>>, vector<2x2x64xf32>
    %148 = vector.shape_cast %147 : vector<2x2x64xf32> to vector<4x64xf32>
    %149 = arith.truncf %148 : vector<4x64xf32> to vector<4x64xbf16>
    %c0_164 = arith.constant 0 : index
    %c320_165 = arith.constant 320 : index
    %150 = vector.load %arg14[%c0_164, %c320_165] : memref<4x576xbf16, #tpu.memory_space<vmem>>, vector<4x64xbf16>
    tpu.vector_store %arg14[%c0_164, %c320_165], %149 {strides = array<i32>} : memref<4x576xbf16, #tpu.memory_space<vmem>>, vector<4x64xbf16>,
    %c2_166 = arith.constant 2 : index
    %c0_167 = arith.constant 0 : index
    %c0_168 = arith.constant 0 : index
    %151 = vector.load %arg13[%c2_166, %c0_167, %c0_168] : memref<4x4x64xf32, #tpu.memory_space<vmem>>, vector<2x2x64xf32>
    %152 = vector.shape_cast %151 : vector<2x2x64xf32> to vector<4x64xf32>
    %153 = arith.truncf %152 : vector<4x64xf32> to vector<4x64xbf16>
    %c0_169 = arith.constant 0 : index
    %c384_170 = arith.constant 384 : index
    %154 = vector.load %arg14[%c0_169, %c384_170] : memref<4x576xbf16, #tpu.memory_space<vmem>>, vector<4x64xbf16>
    tpu.vector_store %arg14[%c0_169, %c384_170], %153 {strides = array<i32>} : memref<4x576xbf16, #tpu.memory_space<vmem>>, vector<4x64xbf16>,
    %c2_171 = arith.constant 2 : index
    %c1_172 = arith.constant 1 : index
    %c0_173 = arith.constant 0 : index
    %155 = vector.load %arg13[%c2_171, %c1_172, %c0_173] : memref<4x4x64xf32, #tpu.memory_space<vmem>>, vector<2x2x64xf32>
    %156 = vector.shape_cast %155 : vector<2x2x64xf32> to vector<4x64xf32>
    %157 = arith.truncf %156 : vector<4x64xf32> to vector<4x64xbf16>
    %c0_174 = arith.constant 0 : index
    %c448_175 = arith.constant 448 : index
    %158 = vector.load %arg14[%c0_174, %c448_175] : memref<4x576xbf16, #tpu.memory_space<vmem>>, vector<4x64xbf16>
    tpu.vector_store %arg14[%c0_174, %c448_175], %157 {strides = array<i32>} : memref<4x576xbf16, #tpu.memory_space<vmem>>, vector<4x64xbf16>,
    %c2_176 = arith.constant 2 : index
    %c2_177 = arith.constant 2 : index
    %c0_178 = arith.constant 0 : index
    %159 = vector.load %arg13[%c2_176, %c2_177, %c0_178] : memref<4x4x64xf32, #tpu.memory_space<vmem>>, vector<2x2x64xf32>
    %160 = vector.shape_cast %159 : vector<2x2x64xf32> to vector<4x64xf32>
    %161 = arith.truncf %160 : vector<4x64xf32> to vector<4x64xbf16>
    %c0_179 = arith.constant 0 : index
    %c512_180 = arith.constant 512 : index
    %162 = vector.load %arg14[%c0_179, %c512_180] : memref<4x576xbf16, #tpu.memory_space<vmem>>, vector<4x64xbf16>
    tpu.vector_store %arg14[%c0_179, %c512_180], %161 {strides = array<i32>} : memref<4x576xbf16, #tpu.memory_space<vmem>>, vector<4x64xbf16>,
    %c0_181 = arith.constant 0 : index
    %c0_182 = arith.constant 0 : index
    %163 = vector.load %arg14[%c0_181, %c0_182] : memref<4x576xbf16, #tpu.memory_space<vmem>>, vector<4x576xbf16>
    %c0_183 = arith.constant 0 : index
    %c0_184 = arith.constant 0 : index
    %164 = vector.load %arg5[%c0_183, %c0_184] : memref<576x64xbf16, #tpu.memory_space<vmem>>, vector<576x64xbf16>
    %cst_185 = arith.constant dense<0.000000e+00> : vector<4x64xf32>
    %165 = tpu.matmul %163, %164, %cst_185 {dimension_numbers = #tpu.dot_dimension_numbers<[1], [0], [0], [1], [0, 0, 1, 1], [], []>} : vector<4x576xbf16>, vector<576x64xbf16>, vector<4x64xf32> -> vector<4x64xf32>
    %c3 = arith.constant 3 : index
    %c0_186 = arith.constant 0 : index
    %166 = vector.load %arg6[%c3, %c0_186] : memref<4x64xf32, #tpu.memory_space<vmem>>, vector<1x64xf32>
    %167 = vector.broadcast %166 : vector<1x64xf32> to vector<4x64xf32>
    %168 = arith.mulf %165, %167 : vector<4x64xf32>
    %c3_187 = arith.constant 3 : index
    %c0_188 = arith.constant 0 : index
    %169 = vector.load %arg7[%c3_187, %c0_188] : memref<4x64xf32, #tpu.memory_space<vmem>>, vector<1x64xf32>
    %170 = vector.broadcast %169 : vector<1x64xf32> to vector<4x64xf32>
    %171 = arith.addf %168, %170 : vector<4x64xf32>
    %cst_189 = arith.constant 0.000000e+00 : f32
    %172 = vector.broadcast %cst_189 : f32 to vector<4x64xf32>
    %173 = arith.maximumf %171, %172 : vector<4x64xf32>
    %174 = vector.shape_cast %173 : vector<4x64xf32> to vector<2x2x64xf32>
    %175 = vector.shape_cast %174 : vector<2x2x64xf32> to vector<1x2x1x2x64xf32>
    %cst_190 = arith.constant dense<0xFF800000> : vector<1x2x1x64xf32>
    %176 = vector.multi_reduction <maximumf>, %175, %cst_190 [3] : vector<1x2x1x2x64xf32> to vector<1x2x1x64xf32>
    %cst_191 = arith.constant dense<0xFF800000> : vector<1x1x64xf32>
    %177 = vector.multi_reduction <maximumf>, %176, %cst_191 [1] : vector<1x2x1x64xf32> to vector<1x1x64xf32>
    %178 = vector.shape_cast %177 : vector<1x1x64xf32> to vector<1x64xf32>
    %c0_192 = arith.constant 0 : index
    %c0_193 = arith.constant 0 : index
    %c0_194 = arith.constant 0 : index
    %179 = vector.load %arg8[%c0_192, %c0_193, %c0_194] : memref<1x1x64xf32, #tpu.memory_space<vmem>>, vector<1x1x64xf32>
    %180 = vector.shape_cast %179 : vector<1x1x64xf32> to vector<1x64xf32>
    %181 = vector.shape_cast %178 : vector<1x64xf32> to vector<1x1x64xf32>
    tpu.vector_store %arg8[%c0_192, %c0_193, %c0_194], %181 {strides = array<i32>} : memref<1x1x64xf32, #tpu.memory_space<vmem>>, vector<1x1x64xf32>,
    return
  }
  func.func @transform_0(%arg0: i32) -> (i32, i32, i32) {
    %c0_i32 = arith.constant 0 : i32
    %c0_i32_0 = arith.constant 0 : i32
    %c0_i32_1 = arith.constant 0 : i32
    return %arg0, %c0_i32, %c0_i32_0 : i32, i32, i32
  }
  func.func @transform_1(%arg0: i32) -> (i32, i32) {
    %c0_i32 = arith.constant 0 : i32
    %c0_i32_0 = arith.constant 0 : i32
    %c0_i32_1 = arith.constant 0 : i32
    return %c0_i32, %c0_i32_0 : i32, i32
  }
  func.func @transform_2(%arg0: i32) -> (i32, i32) {
    %c0_i32 = arith.constant 0 : i32
    %c0_i32_0 = arith.constant 0 : i32
    %c0_i32_1 = arith.constant 0 : i32
    return %c0_i32, %c0_i32_0 : i32, i32
  }
  func.func @transform_3(%arg0: i32) -> (i32, i32) {
    %c0_i32 = arith.constant 0 : i32
    %c0_i32_0 = arith.constant 0 : i32
    %c0_i32_1 = arith.constant 0 : i32
    return %c0_i32, %c0_i32_0 : i32, i32
  }
  func.func @transform_4(%arg0: i32) -> (i32, i32) {
    %c0_i32 = arith.constant 0 : i32
    %c0_i32_0 = arith.constant 0 : i32
    %c0_i32_1 = arith.constant 0 : i32
    return %c0_i32, %c0_i32_0 : i32, i32
  }
  func.func @transform_5(%arg0: i32) -> (i32, i32) {
    %c0_i32 = arith.constant 0 : i32
    %c0_i32_0 = arith.constant 0 : i32
    %c0_i32_1 = arith.constant 0 : i32
    return %c0_i32, %c0_i32_0 : i32, i32
  }
  func.func @transform_6(%arg0: i32) -> (i32, i32) {
    %c0_i32 = arith.constant 0 : i32
    %c0_i32_0 = arith.constant 0 : i32
    %c0_i32_1 = arith.constant 0 : i32
    return %c0_i32, %c0_i32_0 : i32, i32
  }
  func.func @transform_7(%arg0: i32) -> (i32, i32, i32) {
    %c0_i32 = arith.constant 0 : i32
    %c0_i32_0 = arith.constant 0 : i32
    %c0_i32_1 = arith.constant 0 : i32
    return %arg0, %c0_i32, %c0_i32_0 : i32, i32, i32
  }
}

</mosaic_0001>

<bundles_post_ra>
// kernel: net_forward.1
= control target key start
LH: loop header
LB: loop body
LE: loop exit
PB: predicated region body
PF: predicated region fallthrough
CT: control target
= control target key end

     0   :  { %12 = vsyncpa [#allocation9], 0  ;;  %s7759_s0 = inlined_call_operand.vmem [shape: bf16[2,256,32], index: 0, kind: input, shape index: {}]   ;;  %s7760_s1 = inlined_call_operand.vmem [shape: bf16[32,64], index: 1, kind: input, shape index: {}]   ;;  %s7761_s2 = inlined_call_operand.vmem [shape: bf16[576,64], index: 2, kind: input, shape index: {}]   ;;  %s7762_s3 = inlined_call_operand.vmem [shape: bf16[576,64], index: 3, kind: input, shape index: {}]   ;;  %s7763_s4 = inlined_call_operand.vmem [shape: bf16[576,64], index: 4, kind: input, shape index: {}]   ;;  %s7764_s5 = inlined_call_operand.vmem [shape: f32[4,64], index: 5, kind: input, shape index: {}]   ;;  %s7765_s6 = inlined_call_operand.vmem [shape: f32[4,64], index: 6, kind: input, shape index: {}]   ;;  %s7766_s7 = inlined_call_operand.hbm [shape: f32[2,1,64], index: 7, kind: output, shape index: {}]  }
   0x1   :  { %14 = vsyncpa [#allocation9 + $0x1], 0  ;;  %s6137_s24 = smov 0   ;;  %s6139_s25 = smov 0  }
   0x2   :  { %s6141_s26 = smov 0   ;;  %s6143_s27 = smov 0  }
   0x3 LB: > { %s6158_s28 = sadd.s32 4294967295, %s6090_s27   ;;  %s5371_s29 = sadd.s32 4294967294, %s6090_s27   ;;  %s6090_s27 = sphi %s6143_s27, %s7772_s27   ;;  %s6086_s26 = sphi %s6141_s26, %s7771_s26   ;;  %s6082_s25 = sphi %s6139_s25, %s7770_s25   ;;  %s6078_s24 = sphi %s6137_s24, %s7769_s24  }
   0x4   : > { %s6162_s30 = sadd.s32 1, %s6090_s27   ;;  %s179_s8 = sadd.s32 1, %s6086_s26 }
   0x5   : > { %s176_s9 = ssub.s32 %s6090_s27, %s6162_s30  ;;  %p189_p0 = scmp.ne.s32.totalorder %s6086_s26, %s6082_s25 }
   0x6   : > { %p177_p1 = scmp.eq.s32.totalorder %s176_s9, 0  ;;  %p190_p2 = scmp.eq.s32.totalorder %s6158_s28, 1 }
   0x7   : > { %p195_p3 = scmp.ne.s32.totalorder %s6082_s25, %s6078_s24  ;;  %p196_p4 = scmp.eq.s32.totalorder %s5371_s29, 1 }
   0x8   : > { %s6173_s10 = scalar_select %p177_p1, %s6086_s26, %s179_s8  }
   0x9   : > { %p6175_p5 = por %p190_p2, %p189_p0  ;;  %p6179_p6 = por %p196_p4, %p195_p3 }
   0xa   : > { %p5374_p7 = scmp.ge.s32.totalorder %s6090_s27, 1  ;;  %p240_p8 = scmp.lt.s32.totalorder %s6090_s27, 3 }
   0xc   : > { %p241_p9 = pnand %p5374_p7, %p240_p8 }
   0xd   : > { %v5861_v0 = vld [vmem:[%s7760_s1] sm:$0xff] (!%p241_p9)   ;;  %p271_p10 = scmp.lt.s32.totalorder (!%p241_p9), %s6158_s28, 1  ;;  %v5862_v1 = vld [vmem:[%s7760_s1 + $0x8] sm:$0xff] (!%p241_p9)   ;;  %vm405_vm0 = vcmask (!%p241_p9), 261120   ;;  %vm1425_vm1 = vcmask (!%p241_p9), 517120   ;;  %vm2322_vm2 = vcmask (!%p241_p9), 523264   ;;  %v757_v21 = vlaneseq (!%p241_p9) }
   0xe   : > { %244 = sbr.rel (%p241_p9) target bundleno = 1877 (0x755), region = 48  ;;  %5742 = vmatprep.subr.bf16.mxu0 (!%p241_p9), %v5861_v0  ;;  %v6092_v18 = vmov (!%p241_p9), 0.0   ;;  %v6093_v19 = vmov (!%p241_p9), 1983009808   ;;  %v6273_v22 = vld [vmem:[%s7764_s5] ss:$0 sm:$0xff] (!%p241_p9) }
   0xf   : > { %5743 = vmatpush3.bf16.msra.mxu0 (!%p241_p9), %v5861_v0  ;;  %2517 = vst.msk [vmem:[#allocation2 + $0x10] sm:$0xff] (!%p241_p9), %vm2322_vm2, %v6092_v18  ;;  %2515 = vst.msk [vmem:[#allocation2] sm:$0xff] (!%p241_p9), %vm2322_vm2, %v6092_v18  ;;  %v755_v20 = vunpack.c.l.s4 (!%p241_p9), %v6093_v19  ;;  %v758_v24 = vshrl.u32 (!%p241_p9), %v757_v21, 7  ;;  %v6278_v26 = vld [vmem:[%s7765_s6] ss:$0 sm:$0xff] (!%p241_p9)  ;;  %vm2599_vm3 = vcmask (!%p241_p9), 1041409  }
  0x10   : > { %5744 = vmatprep.subr.bf16.mxu0 (!%p241_p9), %v5862_v1  ;;  %2518 = vst.msk [vmem:[#allocation2 + $0x18] sm:$0x3] (!%p241_p9), %vm1425_vm1, %v6092_v18  ;;  %2516 = vst.msk [vmem:[#allocation2 + $0x8] sm:$0x3] (!%p241_p9), %vm1425_vm1, %v6092_v18  ;;  %vm2601_vm4 = vcmask (!%p241_p9), 1042434   ;;  %vm2603_vm5 = vcmask (!%p241_p9), 1043459  }
  0x11   : > { %2519 = vst.msk [vmem:[#allocation2 + $0x20] sm:$0xff] (!%p241_p9), %vm2322_vm2, %v6092_v18  ;;  %2521 = vst.msk [vmem:[#allocation2 + $0x30] sm:$0xff] (!%p241_p9), %vm2322_vm2, %v6092_v18  ;;  %v756_v23 = vunpack.c.0.s8 (!%p241_p9), %v755_v20  ;;  %vm2605_vm6 = vcmask (!%p241_p9), 1044484   ;;  %vm2607_vm7 = vcmask (!%p241_p9), 1045509   ;;  %vm2609_vm8 = vcmask (!%p241_p9), 1046534   ;;  %s269_s29 = sand.u32 (!%p241_p9), 1, %s6082_s25  }
  0x12   : > { %2520 = vst.msk [vmem:[#allocation2 + $0x28] sm:$0x3] (!%p241_p9), %vm1425_vm1, %v6092_v18  ;;  %2522 = vst.msk [vmem:[#allocation2 + $0x38] sm:$0x3] (!%p241_p9), %vm1425_vm1, %v6092_v18  ;;  %vm2611_vm9 = vcmask (!%p241_p9), 1047559   ;;  %vm2723_vm10 = vcmask (!%p241_p9), 1048064  }
  0x13   : > { %5745 = vmatpush3.bf16.msra.mxu0 (!%p241_p9), %v5862_v1  ;;  %2523 = vst.msk [vmem:[#allocation2 + $0x40] sm:$0xff] (!%p241_p9), %vm2322_vm2, %v6092_v18  ;;  %2525 = vst.msk [vmem:[#allocation2 + $0x50] sm:$0xff] (!%p241_p9), %vm2322_vm2, %v6092_v18  ;;  %v6283_v32 = vsub.s32 (!%p241_p9), %v756_v23, %v758_v24  ;;  %vm3886_vm11 = vcmask (!%p241_p9), 521216   ;;  %vm3926_vm12 = vcmask (!%p241_p9), 519168   ;;  %vm6095_vm13 = vmmov (!%p241_p9), 0   ;;  %s5534_s8 = sshll.u32 (!%p241_p9), %s6158_s28, 4 }
  0x14   : > { %2524 = vst.msk [vmem:[#allocation2 + $0x48] sm:$0x3] (!%p241_p9), %vm1425_vm1, %v6092_v18  ;;  %2526 = vst.msk [vmem:[#allocation2 + $0x58] sm:$0x3] (!%p241_p9), %vm1425_vm1, %v6092_v18  ;;  %vm4676_vm14 = vcmask (!%p241_p9), 1041920   ;;  %vm5301_vm15 = vcmask (!%p241_p9), 516096   ;;  %s7717_s15 = scalar_lea.hbm (!%p241_p9), %s7766_s7, %s5534_s8 }
  0x15   : > { %s272_s17 = scalar_select %p271_p10, %s6158_s28, 1  ;;  %2527 = vst.msk [vmem:[#allocation2 + $0x60] sm:$0xff] %vm2322_vm2, %v6092_v18  ;;  %2529 = vst.msk [vmem:[#allocation2 + $0x70] sm:$0xff] %vm2322_vm2, %v6092_v18 }
  0x16   : > { %2528 = vst.msk [vmem:[#allocation2 + $0x68] sm:$0x3] %vm1425_vm1, %v6092_v18  ;;  %2530 = vst.msk [vmem:[#allocation2 + $0x78] sm:$0x3] %vm1425_vm1, %v6092_v18  ;;  %s5304_s28 = scalar_lea.sflag [#allocation9], %s269_s29 }
  0x17   : > { %s5537_s18 = sshll.u32 %s272_s17, 7  ;;  %2531 = vst.msk [vmem:[#allocation2 + $0x80] sm:$0xff] %vm2322_vm2, %v6092_v18  ;;  %2533 = vst.msk [vmem:[#allocation2 + $0x90] sm:$0xff] %vm2322_vm2, %v6092_v18  ;;  %s6096_s17 = smov [#allocation8]  }
  0x18   : > { %s6196_s21 = scalar_lea.vmem %s7759_s0, %s5537_s18  ;;  %2532 = vst.msk [vmem:[#allocation2 + $0x88] sm:$0x3] %vm1425_vm1, %v6092_v18  ;;  %2534 = vst.msk [vmem:[#allocation2 + $0x98] sm:$0x3] %vm1425_vm1, %v6092_v18  ;;  %s6094_s18 = smov 64  }
  0x19   : > { %v5863_v2 = vld [vmem:[%s6196_s21] sm:$0xff]   ;;  %v5864_v3 = vld [vmem:[%s6196_s21 + $0x8] sm:$0xff]   ;;  %v5865_v4 = vld [vmem:[%s6196_s21 + $0x10] sm:$0xff]   ;;  %3888 = vst.msk [vmem:[#allocation4 + $0x8] sm:$0x3f] %vm3886_vm11, %v6092_v18  ;;  %s6032_s19 = sshll.u32 %s6096_s17, 4  ;;  %s6033_s19 = int_to_ptr.vmem [resolvable:$false] %s6032_s19 }
  0x1a   : > { %5746 = vmatprep.mubr.msk.bf16.mxu0 %vm405_vm0, %v5863_v2  ;;  %v5866_v5 = vld [vmem:[%s6196_s21 + $0x18] sm:$0xff]   ;;  %v5867_v6 = vld [vmem:[%s6196_s21 + $0x20] sm:$0xff]   ;;  %v5868_v7 = vld [vmem:[%s6196_s21 + $0x28] sm:$0xff]   ;;  %3887 = vst.msk [vmem:[#allocation4] sm:$0x3f] %vm3886_vm11, %v6092_v18  ;;  %s6034_s20 = scalar_lea.vmem %s6033_s19, 32 }
  0x1b   : > { %5747 = vmatmul.mubr.msk.bf16.vlgmr.msra.gmra.mrb[0].mxu0 %vm405_vm0, %v5864_v3  ;;  %v5869_v8 = vld [vmem:[%s6196_s21 + $0x30] sm:$0xff]   ;;  %v5870_v9 = vld [vmem:[%s6196_s21 + $0x38] sm:$0xff]   ;;  %v5871_v10 = vld [vmem:[%s6196_s21 + $0x40] sm:$0xff]   ;;  %3889 = vst.msk [vmem:[#allocation4 + $0x10] sm:$0x3f] %vm3886_vm11, %v6092_v18 }
  0x1c   : > { %5750 = vmatprep.mubr.msk.bf16.mxu0 %vm405_vm0, %v5865_v4  ;;  %v5872_v11 = vld [vmem:[%s6196_s21 + $0x48] sm:$0xff]   ;;  %v5873_v12 = vld [vmem:[%s6196_s21 + $0x50] sm:$0xff]   ;;  %v5874_v13 = vld [vmem:[%s6196_s21 + $0x58] sm:$0xff]   ;;  %3890 = vst.msk [vmem:[#allocation4 + $0x18] sm:$0x3f] %vm3886_vm11, %v6092_v18 }
  0x1d   : > { %v5875_v14 = vld [vmem:[%s6196_s21 + $0x60] sm:$0xff]   ;;  %v5876_v15 = vld [vmem:[%s6196_s21 + $0x68] sm:$0xff]   ;;  %v5877_v16 = vld [vmem:[%s6196_s21 + $0x70] sm:$0xff]   ;;  %3891 = vst.msk [vmem:[#allocation4 + $0x20] sm:$0x3f] %vm3886_vm11, %v6092_v18 }
  0x1e   : > { %v5878_v17 = vld [vmem:[%s6196_s21 + $0x78] sm:$0xff]   ;;  %3892 = vst.msk [vmem:[#allocation4 + $0x28] sm:$0x3f] %vm3886_vm11, %v6092_v18 }
  0x1f   : > { %4621 = vst.msk [vmem:[#allocation6] sm:$0xf] %vm3926_vm12, %v6092_v18  ;;  %4622 = vst.msk [vmem:[#allocation6 + $0x4] sm:$0xf] %vm3926_vm12, %v6092_v18 }
  0x20   : > { %4623 = vst.msk [vmem:[#allocation6 + $0x8] sm:$0xf] %vm3926_vm12, %v6092_v18  ;;  %4624 = vst.msk [vmem:[#allocation6 + $0xc] sm:$0xf] %vm3926_vm12, %v6092_v18 }
  0x23   : > { %5751 = vmatmul.mubr.msk.bf16.gmra.mrb[4].mxu0 %vm405_vm0, %v5866_v5 }
  0x24   : > { %5754 = vmatprep.mubr.msk.bf16.mxu0 %vm405_vm0, %v5867_v6 }
  0x2b   : > { %5755 = vmatmul.mubr.msk.bf16.gmra.mrb[8].mxu0 %vm405_vm0, %v5868_v7 }
  0x2c   : > { %5758 = vmatprep.mubr.msk.bf16.mxu0 %vm405_vm0, %v5869_v8 }
  0x33   : > { %5759 = vmatmul.mubr.msk.bf16.gmra.mrb[12].mxu0 %vm405_vm0, %v5870_v9 }
  0x34   : > { %5762 = vmatprep.mubr.msk.bf16.mxu0 %vm405_vm0, %v5871_v10 }
  0x3b   : > { %5763 = vmatmul.mubr.msk.bf16.gmra.mrb[16].mxu0 %vm405_vm0, %v5872_v11 }
  0x3c   : > { %5766 = vmatprep.mubr.msk.bf16.mxu0 %vm405_vm0, %v5873_v12 }
  0x43   : > { %5767 = vmatmul.mubr.msk.bf16.gmra.mrb[20].mxu0 %vm405_vm0, %v5874_v13 }
  0x44   : > { %5770 = vmatprep.mubr.msk.bf16.mxu0 %vm405_vm0, %v5875_v14 }
  0x4b   : > { %5771 = vmatmul.mubr.msk.bf16.gmra.mrb[24].mxu0 %vm405_vm0, %v5876_v15 }
  0x4c   : > { %5774 = vmatprep.mubr.msk.bf16.mxu0 %vm405_vm0, %v5877_v16 }
  0x53   : > { %5775 = vmatmul.mubr.msk.bf16.gmra.mrb[28].mxu0 %vm405_vm0, %v5878_v17 }
  0xee   : > { %v5748_v25 = vpop.f32.mrb[0].mxu0 }
  0xef   : > { %v622_v27 = vmul.f32 %v5748_v25, %v6273_v22  ;;  %v488_v28 = vpop.f32.mrb[1].mxu0 }
  0xf0   : > { %v620_v29 = vmul.f32 %v6273_v22, %v488_v28  ;;  %v5749_v30 = vpop.f32.mrb[2].mxu0 }
  0xf1   : > { %v659_v31 = vadd.f32 %v6278_v26, %v622_v27  ;;  %v623_v33 = vmul.f32 %v5749_v30, %v6273_v22  ;;  %v491_v34 = vpop.f32.mrb[3].mxu0 }
  0xf2   : > { %v657_v35 = vadd.f32 %v6278_v26, %v620_v29  ;;  %v621_v36 = vmul.f32 %v6273_v22, %v491_v34 }
  0xf3   : > { %v691_v37 = vmax.f32 %v659_v31, 0.0  ;;  %v660_v38 = vadd.f32 %v6278_v26, %v623_v33 }
  0xf4   : > { %v689_v39 = vmax.f32 %v657_v35, 0.0  ;;  %v658_v40 = vadd.f32 %v6278_v26, %v621_v36 }
  0xf5   : > { %v787_v41 = vcombine.high %v691_v37, %v691_v37  ;;  %v794_v42 = vrot.slane %v691_v37, %v6283_v32  ;;  %v6291_v43 = vmax.f32 %v660_v38, 0.0 }
  0xf6   : > { %v753_v44 = vcombine.high %v689_v39, %v689_v39  ;;  %v760_v45 = vrot.slane %v689_v39, %v6283_v32  ;;  %v6294_v46 = vmax.f32 %v658_v40, 0.0  ;;  %v6296_v47 = vpop.f32.mrb[4].mxu0 }
  0xf7   : > { %v801_v48 = vrot.slane %v787_v41, %v6283_v32  ;;  %v802_v49 = vcombine.high %v794_v42, %v794_v42  ;;  %v1482_v50 = vsel %vm1425_vm1, %v794_v42, -inf  ;;  %v804_v51 = vcombine.high %v6291_v43, %v6291_v43  ;;  %v6302_v52 = vpop.f32.mrb[5].mxu0 }
  0xf8   : > { %v1483_v53 = vrot.slane %v1482_v50, 4  ;;  %v767_v54 = vrot.slane %v753_v44, %v6283_v32  ;;  %v768_v55 = vcombine.high %v760_v45, %v760_v45  ;;  %v1426_v56 = vsel %vm1425_vm1, %v760_v45, -inf  ;;  %v6306_v57 = vpop.f32.mrb[6].mxu0 }
  0xf9   : > { %v803_v58 = vcombine.high %v801_v48, %v801_v48  ;;  %v1489_v59 = vsel %vm1425_vm1, %v802_v49, -inf  ;;  %v1496_v60 = vsel %vm1425_vm1, %v801_v48, -inf  ;;  %v1427_v61 = vrot.slane %v1426_v56, 4  ;;  %v6310_v62 = vpop.f32.mrb[7].mxu0 }
  0xfa   : > { %v1484_v63 = vmax.f32 %v1482_v50, %v1483_v53  ;;  %v1490_v0 = vrot.slane %v1489_v59, 4  ;;  %v1497_v1 = vrot.slane %v1496_v60, 4  ;;  %v769_v2 = vcombine.high %v767_v54, %v767_v54 }
  0xfb   : > { %v1503_v3 = vsel %vm1425_vm1, %v803_v58, -inf  ;;  %v1428_v4 = vmax.f32 %v1426_v56, %v1427_v61  ;;  %v1433_v5 = vsel %vm1425_vm1, %v768_v55, -inf  ;;  %v1440_v6 = vsel %vm1425_vm1, %v767_v54, -inf }
  0xfc   : > { %v1485_v7 = vrot.slane %v1484_v63, 2  ;;  %v1491_v8 = vmax.f32 %v1489_v59, %v1490_v0  ;;  %v1498_v9 = vmax.f32 %v1496_v60, %v1497_v1  ;;  %v1504_v10 = vrot.slane %v1503_v3, 4 }
  0xfd   : > { %v1429_v11 = vrot.slane %v1428_v4, 2  ;;  %v1434_v12 = vrot.slane %v1433_v5, 4  ;;  %v1441_v13 = vrot.slane %v1440_v6, 4  ;;  %v1447_v14 = vsel %vm1425_vm1, %v769_v2, -inf }
  0xfe   : > { %v1486_v15 = vmax.f32 %v1484_v63, %v1485_v7  ;;  %v1492_v16 = vrot.slane %v1491_v8, 2  ;;  %v1499_v17 = vrot.slane %v1498_v9, 2  ;;  %v1505_v19 = vmax.f32 %v1503_v3, %v1504_v10  ;;  %v6316_v20 = vpop.f32.mrb[8].mxu0 }
  0xff   : > { %v1430_v21 = vmax.f32 %v1428_v4, %v1429_v11  ;;  %v1435_v23 = vmax.f32 %v1433_v5, %v1434_v12  ;;  %v1442_v24 = vmax.f32 %v1440_v6, %v1441_v13  ;;  %v1448_v25 = vrot.slane %v1447_v14, 4  ;;  %v6318_v27 = vpop.f32.mrb[9].mxu0 }
 0x100   : > { %v1487_v28 = vrot.slane %v1486_v15, 1  ;;  %v1493_v29 = vmax.f32 %v1491_v8, %v1492_v16  ;;  %v1500_v30 = vmax.f32 %v1498_v9, %v1499_v17  ;;  %v1506_v31 = vrot.slane %v1505_v19, 2  ;;  %v6320_v33 = vpop.f32.mrb[10].mxu0 }
 0x101   : > { %v1431_v34 = vrot.slane %v1430_v21, 1  ;;  %v1436_v35 = vrot.slane %v1435_v23, 2  ;;  %v1443_v36 = vrot.slane %v1442_v24, 2  ;;  %v1449_v37 = vmax.f32 %v1447_v14, %v1448_v25  ;;  %v6322_v38 = vpop.f32.mrb[11].mxu0 }
 0x102   : > { %v1488_v39 = vmax.f32 %v1486_v15, %v1487_v28  ;;  %v1494_v40 = vrot.slane %v1493_v29, 1  ;;  %v1501_v41 = vrot.slane %v1500_v30, 1  ;;  %v1507_v42 = vmax.f32 %v1505_v19, %v1506_v31 }
 0x103   : > { %v1432_v44 = vmax.f32 %v1430_v21, %v1431_v34  ;;  %v1437_v45 = vmax.f32 %v1435_v23, %v1436_v35  ;;  %v1444_v48 = vmax.f32 %v1442_v24, %v1443_v36  ;;  %v1450_v49 = vrot.slane %v1449_v37, 2 }
 0x104   : > { %v1495_v50 = vmax.f32 %v1493_v29, %v1494_v40  ;;  %v1502_v53 = vmax.f32 %v1500_v30, %v1501_v41  ;;  %v1508_v54 = vrot.slane %v1507_v42, 1  ;;  %v2324_v55 = vsel %vm2322_vm2, %v1488_v39, -inf }
 0x105   : > { %v1438_v56 = vrot.slane %v1437_v45, 1  ;;  %v1445_v58 = vrot.slane %v1444_v48, 1  ;;  %v1451_v59 = vmax.f32 %v1449_v37, %v1450_v49  ;;  %v2323_v60 = vsel %vm2322_vm2, %v1432_v44, -inf }
 0x106   : > { %v1509_v61 = vmax.f32 %v1507_v42, %v1508_v54  ;;  %v2327_v63 = vsel %vm2322_vm2, %v1495_v50, -inf  ;;  %v2330_v0 = vsel %vm2322_vm2, %v1502_v53, -inf  ;;  %v2325_v1 = vmax.f32 %v2323_v60, %v2324_v55  ;;  %v6328_v2 = vpop.f32.mrb[12].mxu0 }
 0x107   : > { %v1439_v3 = vmax.f32 %v1437_v45, %v1438_v56  ;;  %v1446_v4 = vmax.f32 %v1444_v48, %v1445_v58  ;;  %v1452_v5 = vrot.slane %v1451_v59, 1  ;;  %v811_v6 = vrot.slane %v6291_v43, %v6283_v32  ;;  %v6332_v7 = vpop.f32.mrb[13].mxu0 }
 0x108   : > { %v6335_v8 = vsel %vm2322_vm2, %v1509_v61, -inf  ;;  %v818_v9 = vrot.slane %v804_v51, %v6283_v32  ;;  %v770_v10 = vcombine.high %v6294_v46, %v6294_v46  ;;  %v777_v11 = vrot.slane %v6294_v46, %v6283_v32  ;;  %v6345_v12 = vpop.f32.mrb[14].mxu0 }
 0x109   : > { %v1453_v13 = vmax.f32 %v1451_v59, %v1452_v5  ;;  %v2326_v14 = vsel %vm2322_vm2, %v1439_v3, -inf  ;;  %v2329_v15 = vsel %vm2322_vm2, %v1446_v4, -inf  ;;  %v819_v16 = vcombine.high %v811_v6, %v811_v6  ;;  %v6349_v17 = vpop.f32.mrb[15].mxu0 }
 0x10a   : > { %v2328_v19 = vmax.f32 %v2326_v14, %v2327_v63  ;;  %v2331_v21 = vmax.f32 %v2329_v15, %v2330_v0  ;;  %v820_v43 = vcombine.high %v818_v9, %v818_v9  ;;  %v1510_v51 = vsel %vm1425_vm1, %v811_v6, -inf }
 0x10b   : > { %v6353_v23 = vsel %vm2322_vm2, %v1453_v13, -inf  ;;  %v1511_v24 = vrot.slane %v1510_v51, 4  ;;  %v1517_v46 = vsel %vm1425_vm1, %v819_v16, -inf  ;;  %v1524_v25 = vsel %vm1425_vm1, %v818_v9, -inf }
 0x10c   : > { %v2334_v28 = vmax.f32 %v6353_v23, %v6335_v8  ;;  %v2600_v29 = vsel %vm2599_vm3, %v2328_v19, %v2325_v1  ;;  %v1518_v30 = vrot.slane %v1517_v46, 4  ;;  %v1525_v31 = vrot.slane %v1524_v25, 4 }
 0x10d   : > { %v2602_v34 = vsel %vm2601_vm4, %v2331_v21, %v2600_v29  ;;  %v1512_v35 = vmax.f32 %v1510_v51, %v1511_v24  ;;  %v1531_v36 = vsel %vm1425_vm1, %v820_v43, -inf  ;;  %v784_v37 = vrot.slane %v770_v10, %v6283_v32 }
 0x10e   : > { %v1519_v39 = vmax.f32 %v1517_v46, %v1518_v30  ;;  %v1526_v40 = vmax.f32 %v1524_v25, %v1525_v31  ;;  %v1532_v41 = vrot.slane %v1531_v36, 4  ;;  %v785_v42 = vcombine.high %v777_v11, %v777_v11  ;;  %v6367_v8 = vpop.f32.mrb[16].mxu0 }
 0x10f   : > { %v1513_v44 = vrot.slane %v1512_v35, 2  ;;  %v786_v45 = vcombine.high %v784_v37, %v784_v37  ;;  %v1454_v48 = vsel %vm1425_vm1, %v777_v11, -inf  ;;  %v1468_v49 = vsel %vm1425_vm1, %v784_v37, -inf  ;;  %v6370_v30 = vpop.f32.mrb[17].mxu0 }
 0x110   : > { %v1520_v50 = vrot.slane %v1519_v39, 2  ;;  %v1527_v53 = vrot.slane %v1526_v40, 2  ;;  %v1533_v54 = vmax.f32 %v1531_v36, %v1532_v41  ;;  %v1455_v55 = vrot.slane %v1454_v48, 4 }
 0x111   : > { %v1514_v56 = vmax.f32 %v1512_v35, %v1513_v44  ;;  %v1461_v58 = vsel %vm1425_vm1, %v785_v42, -inf  ;;  %v1469_v59 = vrot.slane %v1468_v49, 4  ;;  %v1475_v60 = vsel %vm1425_vm1, %v786_v45, -inf }
 0x112   : > { %v1521_v61 = vmax.f32 %v1519_v39, %v1520_v50  ;;  %v1528_v63 = vmax.f32 %v1526_v40, %v1527_v53  ;;  %v1534_v0 = vrot.slane %v1533_v54, 2  ;;  %v1456_v1 = vmax.f32 %v1454_v48, %v1455_v55 }
 0x113   : > { %v1515_v3 = vrot.slane %v1514_v56, 1  ;;  %v1462_v4 = vrot.slane %v1461_v58, 4  ;;  %v1470_v5 = vmax.f32 %v1468_v49, %v1469_v59  ;;  %v1476_v6 = vrot.slane %v1475_v60, 4 }
 0x114   : > { %v1522_v9 = vrot.slane %v1521_v61, 1  ;;  %v1529_v10 = vrot.slane %v1528_v63, 1  ;;  %v1535_v11 = vmax.f32 %v1533_v54, %v1534_v0  ;;  %v1457_v13 = vrot.slane %v1456_v1, 2 }
 0x115   : > { %v1516_v14 = vmax.f32 %v1514_v56, %v1515_v3  ;;  %v1463_v15 = vmax.f32 %v1461_v58, %v1462_v4  ;;  %v1471_v16 = vrot.slane %v1470_v5, 2  ;;  %v1477_v19 = vmax.f32 %v1475_v60, %v1476_v6 }
 0x116   : > { %v1523_v21 = vmax.f32 %v1521_v61, %v1522_v9  ;;  %v1530_v43 = vmax.f32 %v1528_v63, %v1529_v10  ;;  %v1536_v51 = vrot.slane %v1535_v11, 1  ;;  %v1458_v23 = vmax.f32 %v1456_v1, %v1457_v13 }
 0x117   : > { %v2336_v24 = vsel %vm2322_vm2, %v1516_v14, -inf  ;;  %v1464_v46 = vrot.slane %v1463_v15, 2  ;;  %v1472_v25 = vmax.f32 %v1470_v5, %v1471_v16  ;;  %v1478_v29 = vrot.slane %v1477_v19, 2 }
 0x118   : > { %v1537_v31 = vmax.f32 %v1535_v11, %v1536_v51  ;;  %v2339_v35 = vsel %vm2322_vm2, %v1523_v21, -inf  ;;  %v2342_v36 = vsel %vm2322_vm2, %v1530_v43, -inf  ;;  %v1459_v37 = vrot.slane %v1458_v23, 1 }
 0x119   : > { %v1465_v39 = vmax.f32 %v1463_v15, %v1464_v46  ;;  %v1473_v40 = vrot.slane %v1472_v25, 1  ;;  %v1479_v41 = vmax.f32 %v1477_v19, %v1478_v29  ;;  %v2604_v42 = vsel %vm2603_vm5, %v2334_v28, %v2602_v34 }
 0x11a   : > { %v2345_v44 = vsel %vm2322_vm2, %v1537_v31, -inf  ;;  %v1460_v45 = vmax.f32 %v1458_v23, %v1459_v37  ;;  %v626_v48 = vmul.f32 %v6296_v47, %v6273_v22  ;;  %v624_v49 = vmul.f32 %v6273_v22, %v6302_v52 }
 0x11b   : > { %v1466_v50 = vrot.slane %v1465_v39, 1  ;;  %v1474_v53 = vmax.f32 %v1472_v25, %v1473_v40  ;;  %v1480_v54 = vrot.slane %v1479_v41, 1  ;;  %v627_v55 = vmul.f32 %v6306_v57, %v6273_v22 }
 0x11c   : > { %v2335_v56 = vsel %vm2322_vm2, %v1460_v45, -inf  ;;  %v663_v28 = vadd.f32 %v6278_v26, %v626_v48  ;;  %v661_v34 = vadd.f32 %v6278_v26, %v624_v49  ;;  %v625_v58 = vmul.f32 %v6273_v22, %v6310_v62 }
 0x11d   : > { %v1467_v59 = vmax.f32 %v1465_v39, %v1466_v50  ;;  %v1481_v47 = vmax.f32 %v1479_v41, %v1480_v54  ;;  %v2337_v60 = vmax.f32 %v2335_v56, %v2336_v24  ;;  %v2341_v52 = vsel %vm2322_vm2, %v1474_v53, -inf  ;;  %v6408_v41 = vpop.f32.mrb[18].mxu0 }
 0x11e   : > { %v2343_v61 = vmax.f32 %v2341_v52, %v2342_v36  ;;  %v695_v63 = vmax.f32 %v663_v28, 0.0  ;;  %v693_v0 = vmax.f32 %v661_v34, 0.0  ;;  %v664_v1 = vadd.f32 %v6278_v26, %v627_v55 }
 0x11f   : > { %v2338_v57 = vsel %vm2322_vm2, %v1467_v59, -inf  ;;  %v2344_v3 = vsel %vm2322_vm2, %v1481_v47, -inf  ;;  %v2606_v4 = vsel %vm2605_vm6, %v2337_v60, %v2604_v42  ;;  %v662_v5 = vadd.f32 %v6278_v26, %v625_v58 }
 0x120   : > { %v2340_v6 = vmax.f32 %v2338_v57, %v2339_v35  ;;  %v2346_v62 = vmax.f32 %v2344_v3, %v2345_v44  ;;  %v855_v9 = vcombine.high %v695_v63, %v695_v63  ;;  %v862_v10 = vrot.slane %v695_v63, %v6283_v32 }
 0x121   : > { %v821_v11 = vcombine.high %v693_v0, %v693_v0  ;;  %v828_v13 = vrot.slane %v693_v0, %v6283_v32  ;;  %v6395_v14 = vmax.f32 %v664_v1, 0.0  ;;  %v6397_v15 = vmax.f32 %v662_v5, 0.0 }
 0x122   : > { %v2608_v16 = vsel %vm2607_vm7, %v2340_v6, %v2606_v4  ;;  %v869_v19 = vrot.slane %v855_v9, %v6283_v32  ;;  %v870_v21 = vcombine.high %v862_v10, %v862_v10  ;;  %v1594_v43 = vsel %vm1425_vm1, %v862_v10, -inf }
 0x123   : > { %v2610_v51 = vsel %vm2609_vm8, %v2343_v61, %v2608_v16  ;;  %v1595_v23 = vrot.slane %v1594_v43, 4  ;;  %v835_v24 = vrot.slane %v821_v11, %v6283_v32  ;;  %v836_v46 = vcombine.high %v828_v13, %v828_v13 }
 0x124   : > { %v2612_v25 = vsel %vm2611_vm9, %v2346_v62, %v2610_v51  ;;  %v871_v29 = vcombine.high %v869_v19, %v869_v19  ;;  %v1601_v31 = vsel %vm1425_vm1, %v870_v21, -inf  ;;  %v1608_v35 = vsel %vm1425_vm1, %v869_v19, -inf }
 0x125   : > { %2671 = vst.msk [vmem:[#allocation2 + $0x11] sm:$0xff] %vm2322_vm2, %v2612_v25  ;;  %v1596_v36 = vmax.f32 %v1594_v43, %v1595_v23  ;;  %v1602_v37 = vrot.slane %v1601_v31, 4  ;;  %v1609_v39 = vrot.slane %v1608_v35, 4  ;;  %v837_v40 = vcombine.high %v835_v24, %v835_v24 }
 0x126   : > { %v1615_v42 = vsel %vm1425_vm1, %v871_v29, -inf  ;;  %v1538_v44 = vsel %vm1425_vm1, %v828_v13, -inf  ;;  %v1545_v45 = vsel %vm1425_vm1, %v836_v46, -inf  ;;  %v1552_v48 = vsel %vm1425_vm1, %v835_v24, -inf  ;;  %v6416_v29 = vpop.f32.mrb[19].mxu0 }
 0x127   : > { %v1597_v49 = vrot.slane %v1596_v36, 2  ;;  %v1603_v50 = vmax.f32 %v1601_v31, %v1602_v37  ;;  %v1610_v53 = vmax.f32 %v1608_v35, %v1609_v39  ;;  %v1616_v54 = vrot.slane %v1615_v42, 4 }
 0x128   : > { %v1539_v55 = vrot.slane %v1538_v44, 4  ;;  %v1546_v56 = vrot.slane %v1545_v45, 4  ;;  %v1553_v28 = vrot.slane %v1552_v48, 4  ;;  %v1559_v34 = vsel %vm1425_vm1, %v837_v40, -inf }
 0x129   : > { %v1598_v58 = vmax.f32 %v1596_v36, %v1597_v49  ;;  %v1604_v59 = vrot.slane %v1603_v50, 2  ;;  %v1611_v47 = vrot.slane %v1610_v53, 2  ;;  %v1617_v60 = vmax.f32 %v1615_v42, %v1616_v54 }
 0x12a   : > { %v1540_v52 = vmax.f32 %v1538_v44, %v1539_v55  ;;  %v1547_v61 = vmax.f32 %v1545_v45, %v1546_v56  ;;  %v1554_v63 = vmax.f32 %v1552_v48, %v1553_v28  ;;  %v1560_v0 = vrot.slane %v1559_v34, 4 }
 0x12b   : > { %v1599_v1 = vrot.slane %v1598_v58, 1  ;;  %v1605_v57 = vmax.f32 %v1603_v50, %v1604_v59  ;;  %v1612_v3 = vmax.f32 %v1610_v53, %v1611_v47  ;;  %v1618_v4 = vrot.slane %v1617_v60, 2 }
 0x12c   : > { %v1541_v5 = vrot.slane %v1540_v52, 2  ;;  %v1548_v6 = vrot.slane %v1547_v61, 2  ;;  %v1555_v62 = vrot.slane %v1554_v63, 2  ;;  %v1561_v9 = vmax.f32 %v1559_v34, %v1560_v0 }
 0x12d   : > { %v1600_v10 = vmax.f32 %v1598_v58, %v1599_v1  ;;  %v1606_v11 = vrot.slane %v1605_v57, 1  ;;  %v1613_v13 = vrot.slane %v1612_v3, 1  ;;  %v1619_v16 = vmax.f32 %v1617_v60, %v1618_v4 }
 0x12e   : > { %v1542_v19 = vmax.f32 %v1540_v52, %v1541_v5  ;;  %v1549_v21 = vmax.f32 %v1547_v61, %v1548_v6  ;;  %v1556_v43 = vmax.f32 %v1554_v63, %v1555_v62  ;;  %v1562_v51 = vrot.slane %v1561_v9, 2 }
 0x12f   : > { %v1607_v23 = vmax.f32 %v1605_v57, %v1606_v11  ;;  %v1614_v24 = vmax.f32 %v1612_v3, %v1613_v13  ;;  %v1620_v46 = vrot.slane %v1619_v16, 1  ;;  %v2348_v25 = vsel %vm2322_vm2, %v1600_v10, -inf }
 0x130   : > { %v1543_v31 = vrot.slane %v1542_v19, 1  ;;  %v1550_v35 = vrot.slane %v1549_v21, 1  ;;  %v1557_v36 = vrot.slane %v1556_v43, 1  ;;  %v1563_v37 = vmax.f32 %v1561_v9, %v1562_v51 }
 0x131   : > { %v1621_v39 = vmax.f32 %v1619_v16, %v1620_v46  ;;  %v2351_v40 = vsel %vm2322_vm2, %v1607_v23, -inf  ;;  %v2354_v42 = vsel %vm2322_vm2, %v1614_v24, -inf  ;;  %v872_v44 = vcombine.high %v6395_v14, %v6395_v14 }
 0x132   : > { %v1544_v45 = vmax.f32 %v1542_v19, %v1543_v31  ;;  %v1551_v48 = vmax.f32 %v1549_v21, %v1550_v35  ;;  %v1558_v49 = vmax.f32 %v1556_v43, %v1557_v36  ;;  %v1564_v50 = vrot.slane %v1563_v37, 1 }
 0x133   : > { %v2357_v53 = vsel %vm2322_vm2, %v1621_v39, -inf  ;;  %v879_v54 = vrot.slane %v6395_v14, %v6283_v32  ;;  %v886_v55 = vrot.slane %v872_v44, %v6283_v32  ;;  %v838_v56 = vcombine.high %v6397_v15, %v6397_v15 }
 0x134   : > { %v1565_v28 = vmax.f32 %v1563_v37, %v1564_v50  ;;  %v2347_v34 = vsel %vm2322_vm2, %v1544_v45, -inf  ;;  %v2350_v58 = vsel %vm2322_vm2, %v1551_v48, -inf  ;;  %v2353_v59 = vsel %vm2322_vm2, %v1558_v49, -inf }
 0x135   : > { %v2349_v47 = vmax.f32 %v2347_v34, %v2348_v25  ;;  %v2352_v60 = vmax.f32 %v2350_v58, %v2351_v40  ;;  %v2355_v52 = vmax.f32 %v2353_v59, %v2354_v42  ;;  %v887_v61 = vcombine.high %v879_v54, %v879_v54 }
 0x136   : > { %v2356_v63 = vsel %vm2322_vm2, %v1565_v28, -inf  ;;  %v888_v0 = vcombine.high %v886_v55, %v886_v55  ;;  %v1622_v14 = vsel %vm1425_vm1, %v879_v54, -inf  ;;  %v1636_v1 = vsel %vm1425_vm1, %v886_v55, -inf }
 0x137   : > { %v2358_v57 = vmax.f32 %v2356_v63, %v2357_v53  ;;  %v2613_v3 = vsel %vm2599_vm3, %v2352_v60, %v2349_v47  ;;  %v1623_v4 = vrot.slane %v1622_v14, 4  ;;  %v1629_v5 = vsel %vm1425_vm1, %v887_v61, -inf }
 0x138   : > { %v2614_v6 = vsel %vm2601_vm4, %v2355_v52, %v2613_v3  ;;  %v1630_v62 = vrot.slane %v1629_v5, 4  ;;  %v1637_v9 = vrot.slane %v1636_v1, 4  ;;  %v1643_v10 = vsel %vm1425_vm1, %v888_v0, -inf }
 0x139   : > { %v1624_v11 = vmax.f32 %v1622_v14, %v1623_v4  ;;  %v1644_v13 = vrot.slane %v1643_v10, 4  ;;  %v845_v16 = vrot.slane %v6397_v15, %v6283_v32  ;;  %v852_v19 = vrot.slane %v838_v56, %v6283_v32 }
 0x13a   : > { %v1631_v21 = vmax.f32 %v1629_v5, %v1630_v62  ;;  %v1638_v43 = vmax.f32 %v1636_v1, %v1637_v9  ;;  %v6442_v51 = vsel %vm2603_vm5, %v2358_v57, %v2614_v6  ;;  %v630_v23 = vmul.f32 %v6316_v20, %v6273_v22  ;;  %v6449_v20 = vpop.f32.mrb[20].mxu0 }
 0x13b   : > { %v1625_v24 = vrot.slane %v1624_v11, 2  ;;  %v1645_v46 = vmax.f32 %v1643_v10, %v1644_v13  ;;  %v853_v25 = vcombine.high %v845_v16, %v845_v16  ;;  %v854_v31 = vcombine.high %v852_v19, %v852_v19 }
 0x13c   : > { %v1632_v35 = vrot.slane %v1631_v21, 2  ;;  %v1639_v36 = vrot.slane %v1638_v43, 2  ;;  %v1566_v37 = vsel %vm1425_vm1, %v845_v16, -inf  ;;  %v1580_v15 = vsel %vm1425_vm1, %v852_v19, -inf }
 0x13d   : > { %v1626_v39 = vmax.f32 %v1624_v11, %v1625_v24  ;;  %v1646_v40 = vrot.slane %v1645_v46, 2  ;;  %v1567_v42 = vrot.slane %v1566_v37, 4  ;;  %v1573_v44 = vsel %vm1425_vm1, %v853_v25, -inf }
 0x13e   : > { %v1633_v45 = vmax.f32 %v1631_v21, %v1632_v35  ;;  %v1640_v48 = vmax.f32 %v1638_v43, %v1639_v36  ;;  %v1574_v49 = vrot.slane %v1573_v44, 4  ;;  %v1581_v50 = vrot.slane %v1580_v15, 4 }
 0x13f   : > { %v1627_v53 = vrot.slane %v1626_v39, 1  ;;  %v1647_v54 = vmax.f32 %v1645_v46, %v1646_v40  ;;  %v1568_v55 = vmax.f32 %v1566_v37, %v1567_v42  ;;  %v1587_v56 = vsel %vm1425_vm1, %v854_v31, -inf  ;;  %v6467_v40 = vpop.f32.mrb[21].mxu0 }
 0x140   : > { %v1634_v28 = vrot.slane %v1633_v45, 1  ;;  %v1641_v34 = vrot.slane %v1640_v48, 1  ;;  %v1575_v58 = vmax.f32 %v1573_v44, %v1574_v49  ;;  %v1582_v59 = vmax.f32 %v1580_v15, %v1581_v50 }
 0x141   : > { %v1628_v47 = vmax.f32 %v1626_v39, %v1627_v53  ;;  %v1648_v60 = vrot.slane %v1647_v54, 1  ;;  %v1569_v52 = vrot.slane %v1568_v55, 2  ;;  %v1588_v61 = vrot.slane %v1587_v56, 4 }
 0x142   : > { %v1635_v63 = vmax.f32 %v1633_v45, %v1634_v28  ;;  %v1642_v0 = vmax.f32 %v1640_v48, %v1641_v34  ;;  %v1576_v14 = vrot.slane %v1575_v58, 2  ;;  %v1583_v1 = vrot.slane %v1582_v59, 2 }
 0x143   : > { %v1649_v57 = vmax.f32 %v1647_v54, %v1648_v60  ;;  %v2360_v3 = vsel %vm2322_vm2, %v1628_v47, -inf  ;;  %v1570_v4 = vmax.f32 %v1568_v55, %v1569_v52  ;;  %v1589_v5 = vmax.f32 %v1587_v56, %v1588_v61 }
 0x144   : > { %v2363_v6 = vsel %vm2322_vm2, %v1635_v63, -inf  ;;  %v2366_v62 = vsel %vm2322_vm2, %v1642_v0, -inf  ;;  %v1577_v9 = vmax.f32 %v1575_v58, %v1576_v14  ;;  %v1584_v10 = vmax.f32 %v1582_v59, %v1583_v1  ;;  %v6482_v1 = vpop.f32.mrb[22].mxu0 }
 0x145   : > { %v2369_v11 = vsel %vm2322_vm2, %v1649_v57, -inf  ;;  %v1571_v13 = vrot.slane %v1570_v4, 1  ;;  %v1590_v16 = vrot.slane %v1589_v5, 2  ;;  %v667_v19 = vadd.f32 %v6278_v26, %v630_v23 }
 0x146   : > { %v1578_v21 = vrot.slane %v1577_v9, 1  ;;  %v1585_v43 = vrot.slane %v1584_v10, 1  ;;  %v628_v24 = vmul.f32 %v6273_v22, %v6318_v27  ;;  %v631_v46 = vmul.f32 %v6320_v33, %v6273_v22 }
 0x147   : > { %v1572_v25 = vmax.f32 %v1570_v4, %v1571_v13  ;;  %v1591_v31 = vmax.f32 %v1589_v5, %v1590_v16  ;;  %v699_v35 = vmax.f32 %v667_v19, 0.0  ;;  %v6463_v36 = vmul.f32 %v6273_v22, %v6322_v38 }
 0x148   : > { %v1579_v37 = vmax.f32 %v1577_v9, %v1578_v21  ;;  %v1586_v15 = vmax.f32 %v1584_v10, %v1585_v43  ;;  %v665_v39 = vadd.f32 %v6278_v26, %v628_v24  ;;  %v668_v23 = vadd.f32 %v6278_v26, %v631_v46 }
 0x149   : > { %v1592_v42 = vrot.slane %v1591_v31, 1  ;;  %v2359_v27 = vsel %vm2322_vm2, %v1572_v25, -inf  ;;  %v923_v44 = vcombine.high %v699_v35, %v699_v35  ;;  %v930_v33 = vrot.slane %v699_v35, %v6283_v32 }
 0x14a   : > { %v2361_v45 = vmax.f32 %v2359_v27, %v2360_v3  ;;  %v2362_v48 = vsel %vm2322_vm2, %v1579_v37, -inf  ;;  %v2365_v38 = vsel %vm2322_vm2, %v1586_v15, -inf  ;;  %v697_v49 = vmax.f32 %v665_v39, 0.0 }
 0x14b   : > { %v1593_v50 = vmax.f32 %v1591_v31, %v1592_v42  ;;  %v2364_v53 = vmax.f32 %v2362_v48, %v2363_v6  ;;  %v2367_v54 = vmax.f32 %v2365_v38, %v2366_v62  ;;  %v937_v55 = vrot.slane %v923_v44, %v6283_v32 }
 0x14c   : > { %v2616_v56 = vsel %vm2605_vm6, %v2361_v45, %v6442_v51  ;;  %v938_v28 = vcombine.high %v930_v33, %v930_v33  ;;  %v1706_v34 = vsel %vm1425_vm1, %v930_v33, -inf  ;;  %v889_v58 = vcombine.high %v697_v49, %v697_v49 }
 0x14d   : > { %v2368_v59 = vsel %vm2322_vm2, %v1593_v50, -inf  ;;  %v2617_v47 = vsel %vm2607_vm7, %v2364_v53, %v2616_v56  ;;  %v939_v60 = vcombine.high %v937_v55, %v937_v55  ;;  %v1707_v52 = vrot.slane %v1706_v34, 4 }
 0x14e   : > { %v2370_v61 = vmax.f32 %v2368_v59, %v2369_v11  ;;  %v2618_v63 = vsel %vm2609_vm8, %v2367_v54, %v2617_v47  ;;  %v1713_v0 = vsel %vm1425_vm1, %v938_v28, -inf  ;;  %v1720_v14 = vsel %vm1425_vm1, %v937_v55, -inf }
 0x14f   : > { %v1708_v51 = vmax.f32 %v1706_v34, %v1707_v52  ;;  %v1714_v57 = vrot.slane %v1713_v0, 4  ;;  %v1721_v3 = vrot.slane %v1720_v14, 4  ;;  %v1727_v4 = vsel %vm1425_vm1, %v939_v60, -inf }
 0x150   : > { %v2619_v5 = vsel %vm2611_vm9, %v2370_v61, %v2618_v63  ;;  %v1728_v6 = vrot.slane %v1727_v4, 4  ;;  %v896_v62 = vrot.slane %v697_v49, %v6283_v32  ;;  %v903_v9 = vrot.slane %v889_v58, %v6283_v32 }
 0x151   : > { %2672 = vst.msk [vmem:[#allocation2 + $0x21] sm:$0xff] %vm2322_vm2, %v2619_v5  ;;  %v1709_v10 = vrot.slane %v1708_v51, 2  ;;  %v1715_v11 = vmax.f32 %v1713_v0, %v1714_v57  ;;  %v1722_v13 = vmax.f32 %v1720_v14, %v1721_v3  ;;  %v700_v16 = vmax.f32 %v668_v23, 0.0 }
 0x152   : > { %v1729_v19 = vmax.f32 %v1727_v4, %v1728_v6  ;;  %v904_v21 = vcombine.high %v896_v62, %v896_v62  ;;  %v905_v43 = vcombine.high %v903_v9, %v903_v9  ;;  %v1650_v24 = vsel %vm1425_vm1, %v896_v62, -inf }
 0x153   : > { %v1710_v46 = vmax.f32 %v1708_v51, %v1709_v10  ;;  %v1716_v25 = vrot.slane %v1715_v11, 2  ;;  %v1723_v31 = vrot.slane %v1722_v13, 2  ;;  %v1651_v35 = vrot.slane %v1650_v24, 4  ;;  %v6497_v10 = vpop.f32.mrb[23].mxu0 }
 0x154   : > { %v1730_v37 = vrot.slane %v1729_v19, 2  ;;  %v1657_v15 = vsel %vm1425_vm1, %v904_v21, -inf  ;;  %v1664_v39 = vsel %vm1425_vm1, %v903_v9, -inf  ;;  %v1671_v42 = vsel %vm1425_vm1, %v905_v43, -inf }
 0x155   : > { %v1711_v27 = vrot.slane %v1710_v46, 1  ;;  %v1717_v44 = vmax.f32 %v1715_v11, %v1716_v25  ;;  %v1724_v33 = vmax.f32 %v1722_v13, %v1723_v31  ;;  %v1652_v23 = vmax.f32 %v1650_v24, %v1651_v35 }
 0x156   : > { %v1731_v45 = vmax.f32 %v1729_v19, %v1730_v37  ;;  %v1658_v48 = vrot.slane %v1657_v15, 4  ;;  %v1665_v38 = vrot.slane %v1664_v39, 4  ;;  %v1672_v49 = vrot.slane %v1671_v42, 4 }
 0x157   : > { %v1712_v50 = vmax.f32 %v1710_v46, %v1711_v27  ;;  %v1718_v53 = vrot.slane %v1717_v44, 1  ;;  %v1725_v54 = vrot.slane %v1724_v33, 1  ;;  %v1653_v55 = vrot.slane %v1652_v23, 2 }
 0x158   : > { %v1732_v56 = vrot.slane %v1731_v45, 1  ;;  %v1659_v28 = vmax.f32 %v1657_v15, %v1658_v48  ;;  %v1666_v34 = vmax.f32 %v1664_v39, %v1665_v38  ;;  %v1673_v58 = vmax.f32 %v1671_v42, %v1672_v49 }
 0x159   : > { %v1719_v59 = vmax.f32 %v1717_v44, %v1718_v53  ;;  %v1726_v47 = vmax.f32 %v1724_v33, %v1725_v54  ;;  %v2372_v60 = vsel %vm2322_vm2, %v1712_v50, -inf  ;;  %v1654_v52 = vmax.f32 %v1652_v23, %v1653_v55 }
 0x15a   : > { %v1733_v61 = vmax.f32 %v1731_v45, %v1732_v56  ;;  %v1660_v63 = vrot.slane %v1659_v28, 2  ;;  %v1667_v0 = vrot.slane %v1666_v34, 2  ;;  %v1674_v14 = vrot.slane %v1673_v58, 2 }
 0x15b   : > { %v2375_v51 = vsel %vm2322_vm2, %v1719_v59, -inf  ;;  %v2378_v57 = vsel %vm2322_vm2, %v1726_v47, -inf  ;;  %v1655_v3 = vrot.slane %v1654_v52, 1  ;;  %v940_v4 = vcombine.high %v700_v16, %v700_v16 }
 0x15c   : > { %v2381_v5 = vsel %vm2322_vm2, %v1733_v61, -inf  ;;  %v1661_v6 = vmax.f32 %v1659_v28, %v1660_v63  ;;  %v1668_v62 = vmax.f32 %v1666_v34, %v1667_v0  ;;  %v1675_v9 = vmax.f32 %v1673_v58, %v1674_v14 }
 0x15d   : > { %v1656_v11 = vmax.f32 %v1654_v52, %v1655_v3  ;;  %v947_v13 = vrot.slane %v700_v16, %v6283_v32  ;;  %v954_v19 = vrot.slane %v940_v4, %v6283_v32  ;;  %v666_v21 = vadd.f32 %v6278_v26, %v6463_v36 }
 0x15e   : > { %v1662_v43 = vrot.slane %v1661_v6, 1  ;;  %v1669_v24 = vrot.slane %v1668_v62, 1  ;;  %v1676_v46 = vrot.slane %v1675_v9, 1  ;;  %v634_v25 = vmul.f32 %v6328_v2, %v6273_v22 }
 0x15f   : > { %v2371_v31 = vsel %vm2322_vm2, %v1656_v11, -inf  ;;  %v955_v35 = vcombine.high %v947_v13, %v947_v13  ;;  %v956_v37 = vcombine.high %v954_v19, %v954_v19  ;;  %v1734_v15 = vsel %vm1425_vm1, %v947_v13, -inf }
 0x160   : > { %v1663_v39 = vmax.f32 %v1661_v6, %v1662_v43  ;;  %v1670_v42 = vmax.f32 %v1668_v62, %v1669_v24  ;;  %v1677_v16 = vmax.f32 %v1675_v9, %v1676_v46  ;;  %v2373_v27 = vmax.f32 %v2371_v31, %v2372_v60 }
 0x161   : > { %v1735_v44 = vrot.slane %v1734_v15, 4  ;;  %v1741_v33 = vsel %vm1425_vm1, %v955_v35, -inf  ;;  %v1748_v36 = vsel %vm1425_vm1, %v954_v19, -inf  ;;  %v1755_v23 = vsel %vm1425_vm1, %v956_v37, -inf }
 0x162   : > { %v2374_v45 = vsel %vm2322_vm2, %v1663_v39, -inf  ;;  %v2377_v2 = vsel %vm2322_vm2, %v1670_v42, -inf  ;;  %v2380_v48 = vsel %vm2322_vm2, %v1677_v16, -inf  ;;  %v1742_v38 = vrot.slane %v1741_v33, 4 }
 0x163   : > { %v2376_v49 = vmax.f32 %v2374_v45, %v2375_v51  ;;  %v2379_v50 = vmax.f32 %v2377_v2, %v2378_v57  ;;  %v2382_v53 = vmax.f32 %v2380_v48, %v2381_v5  ;;  %v1736_v54 = vmax.f32 %v1734_v15, %v1735_v44 }
 0x164   : > { %v1743_v55 = vmax.f32 %v1741_v33, %v1742_v38  ;;  %v1749_v56 = vrot.slane %v1748_v36, 4  ;;  %v1756_v28 = vrot.slane %v1755_v23, 4  ;;  %v698_v34 = vmax.f32 %v666_v21, 0.0 }
 0x165   : > { %v2620_v58 = vsel %vm2599_vm3, %v2376_v49, %v2373_v27  ;;  %v1737_v59 = vrot.slane %v1736_v54, 2  ;;  %v671_v47 = vadd.f32 %v6278_v26, %v634_v25  ;;  %v632_v60 = vmul.f32 %v6273_v22, %v6332_v7  ;;  %v6522_v26 = vpop.f32.mrb[24].mxu0 }
 0x166   : > { %v2621_v52 = vsel %vm2601_vm4, %v2379_v50, %v2620_v58  ;;  %v1744_v61 = vrot.slane %v1743_v55, 2  ;;  %v1750_v63 = vmax.f32 %v1748_v36, %v1749_v56  ;;  %v1757_v0 = vmax.f32 %v1755_v23, %v1756_v28 }
 0x167   : > { %v1738_v14 = vmax.f32 %v1736_v54, %v1737_v59  ;;  %v906_v51 = vcombine.high %v698_v34, %v698_v34  ;;  %v913_v57 = vrot.slane %v698_v34, %v6283_v32  ;;  %v6520_v3 = vsel %vm2603_vm5, %v2382_v53, %v2621_v52 }
 0x168   : > { %v1745_v4 = vmax.f32 %v1743_v55, %v1744_v61  ;;  %v1751_v5 = vrot.slane %v1750_v63, 2  ;;  %v1758_v6 = vrot.slane %v1757_v0, 2  ;;  %v703_v62 = vmax.f32 %v671_v47, 0.0  ;;  %v6539_v61 = vld [vmem:[%s7765_s6] ss:$0 sm:$0xff] }
 0x169   : > { %v1739_v9 = vrot.slane %v1738_v14, 1  ;;  %v920_v22 = vrot.slane %v906_v51, %v6283_v32  ;;  %v921_v7 = vcombine.high %v913_v57, %v913_v57  ;;  %v1678_v11 = vsel %vm1425_vm1, %v913_v57, -inf }
 0x16a   : > { %v1746_v13 = vrot.slane %v1745_v4, 1  ;;  %v1752_v19 = vmax.f32 %v1750_v63, %v1751_v5  ;;  %v1759_v21 = vmax.f32 %v1757_v0, %v1758_v6  ;;  %v1679_v43 = vrot.slane %v1678_v11, 4  ;;  %v6542_v0 = vpop.f32.mrb[25].mxu0 }
 0x16b   : > { %v1740_v24 = vmax.f32 %v1738_v14, %v1739_v9  ;;  %v922_v46 = vcombine.high %v920_v22, %v920_v22  ;;  %v1685_v25 = vsel %vm1425_vm1, %v921_v7, -inf  ;;  %v1692_v31 = vsel %vm1425_vm1, %v920_v22, -inf }
 0x16c   : > { %v1747_v35 = vmax.f32 %v1745_v4, %v1746_v13  ;;  %v1753_v37 = vrot.slane %v1752_v19, 1  ;;  %v1760_v15 = vrot.slane %v1759_v21, 1  ;;  %v1680_v39 = vmax.f32 %v1678_v11, %v1679_v43 }
 0x16d   : > { %v2384_v42 = vsel %vm2322_vm2, %v1740_v24, -inf  ;;  %v1686_v16 = vrot.slane %v1685_v25, 4  ;;  %v1693_v27 = vrot.slane %v1692_v31, 4  ;;  %v1699_v44 = vsel %vm1425_vm1, %v922_v46, -inf }
 0x16e   : > { %v1754_v33 = vmax.f32 %v1752_v19, %v1753_v37  ;;  %v1761_v36 = vmax.f32 %v1759_v21, %v1760_v15  ;;  %v2387_v23 = vsel %vm2322_vm2, %v1747_v35, -inf  ;;  %v1681_v45 = vrot.slane %v1680_v39, 2 }
 0x16f   : > { %v1687_v2 = vmax.f32 %v1685_v25, %v1686_v16  ;;  %v1694_v48 = vmax.f32 %v1692_v31, %v1693_v27  ;;  %v1700_v38 = vrot.slane %v1699_v44, 4  ;;  %v991_v49 = vcombine.high %v703_v62, %v703_v62 }
 0x170   : > { %v2390_v50 = vsel %vm2322_vm2, %v1754_v33, -inf  ;;  %v2393_v53 = vsel %vm2322_vm2, %v1761_v36, -inf  ;;  %v1682_v54 = vmax.f32 %v1680_v39, %v1681_v45  ;;  %v998_v55 = vrot.slane %v703_v62, %v6283_v32 }
 0x171   : > { %v1688_v56 = vrot.slane %v1687_v2, 2  ;;  %v1695_v28 = vrot.slane %v1694_v48, 2  ;;  %v1701_v34 = vmax.f32 %v1699_v44, %v1700_v38  ;;  %v1005_v58 = vrot.slane %v991_v49, %v6283_v32  ;;  %v6552_v38 = vpop.f32.mrb[26].mxu0 }
 0x172   : > { %v1683_v59 = vrot.slane %v1682_v54, 1  ;;  %v1006_v47 = vcombine.high %v998_v55, %v998_v55  ;;  %v1818_v52 = vsel %vm1425_vm1, %v998_v55, -inf  ;;  %v669_v63 = vadd.f32 %v6539_v61, %v632_v60 }
 0x173   : > { %v1689_v14 = vmax.f32 %v1687_v2, %v1688_v56  ;;  %v1696_v51 = vmax.f32 %v1694_v48, %v1695_v28  ;;  %v1702_v57 = vrot.slane %v1701_v34, 2  ;;  %v1007_v4 = vcombine.high %v1005_v58, %v1005_v58 }
 0x174   : > { %v1684_v5 = vmax.f32 %v1682_v54, %v1683_v59  ;;  %v1819_v6 = vrot.slane %v1818_v52, 4  ;;  %v1825_v62 = vsel %vm1425_vm1, %v1006_v47, -inf  ;;  %v1832_v9 = vsel %vm1425_vm1, %v1005_v58, -inf }
 0x175   : > { %v1690_v22 = vrot.slane %v1689_v14, 1  ;;  %v1697_v7 = vrot.slane %v1696_v51, 1  ;;  %v1703_v11 = vmax.f32 %v1701_v34, %v1702_v57  ;;  %v1826_v13 = vrot.slane %v1825_v62, 4 }
 0x176   : > { %v2383_v19 = vsel %vm2322_vm2, %v1684_v5, -inf  ;;  %v1820_v21 = vmax.f32 %v1818_v52, %v1819_v6  ;;  %v1833_v60 = vrot.slane %v1832_v9, 4  ;;  %v1839_v43 = vsel %vm1425_vm1, %v1007_v4, -inf  ;;  %v6564_v4 = vld [vmem:[%s7764_s5] ss:$0 sm:$0xff] }
 0x177   : > { %v1691_v24 = vmax.f32 %v1689_v14, %v1690_v22  ;;  %v1698_v46 = vmax.f32 %v1696_v51, %v1697_v7  ;;  %v1704_v25 = vrot.slane %v1703_v11, 1  ;;  %v2385_v31 = vmax.f32 %v2383_v19, %v2384_v42 }
 0x178   : > { %v1821_v35 = vrot.slane %v1820_v21, 2  ;;  %v1827_v37 = vmax.f32 %v1825_v62, %v1826_v13  ;;  %v1834_v15 = vmax.f32 %v1832_v9, %v1833_v60  ;;  %v1840_v39 = vrot.slane %v1839_v43, 4 }
 0x179   : > { %v1705_v16 = vmax.f32 %v1703_v11, %v1704_v25  ;;  %v2386_v27 = vsel %vm2322_vm2, %v1691_v24, -inf  ;;  %v2389_v44 = vsel %vm2322_vm2, %v1698_v46, -inf  ;;  %v2623_v33 = vsel %vm2605_vm6, %v2385_v31, %v6520_v3 }
 0x17a   : > { %v2388_v36 = vmax.f32 %v2386_v27, %v2387_v23  ;;  %v2391_v45 = vmax.f32 %v2389_v44, %v2390_v50  ;;  %v1822_v2 = vmax.f32 %v1820_v21, %v1821_v35  ;;  %v1828_v48 = vrot.slane %v1827_v37, 2 }
 0x17b   : > { %v2392_v42 = vsel %vm2322_vm2, %v1705_v16, -inf  ;;  %v1835_v49 = vrot.slane %v1834_v15, 2  ;;  %v1841_v54 = vmax.f32 %v1839_v43, %v1840_v39  ;;  %v701_v55 = vmax.f32 %v669_v63, 0.0 }
 0x17c   : > { %v2394_v56 = vmax.f32 %v2392_v42, %v2393_v53  ;;  %v2624_v28 = vsel %vm2607_vm7, %v2388_v36, %v2623_v33  ;;  %v1823_v34 = vrot.slane %v1822_v2, 1  ;;  %v1829_v58 = vmax.f32 %v1827_v37, %v1828_v48 }
 0x17d   : > { %v2625_v59 = vsel %vm2609_vm8, %v2391_v45, %v2624_v28  ;;  %v1836_v47 = vmax.f32 %v1834_v15, %v1835_v49  ;;  %v1842_v3 = vrot.slane %v1841_v54, 2  ;;  %v957_v23 = vcombine.high %v701_v55, %v701_v55 }
 0x17e   : > { %v2626_v50 = vsel %vm2611_vm9, %v2394_v56, %v2625_v59  ;;  %v1824_v52 = vmax.f32 %v1822_v2, %v1823_v34  ;;  %v1830_v14 = vrot.slane %v1829_v58, 1  ;;  %v964_v51 = vrot.slane %v701_v55, %v6283_v32  ;;  %v6591_v56 = vpop.f32.mrb[27].mxu0 }
 0x17f   : > { %2673 = vst.msk [vmem:[#allocation2 + $0x31] sm:$0xff] %vm2322_vm2, %v2626_v50  ;;  %v1837_v57 = vrot.slane %v1836_v47, 1  ;;  %v1843_v63 = vmax.f32 %v1841_v54, %v1842_v3  ;;  %v971_v53 = vrot.slane %v957_v23, %v6283_v32  ;;  %v635_v5 = vmul.f32 %v6564_v4, %v6345_v12 }
 0x180   : > { %v1831_v6 = vmax.f32 %v1829_v58, %v1830_v14  ;;  %v6569_v62 = vsel %vm2322_vm2, %v1824_v52, -inf  ;;  %v972_v9 = vcombine.high %v964_v51, %v964_v51  ;;  %v1762_v22 = vsel %vm1425_vm1, %v964_v51, -inf }
 0x181   : > { %v1838_v7 = vmax.f32 %v1836_v47, %v1837_v57  ;;  %v1844_v11 = vrot.slane %v1843_v63, 1  ;;  %v973_v13 = vcombine.high %v971_v53, %v971_v53  ;;  %v1763_v19 = vrot.slane %v1762_v22, 4 }
 0x182   : > { %v6573_v21 = vsel %vm2322_vm2, %v1831_v6, -inf  ;;  %v1769_v60 = vsel %vm1425_vm1, %v972_v9, -inf  ;;  %v1776_v43 = vsel %vm1425_vm1, %v971_v53, -inf  ;;  %v672_v12 = vadd.f32 %v6539_v61, %v635_v5 }
 0x183   : > { %v1845_v24 = vmax.f32 %v1843_v63, %v1844_v11  ;;  %v6579_v46 = vsel %vm2322_vm2, %v1838_v7, -inf  ;;  %v1764_v25 = vmax.f32 %v1762_v22, %v1763_v19  ;;  %v1770_v31 = vrot.slane %v1769_v60, 4 }
 0x184   : > { %v1777_v35 = vrot.slane %v1776_v43, 4  ;;  %v1783_v37 = vsel %vm1425_vm1, %v973_v13, -inf  ;;  %v704_v15 = vmax.f32 %v672_v12, 0.0  ;;  %v633_v39 = vmul.f32 %v6564_v4, %v6349_v17 }
 0x185   : > { %v6585_v16 = vsel %vm2322_vm2, %v1845_v24, -inf  ;;  %v1765_v27 = vrot.slane %v1764_v25, 2  ;;  %v1771_v44 = vmax.f32 %v1769_v60, %v1770_v31  ;;  %v1784_v33 = vrot.slane %v1783_v37, 4 }
 0x186   : > { %v1778_v36 = vmax.f32 %v1776_v43, %v1777_v35  ;;  %v1008_v45 = vcombine.high %v704_v15, %v704_v15  ;;  %v1015_v2 = vrot.slane %v704_v15, %v6283_v32  ;;  %v670_v48 = vadd.f32 %v6539_v61, %v633_v39 }
 0x187   : > { %v1766_v42 = vmax.f32 %v1764_v25, %v1765_v27  ;;  %v1772_v49 = vrot.slane %v1771_v44, 2  ;;  %v1785_v54 = vmax.f32 %v1783_v37, %v1784_v33  ;;  %v638_v55 = vmul.f32 %v6564_v4, %v6367_v8 }
 0x188   : > { %v1779_v17 = vrot.slane %v1778_v36, 2  ;;  %v1022_v28 = vrot.slane %v1008_v45, %v6283_v32  ;;  %v1023_v34 = vcombine.high %v1015_v2, %v1015_v2  ;;  %v1846_v58 = vsel %vm1425_vm1, %v1015_v2, -inf }
 0x189   : > { %v1767_v59 = vrot.slane %v1766_v42, 1  ;;  %v1773_v47 = vmax.f32 %v1771_v44, %v1772_v49  ;;  %v1786_v3 = vrot.slane %v1785_v54, 2  ;;  %v1847_v23 = vrot.slane %v1846_v58, 4 }
 0x18a   : > { %v1780_v50 = vmax.f32 %v1778_v36, %v1779_v17  ;;  %v1024_v52 = vcombine.high %v1022_v28, %v1022_v28  ;;  %v1853_v14 = vsel %vm1425_vm1, %v1023_v34, -inf  ;;  %v1860_v51 = vsel %vm1425_vm1, %v1022_v28, -inf }
 0x18b   : > { %v1768_v57 = vmax.f32 %v1766_v42, %v1767_v59  ;;  %v1774_v8 = vrot.slane %v1773_v47, 1  ;;  %v1787_v63 = vmax.f32 %v1785_v54, %v1786_v3  ;;  %v1848_v53 = vmax.f32 %v1846_v58, %v1847_v23 }
 0x18c   : > { %v1781_v5 = vrot.slane %v1780_v50, 1  ;;  %v1854_v6 = vrot.slane %v1853_v14, 4  ;;  %v1861_v9 = vrot.slane %v1860_v51, 4  ;;  %v1867_v22 = vsel %vm1425_vm1, %v1024_v52, -inf }
 0x18d   : > { %v1775_v7 = vmax.f32 %v1773_v47, %v1774_v8  ;;  %v1788_v11 = vrot.slane %v1787_v63, 1  ;;  %v2395_v13 = vsel %vm2322_vm2, %v1768_v57, -inf  ;;  %v1849_v19 = vrot.slane %v1848_v53, 2 }
 0x18e   : > { %v1782_v60 = vmax.f32 %v1780_v50, %v1781_v5  ;;  %v2397_v43 = vmax.f32 %v2395_v13, %v6569_v62  ;;  %v1855_v12 = vmax.f32 %v1853_v14, %v1854_v6  ;;  %v1862_v24 = vmax.f32 %v1860_v51, %v1861_v9 }
 0x18f   : > { %v1789_v25 = vmax.f32 %v1787_v63, %v1788_v11  ;;  %v2398_v31 = vsel %vm2322_vm2, %v1775_v7, -inf  ;;  %v1850_v35 = vmax.f32 %v1848_v53, %v1849_v19  ;;  %v1868_v37 = vrot.slane %v1867_v22, 4 }
 0x190   : > { %v2400_v15 = vmax.f32 %v2398_v31, %v6573_v21  ;;  %v2401_v39 = vsel %vm2322_vm2, %v1782_v60, -inf  ;;  %v1856_v27 = vrot.slane %v1855_v12, 2  ;;  %v1863_v44 = vrot.slane %v1862_v24, 2 }
 0x191   : > { %v2403_v33 = vmax.f32 %v2401_v39, %v6579_v46  ;;  %v2404_v36 = vsel %vm2322_vm2, %v1789_v25, -inf  ;;  %v1851_v45 = vrot.slane %v1850_v35, 1  ;;  %v1869_v2 = vmax.f32 %v1867_v22, %v1868_v37 }
 0x192   : > { %v2406_v62 = vmax.f32 %v2404_v36, %v6585_v16  ;;  %v2627_v42 = vsel %vm2599_vm3, %v2400_v15, %v2397_v43  ;;  %v1857_v49 = vmax.f32 %v1855_v12, %v1856_v27  ;;  %v1864_v54 = vmax.f32 %v1862_v24, %v1863_v44 }
 0x193   : > { %v2628_v17 = vsel %vm2601_vm4, %v2403_v33, %v2627_v42  ;;  %v1852_v28 = vmax.f32 %v1850_v35, %v1851_v45  ;;  %v1870_v21 = vrot.slane %v1869_v2, 2  ;;  %v702_v34 = vmax.f32 %v670_v48, 0.0  ;;  %v6635_v35 = vpop.f32.mrb[28].mxu0 }
 0x194   : > { %v1858_v58 = vrot.slane %v1857_v49, 1  ;;  %v1865_v59 = vrot.slane %v1864_v54, 1  ;;  %v6609_v47 = vsel %vm2603_vm5, %v2406_v62, %v2628_v17  ;;  %v675_v46 = vadd.f32 %v6539_v61, %v638_v55 }
 0x195   : > { %v1871_v3 = vmax.f32 %v1869_v2, %v1870_v21  ;;  %v6613_v23 = vsel %vm2322_vm2, %v1852_v28, -inf  ;;  %v974_v16 = vcombine.high %v702_v34, %v702_v34  ;;  %v981_v50 = vrot.slane %v702_v34, %v6283_v32 }
 0x196   : > { %v1859_v52 = vmax.f32 %v1857_v49, %v1858_v58  ;;  %v1866_v14 = vmax.f32 %v1864_v54, %v1865_v59  ;;  %v707_v51 = vmax.f32 %v675_v46, 0.0  ;;  %v636_v48 = vmul.f32 %v6564_v4, %v6370_v30 }
 0x197   : > { %v1872_v57 = vrot.slane %v1871_v3, 1  ;;  %v988_v8 = vrot.slane %v974_v16, %v6283_v32  ;;  %v989_v63 = vcombine.high %v981_v50, %v981_v50  ;;  %v1790_v53 = vsel %vm1425_vm1, %v981_v50, -inf }
 0x198   : > { %v6621_v55 = vsel %vm2322_vm2, %v1859_v52, -inf  ;;  %v6624_v5 = vsel %vm2322_vm2, %v1866_v14, -inf  ;;  %v1791_v6 = vrot.slane %v1790_v53, 4  ;;  %v1059_v9 = vcombine.high %v707_v51, %v707_v51 }
 0x199   : > { %v1873_v22 = vmax.f32 %v1871_v3, %v1872_v57  ;;  %v990_v7 = vcombine.high %v988_v8, %v988_v8  ;;  %v1797_v11 = vsel %vm1425_vm1, %v989_v63, -inf  ;;  %v1804_v30 = vsel %vm1425_vm1, %v988_v8, -inf }
 0x19a   : > { %v1792_v13 = vmax.f32 %v1790_v53, %v1791_v6  ;;  %v1798_v19 = vrot.slane %v1797_v11, 4  ;;  %v1805_v60 = vrot.slane %v1804_v30, 4  ;;  %v1066_v43 = vrot.slane %v707_v51, %v6283_v32 }
 0x19b   : > { %v6630_v12 = vsel %vm2322_vm2, %v1873_v22, -inf  ;;  %v1811_v24 = vsel %vm1425_vm1, %v990_v7, -inf  ;;  %v1073_v25 = vrot.slane %v1059_v9, %v6283_v32  ;;  %v673_v31 = vadd.f32 %v6539_v61, %v636_v48 }
 0x19c   : > { %v1793_v37 = vrot.slane %v1792_v13, 2  ;;  %v1799_v15 = vmax.f32 %v1797_v11, %v1798_v19  ;;  %v1806_v39 = vmax.f32 %v1804_v30, %v1805_v60  ;;  %v1812_v27 = vrot.slane %v1811_v24, 4 }
 0x19d   : > { %v1074_v44 = vcombine.high %v1066_v43, %v1066_v43  ;;  %v1075_v33 = vcombine.high %v1073_v25, %v1073_v25  ;;  %v1930_v36 = vsel %vm1425_vm1, %v1066_v43, -inf  ;;  %v1944_v45 = vsel %vm1425_vm1, %v1073_v25, -inf }
 0x19e   : > { %v1794_v2 = vmax.f32 %v1792_v13, %v1793_v37  ;;  %v1800_v62 = vrot.slane %v1799_v15, 2  ;;  %v1807_v42 = vrot.slane %v1806_v39, 2  ;;  %v1813_v49 = vmax.f32 %v1811_v24, %v1812_v27 }
 0x19f   : > { %v1931_v54 = vrot.slane %v1930_v36, 4  ;;  %v1937_v17 = vsel %vm1425_vm1, %v1074_v44, -inf  ;;  %v1945_v28 = vrot.slane %v1944_v45, 4  ;;  %v1951_v21 = vsel %vm1425_vm1, %v1075_v33, -inf }
 0x1a0   : > { %v1795_v34 = vrot.slane %v1794_v2, 1  ;;  %v1801_v58 = vmax.f32 %v1799_v15, %v1800_v62  ;;  %v1808_v59 = vmax.f32 %v1806_v39, %v1807_v42  ;;  %v1814_v46 = vrot.slane %v1813_v49, 2 }
 0x1a1   : > { %v1932_v3 = vmax.f32 %v1930_v36, %v1931_v54  ;;  %v1938_v16 = vrot.slane %v1937_v17, 4  ;;  %v1946_v50 = vmax.f32 %v1944_v45, %v1945_v28  ;;  %v1952_v52 = vrot.slane %v1951_v21, 4 }
 0x1a2   : > { %v1796_v14 = vmax.f32 %v1794_v2, %v1795_v34  ;;  %v1802_v51 = vrot.slane %v1801_v58, 1  ;;  %v1809_v48 = vrot.slane %v1808_v59, 1  ;;  %v1815_v57 = vmax.f32 %v1813_v49, %v1814_v46 }
 0x1a3   : > { %v1933_v8 = vrot.slane %v1932_v3, 2  ;;  %v1939_v63 = vmax.f32 %v1937_v17, %v1938_v16  ;;  %v1947_v53 = vrot.slane %v1946_v50, 2  ;;  %v1953_v6 = vmax.f32 %v1951_v21, %v1952_v52  ;;  %v6668_v52 = vpop.f32.mrb[29].mxu0 }
 0x1a4   : > { %v1803_v9 = vmax.f32 %v1801_v58, %v1802_v51  ;;  %v1810_v22 = vmax.f32 %v1808_v59, %v1809_v48  ;;  %v1816_v7 = vrot.slane %v1815_v57, 1  ;;  %v2407_v11 = vsel %vm2322_vm2, %v1796_v14, -inf }
 0x1a5   : > { %v2409_v30 = vmax.f32 %v2407_v11, %v6613_v23  ;;  %v1934_v13 = vmax.f32 %v1932_v3, %v1933_v8  ;;  %v1940_v19 = vrot.slane %v1939_v63, 2  ;;  %v1948_v60 = vmax.f32 %v1946_v50, %v1947_v53 }
 0x1a6   : > { %v1817_v43 = vmax.f32 %v1815_v57, %v1816_v7  ;;  %v2410_v24 = vsel %vm2322_vm2, %v1803_v9, -inf  ;;  %v2413_v25 = vsel %vm2322_vm2, %v1810_v22, -inf  ;;  %v1954_v37 = vrot.slane %v1953_v6, 2 }
 0x1a7   : > { %v2412_v15 = vmax.f32 %v2410_v24, %v6621_v55  ;;  %v2415_v39 = vmax.f32 %v2413_v25, %v6624_v5  ;;  %v2630_v27 = vsel %vm2605_vm6, %v2409_v30, %v6609_v47  ;;  %v1935_v44 = vrot.slane %v1934_v13, 1 }
 0x1a8   : > { %v2416_v33 = vsel %vm2322_vm2, %v1817_v43, -inf  ;;  %v1941_v23 = vmax.f32 %v1939_v63, %v1940_v19  ;;  %v1949_v36 = vrot.slane %v1948_v60, 1  ;;  %v1955_v45 = vmax.f32 %v1953_v6, %v1954_v37 }
 0x1a9   : > { %v2418_v2 = vmax.f32 %v2416_v33, %v6630_v12  ;;  %v2631_v62 = vsel %vm2607_vm7, %v2412_v15, %v2630_v27  ;;  %v1936_v42 = vmax.f32 %v1934_v13, %v1935_v44  ;;  %v705_v49 = vmax.f32 %v673_v31, 0.0 }
 0x1aa   : > { %v2632_v54 = vsel %vm2609_vm8, %v2415_v39, %v2631_v62  ;;  %v1942_v55 = vrot.slane %v1941_v23, 1  ;;  %v1950_v17 = vmax.f32 %v1948_v60, %v1949_v36  ;;  %v1956_v5 = vrot.slane %v1955_v45, 1 }
 0x1ab   : > { %v2633_v28 = vsel %vm2611_vm9, %v2418_v2, %v2632_v54  ;;  %v6655_v47 = vsel %vm2322_vm2, %v1936_v42, -inf  ;;  %v1025_v21 = vcombine.high %v705_v49, %v705_v49  ;;  %v1032_v34 = vrot.slane %v705_v49, %v6283_v32 }
 0x1ac   : > { %2674 = vst.msk [vmem:[#allocation2 + $0x41] sm:$0xff] %vm2322_vm2, %v2633_v28  ;;  %v1943_v12 = vmax.f32 %v1941_v23, %v1942_v55  ;;  %v1957_v58 = vmax.f32 %v1955_v45, %v1956_v5  ;;  %v6660_v59 = vsel %vm2322_vm2, %v1950_v17, -inf  ;;  %v639_v31 = vmul.f32 %v6564_v4, %v6408_v41  ;;  %v6677_v41 = vpop.f32.mrb[30].mxu0 }
 0x1ad   : > { %v1039_v46 = vrot.slane %v1025_v21, %v6283_v32  ;;  %v1040_v3 = vcombine.high %v1032_v34, %v1032_v34  ;;  %v1874_v16 = vsel %vm1425_vm1, %v1032_v34, -inf  ;;  %v637_v50 = vmul.f32 %v6564_v4, %v6416_v29  ;;  %v6691_v37 = vpop.f32.mrb[31].mxu0 }
 0x1ae   : > { %v6671_v14 = vsel %vm2322_vm2, %v1943_v12, -inf  ;;  %v6674_v51 = vsel %vm2322_vm2, %v1957_v58, -inf  ;;  %v1875_v48 = vrot.slane %v1874_v16, 4  ;;  %v676_v57 = vadd.f32 %v6539_v61, %v639_v31 }
 0x1af   : > { %v1041_v8 = vcombine.high %v1039_v46, %v1039_v46  ;;  %v1881_v63 = vsel %vm1425_vm1, %v1040_v3, -inf  ;;  %v1888_v53 = vsel %vm1425_vm1, %v1039_v46, -inf  ;;  %v674_v29 = vadd.f32 %v6539_v61, %v637_v50 }
 0x1b0   : > { %v1876_v6 = vmax.f32 %v1874_v16, %v1875_v48  ;;  %v1882_v9 = vrot.slane %v1881_v63, 4  ;;  %v1889_v22 = vrot.slane %v1888_v53, 4  ;;  %v708_v7 = vmax.f32 %v676_v57, 0.0 }
 0x1b1   : > { %v1895_v11 = vsel %vm1425_vm1, %v1041_v8, -inf  ;;  %v706_v30 = vmax.f32 %v674_v29, 0.0  ;;  %v6685_v13 = vmul.f32 %v6564_v4, %v6449_v20  ;;  %v6689_v19 = vmul.f32 %v6564_v4, %v6467_v40 }
 0x1b2   : > { %v1877_v60 = vrot.slane %v1876_v6, 2  ;;  %v1883_v43 = vmax.f32 %v1881_v63, %v1882_v9  ;;  %v1890_v24 = vmax.f32 %v1888_v53, %v1889_v22  ;;  %v1896_v25 = vrot.slane %v1895_v11, 4 }
 0x1b3   : > { %v1076_v15 = vcombine.high %v708_v7, %v708_v7  ;;  %v1083_v39 = vrot.slane %v708_v7, %v6283_v32  ;;  %v1042_v27 = vcombine.high %v706_v30, %v706_v30  ;;  %v1049_v44 = vrot.slane %v706_v30, %v6283_v32 }
 0x1b4   : > { %v1878_v33 = vmax.f32 %v1876_v6, %v1877_v60  ;;  %v1884_v23 = vrot.slane %v1883_v43, 2  ;;  %v1891_v20 = vrot.slane %v1890_v24, 2  ;;  %v1897_v36 = vmax.f32 %v1895_v11, %v1896_v25 }
 0x1b5   : > { %v1090_v45 = vrot.slane %v1076_v15, %v6283_v32  ;;  %v1091_v40 = vcombine.high %v1083_v39, %v1083_v39  ;;  %v1958_v2 = vsel %vm1425_vm1, %v1083_v39, -inf  ;;  %v1056_v62 = vrot.slane %v1042_v27, %v6283_v32 }
 0x1b6   : > { %v1879_v42 = vrot.slane %v1878_v33, 1  ;;  %v1885_v49 = vmax.f32 %v1883_v43, %v1884_v23  ;;  %v1892_v54 = vmax.f32 %v1890_v24, %v1891_v20  ;;  %v1898_v55 = vrot.slane %v1897_v36, 2 }
 0x1b7   : > { %v1092_v17 = vcombine.high %v1090_v45, %v1090_v45  ;;  %v1959_v5 = vrot.slane %v1958_v2, 4  ;;  %v1965_v28 = vsel %vm1425_vm1, %v1091_v40, -inf  ;;  %v1972_v21 = vsel %vm1425_vm1, %v1090_v45, -inf }
 0x1b8   : > { %v1880_v34 = vmax.f32 %v1878_v33, %v1879_v42  ;;  %v1886_v12 = vrot.slane %v1885_v49, 1  ;;  %v1893_v58 = vrot.slane %v1892_v54, 1  ;;  %v1899_v31 = vmax.f32 %v1897_v36, %v1898_v55 }
 0x1b9   : > { %v1960_v46 = vmax.f32 %v1958_v2, %v1959_v5  ;;  %v1966_v3 = vrot.slane %v1965_v28, 4  ;;  %v1973_v16 = vrot.slane %v1972_v21, 4  ;;  %v1979_v50 = vsel %vm1425_vm1, %v1092_v17, -inf }
 0x1ba   : > { %v1887_v48 = vmax.f32 %v1885_v49, %v1886_v12  ;;  %v1894_v57 = vmax.f32 %v1892_v54, %v1893_v58  ;;  %v1900_v8 = vrot.slane %v1899_v31, 1  ;;  %v2419_v63 = vsel %vm2322_vm2, %v1880_v34, -inf }
 0x1bb   : > { %v2421_v53 = vmax.f32 %v2419_v63, %v6655_v47  ;;  %v1961_v29 = vrot.slane %v1960_v46, 2  ;;  %v1967_v6 = vmax.f32 %v1965_v28, %v1966_v3  ;;  %v1974_v9 = vmax.f32 %v1972_v21, %v1973_v16 }
 0x1bc   : > { %v1901_v22 = vmax.f32 %v1899_v31, %v1900_v8  ;;  %v2422_v7 = vsel %vm2322_vm2, %v1887_v48, -inf  ;;  %v2425_v11 = vsel %vm2322_vm2, %v1894_v57, -inf  ;;  %v1980_v30 = vrot.slane %v1979_v50, 4 }
 0x1bd   : > { %v2424_v60 = vmax.f32 %v2422_v7, %v6671_v14  ;;  %v2427_v43 = vmax.f32 %v2425_v11, %v6660_v59  ;;  %v1962_v24 = vmax.f32 %v1960_v46, %v1961_v29  ;;  %v1968_v25 = vrot.slane %v1967_v6, 2 }
 0x1be   : > { %v2428_v15 = vsel %vm2322_vm2, %v1901_v22, -inf  ;;  %v1975_v39 = vrot.slane %v1974_v9, 2  ;;  %v1981_v27 = vmax.f32 %v1979_v50, %v1980_v30  ;;  %v1057_v47 = vcombine.high %v1049_v44, %v1049_v44 }
 0x1bf   : > { %v2430_v33 = vmax.f32 %v2428_v15, %v6674_v51  ;;  %v2634_v23 = vsel %vm2599_vm3, %v2424_v60, %v2421_v53  ;;  %v1963_v20 = vrot.slane %v1962_v24, 1  ;;  %v1969_v36 = vmax.f32 %v1967_v6, %v1968_v25 }
 0x1c0   : > { %v2635_v45 = vsel %vm2601_vm4, %v2427_v43, %v2634_v23  ;;  %v1976_v40 = vmax.f32 %v1974_v9, %v1975_v39  ;;  %v1982_v2 = vrot.slane %v1981_v27, 2  ;;  %v1058_v14 = vcombine.high %v1056_v62, %v1056_v62 }
 0x1c1   : > { %v1964_v42 = vmax.f32 %v1962_v24, %v1963_v20  ;;  %v1970_v59 = vrot.slane %v1969_v36, 1  ;;  %v1902_v49 = vsel %vm1425_vm1, %v1049_v44, -inf  ;;  %v1909_v54 = vsel %vm1425_vm1, %v1057_v47, -inf }
 0x1c2   : > { %v1977_v55 = vrot.slane %v1976_v40, 1  ;;  %v1983_v17 = vmax.f32 %v1981_v27, %v1982_v2  ;;  %v1903_v5 = vrot.slane %v1902_v49, 4  ;;  %v1910_v28 = vrot.slane %v1909_v54, 4 }
 0x1c3   : > { %v1971_v51 = vmax.f32 %v1969_v36, %v1970_v59  ;;  %v6714_v21 = vsel %vm2322_vm2, %v1964_v42, -inf  ;;  %v1916_v34 = vsel %vm1425_vm1, %v1056_v62, -inf  ;;  %v1923_v12 = vsel %vm1425_vm1, %v1058_v14, -inf  ;;  %v5879_v62 = vld [vmem:[%s7761_s2 + $0x100] sm:$0xff]  }
 0x1c4   : > { %v1978_v58 = vmax.f32 %v1976_v40, %v1977_v55  ;;  %v1984_v31 = vrot.slane %v1983_v17, 1  ;;  %v1904_v46 = vmax.f32 %v1902_v49, %v1903_v5  ;;  %v1911_v3 = vmax.f32 %v1909_v54, %v1910_v28  ;;  %5778 = vmatprep.subr.bf16.mxu0 %v5879_v62 }
 0x1c5   : > { %v2435_v44 = vsel %vm2322_vm2, %v1971_v51, -inf  ;;  %v1917_v16 = vrot.slane %v1916_v34, 4  ;;  %v1924_v50 = vrot.slane %v1923_v12, 4  ;;  %v2636_v48 = vsel %vm2603_vm5, %v2430_v33, %v2635_v45  ;;  %5779 = vmatpush3.bf16.msra.mxu0 %v5879_v62 }
 0x1c6   : > { %v1985_v57 = vmax.f32 %v1983_v17, %v1984_v31  ;;  %v6721_v8 = vsel %vm2322_vm2, %v1978_v58, -inf  ;;  %v1905_v63 = vrot.slane %v1904_v46, 2  ;;  %v1912_v53 = vrot.slane %v1911_v3, 2 }
 0x1c7   : > { %v1918_v29 = vmax.f32 %v1916_v34, %v1917_v16  ;;  %v1925_v6 = vmax.f32 %v1923_v12, %v1924_v50  ;;  %v679_v9 = vadd.f32 %v6539_v61, %v6685_v13  ;;  %v677_v22 = vadd.f32 %v6539_v61, %v6689_v19  ;;  %v5880_v34 = vld [vmem:[%s7761_s2 + $0x108] sm:$0xff]  }
 0x1c8   : > { %v2441_v7 = vsel %vm2322_vm2, %v1985_v57, -inf  ;;  %v1906_v11 = vmax.f32 %v1904_v46, %v1905_v63  ;;  %v1913_v30 = vmax.f32 %v1911_v3, %v1912_v53  ;;  %v643_v60 = vmul.f32 %v6564_v4, %v6482_v1  ;;  %5780 = vmatprep.subr.bf16.mxu0 %v5880_v34 }
 0x1c9   : > { %v1919_v43 = vrot.slane %v1918_v29, 2  ;;  %v1926_v24 = vrot.slane %v1925_v6, 2  ;;  %v711_v25 = vmax.f32 %v679_v9, 0.0  ;;  %v709_v15 = vmax.f32 %v677_v22, 0.0  ;;  %5781 = vmatpush3.bf16.msra.mxu0 %v5880_v34 }
 0x1ca   : > { %v1907_v39 = vrot.slane %v1906_v11, 1  ;;  %v1914_v27 = vrot.slane %v1913_v30, 1  ;;  %v6734_v13 = vadd.f32 %v6539_v61, %v643_v60  ;;  %v6738_v19 = vmul.f32 %v6564_v4, %v6497_v10 }
 0x1cb   : > { %v1920_v47 = vmax.f32 %v1918_v29, %v1919_v43  ;;  %v1927_v33 = vmax.f32 %v1925_v6, %v1926_v24  ;;  %v1127_v23 = vcombine.high %v711_v25, %v711_v25  ;;  %v1134_v1 = vrot.slane %v711_v25, %v6283_v32 }
 0x1cc   : > { %v1908_v20 = vmax.f32 %v1906_v11, %v1907_v39  ;;  %v1915_v36 = vmax.f32 %v1913_v30, %v1914_v27  ;;  %v1093_v45 = vcombine.high %v709_v15, %v709_v15  ;;  %v1100_v40 = vrot.slane %v709_v15, %v6283_v32  ;;  %v5881_v27 = vld [vmem:[%s7761_s2 + $0x110] sm:$0xff]  }
 0x1cd   : > { %v1921_v2 = vrot.slane %v1920_v47, 1  ;;  %v1928_v14 = vrot.slane %v1927_v33, 1  ;;  %v1141_v42 = vrot.slane %v1127_v23, %v6283_v32  ;;  %v1142_v59 = vcombine.high %v1134_v1, %v1134_v1  ;;  %5782 = vmatprep.subr.bf16.mxu0 %v5881_v27 }
 0x1ce   : > { %v2431_v49 = vsel %vm2322_vm2, %v1908_v20, -inf  ;;  %v2434_v10 = vsel %vm2322_vm2, %v1915_v36, -inf  ;;  %v2042_v54 = vsel %vm1425_vm1, %v1134_v1, -inf  ;;  %v1107_v55 = vrot.slane %v1093_v45, %v6283_v32  ;;  %5783 = vmatpush3.bf16.msra.mxu0 %v5881_v27 }
 0x1cf   : > { %v1922_v17 = vmax.f32 %v1920_v47, %v1921_v2  ;;  %v1929_v5 = vmax.f32 %v1927_v33, %v1928_v14  ;;  %v2433_v28 = vmax.f32 %v2431_v49, %v6714_v21  ;;  %v2436_v51 = vmax.f32 %v2434_v10, %v2435_v44 }
 0x1d0   : > { %v1143_v12 = vcombine.high %v1141_v42, %v1141_v42  ;;  %v2043_v58 = vrot.slane %v2042_v54, 4  ;;  %v2049_v31 = vsel %vm1425_vm1, %v1142_v59, -inf  ;;  %v2056_v46 = vsel %vm1425_vm1, %v1141_v42, -inf }
 0x1d1   : > { %v2437_v3 = vsel %vm2322_vm2, %v1922_v17, -inf  ;;  %v2440_v16 = vsel %vm2322_vm2, %v1929_v5, -inf  ;;  %v2637_v50 = vsel %vm2605_vm6, %v2433_v28, %v2636_v48  ;;  %v2050_v57 = vrot.slane %v2049_v31, 4  ;;  %v5882_v5 = vld [vmem:[%s7761_s2 + $0x118] sm:$0xff]  }
 0x1d2   : > { %v2439_v21 = vmax.f32 %v2437_v3, %v6721_v8  ;;  %v2442_v44 = vmax.f32 %v2440_v16, %v2441_v7  ;;  %v2638_v63 = vsel %vm2607_vm7, %v2436_v51, %v2637_v50  ;;  %v2044_v53 = vmax.f32 %v2042_v54, %v2043_v58  ;;  %5784 = vmatprep.subr.bf16.mxu0 %v5882_v5 }
 0x1d3   : > { %v2051_v62 = vmax.f32 %v2049_v31, %v2050_v57  ;;  %v2057_v29 = vrot.slane %v2056_v46, 4  ;;  %v2063_v6 = vsel %vm1425_vm1, %v1143_v12, -inf  ;;  %v1108_v9 = vcombine.high %v1100_v40, %v1100_v40  ;;  %5785 = vmatpush3.bf16.msra.mxu0 %v5882_v5 }
 0x1d4   : > { %v2639_v22 = vsel %vm2609_vm8, %v2439_v21, %v2638_v63  ;;  %v2045_v11 = vrot.slane %v2044_v53, 2  ;;  %v2064_v30 = vrot.slane %v2063_v6, 4  ;;  %v1109_v60 = vcombine.high %v1107_v55, %v1107_v55 }
 0x1d5   : > { %v2640_v48 = vsel %vm2611_vm9, %v2442_v44, %v2639_v22  ;;  %v2052_v43 = vrot.slane %v2051_v62, 2  ;;  %v2058_v24 = vmax.f32 %v2056_v46, %v2057_v29  ;;  %v1986_v8 = vsel %vm1425_vm1, %v1100_v40, -inf }
 0x1d6   : > { %2675 = vst.msk [vmem:[#allocation2 + $0x51] sm:$0xff] %vm2322_vm2, %v2640_v48  ;;  %v2046_v7 = vmax.f32 %v2044_v53, %v2045_v11  ;;  %v2065_v25 = vmax.f32 %v2063_v6, %v2064_v30  ;;  %v1987_v15 = vrot.slane %v1986_v8, 4  ;;  %v1993_v39 = vsel %vm1425_vm1, %v1108_v9, -inf }
 0x1d7   : > { %v2053_v47 = vmax.f32 %v2051_v62, %v2052_v43  ;;  %v2059_v33 = vrot.slane %v2058_v24, 2  ;;  %v1994_v23 = vrot.slane %v1993_v39, 4  ;;  %v2000_v1 = vsel %vm1425_vm1, %v1107_v55, -inf }
 0x1d8   : > { %v2047_v20 = vrot.slane %v2046_v7, 1  ;;  %v2066_v36 = vrot.slane %v2065_v25, 2  ;;  %v1988_v45 = vmax.f32 %v1986_v8, %v1987_v15  ;;  %v2001_v40 = vrot.slane %v2000_v1, 4 }
 0x1d9   : > { %v2054_v2 = vrot.slane %v2053_v47, 1  ;;  %v2060_v14 = vmax.f32 %v2058_v24, %v2059_v33  ;;  %v1995_v42 = vmax.f32 %v1993_v39, %v1994_v23  ;;  %v2007_v59 = vsel %vm1425_vm1, %v1109_v60, -inf }
 0x1da   : > { %v2048_v49 = vmax.f32 %v2046_v7, %v2047_v20  ;;  %v2067_v10 = vmax.f32 %v2065_v25, %v2066_v36  ;;  %v1989_v54 = vrot.slane %v1988_v45, 2  ;;  %v2002_v17 = vmax.f32 %v2000_v1, %v2001_v40 }
 0x1db   : > { %v2055_v55 = vmax.f32 %v2053_v47, %v2054_v2  ;;  %v2061_v28 = vrot.slane %v2060_v14, 1  ;;  %v1996_v51 = vrot.slane %v1995_v42, 2  ;;  %v2008_v34 = vrot.slane %v2007_v59, 4 }
 0x1dc   : > { %v2068_v12 = vrot.slane %v2067_v10, 1  ;;  %v2444_v58 = vsel %vm2322_vm2, %v2048_v49, -inf  ;;  %v1990_v31 = vmax.f32 %v1988_v45, %v1989_v54  ;;  %v2003_v46 = vrot.slane %v2002_v17, 2 }
 0x1dd   : > { %v2062_v3 = vmax.f32 %v2060_v14, %v2061_v28  ;;  %v2447_v16 = vsel %vm2322_vm2, %v2055_v55, -inf  ;;  %v1997_v50 = vmax.f32 %v1995_v42, %v1996_v51  ;;  %v2009_v57 = vmax.f32 %v2007_v59, %v2008_v34 }
 0x1de   : > { %v2069_v21 = vmax.f32 %v2067_v10, %v2068_v12  ;;  %v1991_v44 = vrot.slane %v1990_v31, 1  ;;  %v2004_v63 = vmax.f32 %v2002_v17, %v2003_v46  ;;  %v712_v53 = vmax.f32 %v6734_v13, 0.0 }
 0x1df   : > { %v2450_v62 = vsel %vm2322_vm2, %v2062_v3, -inf  ;;  %v1998_v29 = vrot.slane %v1997_v50, 1  ;;  %v2010_v6 = vrot.slane %v2009_v57, 2  ;;  %v678_v9 = vadd.f32 %v6539_v61, %v6738_v19 }
 0x1e0   : > { %v2453_v22 = vsel %vm2322_vm2, %v2069_v21, -inf  ;;  %v1992_v11 = vmax.f32 %v1990_v31, %v1991_v44  ;;  %v2005_v30 = vrot.slane %v2004_v63, 1  ;;  %v1144_v60 = vcombine.high %v712_v53, %v712_v53 }
 0x1e1   : > { %v1999_v48 = vmax.f32 %v1997_v50, %v1998_v29  ;;  %v2011_v43 = vmax.f32 %v2009_v57, %v2010_v6  ;;  %v1151_v24 = vrot.slane %v712_v53, %v6283_v32  ;;  %v710_v8 = vmax.f32 %v678_v9, 0.0 }
 0x1e2   : > { %v2006_v7 = vmax.f32 %v2004_v63, %v2005_v30  ;;  %v2443_v13 = vsel %vm2322_vm2, %v1992_v11, -inf  ;;  %v1158_v25 = vrot.slane %v1144_v60, %v6283_v32  ;;  %v646_v15 = vmul.f32 %v6564_v4, %v6522_v26 }
 0x1e3   : > { %v2012_v39 = vrot.slane %v2011_v43, 1  ;;  %v2445_v19 = vmax.f32 %v2443_v13, %v2444_v58  ;;  %v2446_v27 = vsel %vm2322_vm2, %v1999_v48, -inf  ;;  %v1159_v47 = vcombine.high %v1151_v24, %v1151_v24 }
 0x1e4   : > { %v2448_v33 = vmax.f32 %v2446_v27, %v2447_v16  ;;  %v2449_v23 = vsel %vm2322_vm2, %v2006_v7, -inf  ;;  %v1160_v1 = vcombine.high %v1158_v25, %v1158_v25  ;;  %v2070_v20 = vsel %vm1425_vm1, %v1151_v24, -inf }
 0x1e5   : > { %v2013_v36 = vmax.f32 %v2011_v43, %v2012_v39  ;;  %v2451_v45 = vmax.f32 %v2449_v23, %v2450_v62  ;;  %v2071_v40 = vrot.slane %v2070_v20, 4  ;;  %v2077_v2 = vsel %vm1425_vm1, %v1159_v47, -inf }
 0x1e6   : > { %v2641_v14 = vsel %vm2599_vm3, %v2448_v33, %v2445_v19  ;;  %v2078_v42 = vrot.slane %v2077_v2, 4  ;;  %v2084_v26 = vsel %vm1425_vm1, %v1158_v25, -inf  ;;  %v2091_v59 = vsel %vm1425_vm1, %v1160_v1, -inf }
 0x1e7   : > { %v2452_v49 = vsel %vm2322_vm2, %v2013_v36, -inf  ;;  %v2642_v10 = vsel %vm2601_vm4, %v2451_v45, %v2641_v14  ;;  %v2072_v54 = vmax.f32 %v2070_v20, %v2071_v40  ;;  %v2085_v17 = vrot.slane %v2084_v26, 4 }
 0x1e8   : > { %v2454_v5 = vmax.f32 %v2452_v49, %v2453_v22  ;;  %v2079_v55 = vmax.f32 %v2077_v2, %v2078_v42  ;;  %v2092_v28 = vrot.slane %v2091_v59, 4  ;;  %v1110_v51 = vcombine.high %v710_v8, %v710_v8 }
 0x1e9   : > { %v2073_v34 = vrot.slane %v2072_v54, 2  ;;  %v2086_v12 = vmax.f32 %v2084_v26, %v2085_v17  ;;  %v1117_v58 = vrot.slane %v710_v8, %v6283_v32  ;;  %v683_v31 = vadd.f32 %v6539_v61, %v646_v15 }
 0x1ea   : > { %v2080_v46 = vrot.slane %v2079_v55, 2  ;;  %v2093_v3 = vmax.f32 %v2091_v59, %v2092_v28  ;;  %v1124_v16 = vrot.slane %v1110_v51, %v6283_v32  ;;  %v6797_v50 = vsel %vm2603_vm5, %v2454_v5, %v2642_v10 }
 0x1eb   : > { %v2074_v57 = vmax.f32 %v2072_v54, %v2073_v34  ;;  %v2087_v21 = vrot.slane %v2086_v12, 2  ;;  %v1125_v44 = vcombine.high %v1117_v58, %v1117_v58  ;;  %v2014_v63 = vsel %vm1425_vm1, %v1117_v58, -inf  ;;  %v6815_v34 = vld [vmem:[%s7765_s6] ss:$0 sm:$0xff] }
 0x1ec   : > { %v2081_v53 = vmax.f32 %v2079_v55, %v2080_v46  ;;  %v2094_v62 = vrot.slane %v2093_v3, 2  ;;  %v1126_v29 = vcombine.high %v1124_v16, %v1124_v16  ;;  %v2015_v6 = vrot.slane %v2014_v63, 4  ;;  %v5885_v46 = vld [vmem:[%s7761_s2 + $0x48] sm:$0xff]  }
 0x1ed   : > { %v2075_v9 = vrot.slane %v2074_v57, 1  ;;  %v2088_v22 = vmax.f32 %v2086_v12, %v2087_v21  ;;  %v2021_v61 = vsel %vm1425_vm1, %v1125_v44, -inf  ;;  %v2028_v11 = vsel %vm1425_vm1, %v1124_v16, -inf }
 0x1ee   : > { %v2082_v30 = vrot.slane %v2081_v53, 1  ;;  %v2095_v60 = vmax.f32 %v2093_v3, %v2094_v62  ;;  %v2016_v48 = vmax.f32 %v2014_v63, %v2015_v6  ;;  %v2022_v43 = vrot.slane %v2021_v61, 4 }
 0x1ef   : > { %v2076_v24 = vmax.f32 %v2074_v57, %v2075_v9  ;;  %v2089_v8 = vrot.slane %v2088_v22, 1  ;;  %v2029_v7 = vrot.slane %v2028_v11, 4  ;;  %v2035_v13 = vsel %vm1425_vm1, %v1126_v29, -inf  ;;  %v5886_v9 = vld [vmem:[%s7761_s2 + $0x8] sm:$0xff]  }
 0x1f0   : > { %v2083_v25 = vmax.f32 %v2081_v53, %v2082_v30  ;;  %v2096_v15 = vrot.slane %v2095_v60, 1  ;;  %v2017_v39 = vrot.slane %v2016_v48, 2  ;;  %v2023_v19 = vmax.f32 %v2021_v61, %v2022_v43 }
 0x1f1   : > { %v2090_v27 = vmax.f32 %v2088_v22, %v2089_v8  ;;  %v2456_v47 = vsel %vm2322_vm2, %v2076_v24, -inf  ;;  %v2030_v33 = vmax.f32 %v2028_v11, %v2029_v7  ;;  %v2036_v23 = vrot.slane %v2035_v13, 4 }
 0x1f2   : > { %v2097_v1 = vmax.f32 %v2095_v60, %v2096_v15  ;;  %v2459_v20 = vsel %vm2322_vm2, %v2083_v25, -inf  ;;  %v2018_v36 = vmax.f32 %v2016_v48, %v2017_v39  ;;  %v2024_v45 = vrot.slane %v2023_v19, 2  ;;  %v5887_v60 = vld [vmem:[%s7761_s2 + $0x50] sm:$0xff]  }
 0x1f3   : > { %v2462_v40 = vsel %vm2322_vm2, %v2090_v27, -inf  ;;  %v2031_v2 = vrot.slane %v2030_v33, 2  ;;  %v2037_v14 = vmax.f32 %v2035_v13, %v2036_v23  ;;  %v715_v42 = vmax.f32 %v683_v31, 0.0  ;;  %v5884_v31 = vld [vmem:[%s7761_s2] sm:$0xff]  }
 0x1f4   : > { %v6807_v26 = vsel %vm2322_vm2, %v2097_v1, -inf  ;;  %v2019_v59 = vrot.slane %v2018_v36, 1  ;;  %v2025_v49 = vmax.f32 %v2023_v19, %v2024_v45  ;;  %v644_v10 = vmul.f32 %v6564_v4, %v6542_v0  ;;  %v5883_v0 = vld [vmem:[%s7761_s2 + $0x40] sm:$0xff]  }
 0x1f5   : > { %v2032_v54 = vmax.f32 %v2030_v33, %v2031_v2  ;;  %v2038_v17 = vrot.slane %v2037_v14, 2  ;;  %v1195_v5 = vcombine.high %v715_v42, %v715_v42  ;;  %v1202_v55 = vrot.slane %v715_v42, %v6283_v32  ;;  %5556 = vmatprep.subr.bf16.mxu1 %v5883_v0  ;;  %v5888_v33 = vld [vmem:[%s7761_s2 + $0x10] sm:$0xff]  }
 0x1f6   : > { %v2020_v28 = vmax.f32 %v2018_v36, %v2019_v59  ;;  %v2026_v51 = vrot.slane %v2025_v49, 1  ;;  %v681_v12 = vadd.f32 %v6815_v34, %v644_v10  ;;  %v647_v58 = vmul.f32 %v6564_v4, %v6552_v38  ;;  %5557 = vmatpush3.bf16.msra.mxu1 %v5884_v31  ;;  %v5889_v36 = vld [vmem:[%s7761_s2 + $0x58] sm:$0xff]  }
 0x1f7   : > { %v2033_v3 = vrot.slane %v2032_v54, 1  ;;  %v2039_v16 = vmax.f32 %v2037_v14, %v2038_v17  ;;  %v1209_v57 = vrot.slane %v1195_v5, %v6283_v32  ;;  %v1210_v21 = vcombine.high %v1202_v55, %v1202_v55  ;;  %5558 = vmatprep.subr.bf16.mxu1 %v5885_v46 }
 0x1f8   : > { %v2027_v44 = vmax.f32 %v2025_v49, %v2026_v51  ;;  %v2455_v38 = vsel %vm2322_vm2, %v2020_v28, -inf  ;;  %v2154_v4 = vsel %vm1425_vm1, %v1202_v55, -inf  ;;  %v713_v63 = vmax.f32 %v681_v12, 0.0  ;;  %v5890_v55 = vld [vmem:[%s7761_s2 + $0x18] sm:$0xff]  }
 0x1f9   : > { %v2034_v53 = vmax.f32 %v2032_v54, %v2033_v3  ;;  %v2040_v62 = vrot.slane %v2039_v16, 1  ;;  %v2457_v29 = vmax.f32 %v2455_v38, %v2456_v47  ;;  %v1211_v6 = vcombine.high %v1209_v57, %v1209_v57 }
 0x1fa   : > { %v2458_v22 = vsel %vm2322_vm2, %v2027_v44, -inf  ;;  %v2155_v61 = vrot.slane %v2154_v4, 4  ;;  %v2161_v11 = vsel %vm1425_vm1, %v1210_v21, -inf  ;;  %v2168_v30 = vsel %vm1425_vm1, %v1209_v57, -inf  ;;  %5559 = vmatpush3.bf16.msra.mxu1 %v5886_v9 }
 0x1fb   : > { %v2041_v48 = vmax.f32 %v2039_v16, %v2040_v62  ;;  %v2460_v43 = vmax.f32 %v2458_v22, %v2459_v20  ;;  %v2461_v24 = vsel %vm2322_vm2, %v2034_v53, -inf  ;;  %v2644_v8 = vsel %vm2605_vm6, %v2457_v29, %v6797_v50  ;;  %5560 = vmatprep.subr.bf16.mxu1 %v5887_v60  ;;  %v5892_v29 = vld [vmem:[%s7761_s2 + $0x20] sm:$0xff]  }
 0x1fc   : > { %v2463_v7 = vmax.f32 %v2461_v24, %v2462_v40  ;;  %v2156_v13 = vmax.f32 %v2154_v4, %v2155_v61  ;;  %v2162_v25 = vrot.slane %v2161_v11, 4  ;;  %v2169_v15 = vrot.slane %v2168_v30, 4 }
 0x1fd   : > { %v2464_v39 = vsel %vm2322_vm2, %v2041_v48, -inf  ;;  %v2645_v19 = vsel %vm2607_vm7, %v2460_v43, %v2644_v8  ;;  %v2175_v27 = vsel %vm1425_vm1, %v1211_v6, -inf  ;;  %v1161_v47 = vcombine.high %v713_v63, %v713_v63 }
 0x1fe   : > { %v2466_v23 = vmax.f32 %v2464_v39, %v6807_v26  ;;  %v2646_v50 = vsel %vm2609_vm8, %v2463_v7, %v2645_v19  ;;  %v2157_v1 = vrot.slane %v2156_v13, 2  ;;  %v2163_v20 = vmax.f32 %v2161_v11, %v2162_v25  ;;  %5561 = vmatpush3.bf16.msra.mxu1 %v5888_v33 }
 0x1ff   : > { %v2170_v45 = vmax.f32 %v2168_v30, %v2169_v15  ;;  %v2176_v40 = vrot.slane %v2175_v27, 4  ;;  %v1168_v2 = vrot.slane %v713_v63, %v6283_v32  ;;  %v1175_v14 = vrot.slane %v1161_v47, %v6283_v32  ;;  %5562 = vmatprep.subr.bf16.mxu1 %v5889_v36 }
 0x200   : > { %v2647_v42 = vsel %vm2611_vm9, %v2466_v23, %v2646_v50  ;;  %v2158_v59 = vmax.f32 %v2156_v13, %v2157_v1  ;;  %v2164_v49 = vrot.slane %v2163_v20, 2  ;;  %v684_v26 = vadd.f32 %v6815_v34, %v647_v58  ;;  %v5891_v58 = vld [vmem:[%s7761_s2 + $0x60] sm:$0xff]  }
 0x201   : > { %2676 = vst.msk [vmem:[#allocation2 + $0x61] sm:$0xff] %vm2322_vm2, %v2647_v42  ;;  %v2171_v10 = vrot.slane %v2170_v45, 2  ;;  %v2177_v54 = vmax.f32 %v2175_v27, %v2176_v40  ;;  %v1176_v17 = vcombine.high %v1168_v2, %v1168_v2  ;;  %v1177_v5 = vcombine.high %v1175_v14, %v1175_v14  ;;  %v5894_v40 = vld [vmem:[%s7761_s2 + $0x28] sm:$0xff]  }
 0x202   : > { %v2159_v28 = vrot.slane %v2158_v59, 1  ;;  %v2165_v51 = vmax.f32 %v2163_v20, %v2164_v49  ;;  %v2098_v12 = vsel %vm1425_vm1, %v1168_v2, -inf  ;;  %v2112_v0 = vsel %vm1425_vm1, %v1175_v14, -inf  ;;  %5563 = vmatpush3.bf16.msra.mxu1 %v5890_v55  ;;  %v6881_v20 = vld [vmem:[%s7764_s5] ss:$0 sm:$0xff] }
 0x203   : > { %v2172_v31 = vmax.f32 %v2170_v45, %v2171_v10  ;;  %v2178_v46 = vrot.slane %v2177_v54, 2  ;;  %v2099_v3 = vrot.slane %v2098_v12, 4  ;;  %v2105_v16 = vsel %vm1425_vm1, %v1176_v17, -inf  ;;  %5564 = vmatprep.subr.bf16.mxu1 %v5891_v58  ;;  %v5893_v45 = vld [vmem:[%s7761_s2 + $0x68] sm:$0xff]  }
 0x204   : > { %v2160_v57 = vmax.f32 %v2158_v59, %v2159_v28  ;;  %v2166_v21 = vrot.slane %v2165_v51, 1  ;;  %v2106_v44 = vrot.slane %v2105_v16, 4  ;;  %v2113_v38 = vrot.slane %v2112_v0, 4 }
 0x205   : > { %v2173_v4 = vrot.slane %v2172_v31, 1  ;;  %v2179_v63 = vmax.f32 %v2177_v54, %v2178_v46  ;;  %v2100_v53 = vmax.f32 %v2098_v12, %v2099_v3  ;;  %v2119_v62 = vsel %vm1425_vm1, %v1177_v5, -inf }
 0x206   : > { %v2167_v6 = vmax.f32 %v2165_v51, %v2166_v21  ;;  %v2468_v9 = vsel %vm2322_vm2, %v2160_v57, -inf  ;;  %v2107_v22 = vmax.f32 %v2105_v16, %v2106_v44  ;;  %v2114_v61 = vmax.f32 %v2112_v0, %v2113_v38  ;;  %5565 = vmatpush3.bf16.msra.mxu1 %v5892_v29 }
 0x207   : > { %v2174_v11 = vmax.f32 %v2172_v31, %v2173_v4  ;;  %v2180_v30 = vrot.slane %v2179_v63, 1  ;;  %v2101_v60 = vrot.slane %v2100_v53, 2  ;;  %v2120_v48 = vrot.slane %v2119_v62, 4  ;;  %5566 = vmatprep.subr.bf16.mxu1 %v5893_v45 }
 0x208   : > { %v2471_v43 = vsel %vm2322_vm2, %v2167_v6, -inf  ;;  %v2108_v24 = vrot.slane %v2107_v22, 2  ;;  %v2115_v8 = vrot.slane %v2114_v61, 2  ;;  %v716_v7 = vmax.f32 %v684_v26, 0.0 }
 0x209   : > { %v2181_v13 = vmax.f32 %v2179_v63, %v2180_v30  ;;  %v2474_v25 = vsel %vm2322_vm2, %v2174_v11, -inf  ;;  %v2102_v15 = vmax.f32 %v2100_v53, %v2101_v60  ;;  %v2121_v39 = vmax.f32 %v2119_v62, %v2120_v48  ;;  %v5895_v48 = vld [vmem:[%s7761_s2 + $0x70] sm:$0xff]  }
 0x20a   : > { %v2109_v19 = vmax.f32 %v2107_v22, %v2108_v24  ;;  %v2116_v27 = vmax.f32 %v2114_v61, %v2115_v8  ;;  %v1212_v47 = vcombine.high %v716_v7, %v716_v7  ;;  %v1219_v33 = vrot.slane %v716_v7, %v6283_v32  ;;  %5567 = vmatpush3.bf16.msra.mxu1 %v5894_v40  ;;  %v6902_v22 = vld [vmem:[#allocation2 + $0x20] sm:$0xff]  ;;  %v5897_v24 = vld [vmem:[%s7761_s2 + $0x78] sm:$0xff]  }
 0x20b   : > { %v2477_v23 = vsel %vm2322_vm2, %v2181_v13, -inf  ;;  %v2103_v50 = vrot.slane %v2102_v15, 1  ;;  %v2122_v1 = vrot.slane %v2121_v39, 2  ;;  %v645_v36 = vmul.f32 %v6881_v20, %v6591_v56  ;;  %5568 = vmatprep.subr.bf16.mxu1 %v5895_v48 }
 0x20c   : > { %v2110_v2 = vrot.slane %v2109_v19, 1  ;;  %v2117_v14 = vrot.slane %v2116_v27, 1  ;;  %v1226_v42 = vrot.slane %v1212_v47, %v6283_v32  ;;  %v1227_v59 = vcombine.high %v1219_v33, %v1219_v33 }
 0x20d   : > { %v2104_v49 = vmax.f32 %v2102_v15, %v2103_v50  ;;  %v2123_v26 = vmax.f32 %v2121_v39, %v2122_v1  ;;  %v2182_v10 = vsel %vm1425_vm1, %v1219_v33, -inf  ;;  %v682_v54 = vadd.f32 %v6815_v34, %v645_v36  ;;  %v6915_v15 = vld [vmem:[#allocation2 + $0x10] sm:$0xff]  ;;  %v5898_v36 = vld [vmem:[%s7761_s2 + $0x38] sm:$0xff]  }
 0x20e   : > { %v2111_v56 = vmax.f32 %v2109_v19, %v2110_v2  ;;  %v2118_v17 = vmax.f32 %v2116_v27, %v2117_v14  ;;  %v1228_v5 = vcombine.high %v1226_v42, %v1226_v42  ;;  %v2183_v55 = vrot.slane %v2182_v10, 4 }
 0x20f   : > { %v2124_v28 = vrot.slane %v2123_v26, 1  ;;  %v2467_v51 = vsel %vm2322_vm2, %v2104_v49, -inf  ;;  %v2189_v12 = vsel %vm1425_vm1, %v1227_v59, -inf  ;;  %v2196_v0 = vsel %vm1425_vm1, %v1226_v42, -inf }
 0x210   : > { %v2469_v58 = vmax.f32 %v2467_v51, %v2468_v9  ;;  %v2470_v31 = vsel %vm2322_vm2, %v2111_v56, -inf  ;;  %v2473_v46 = vsel %vm2322_vm2, %v2118_v17, -inf  ;;  %v2184_v3 = vmax.f32 %v2182_v10, %v2183_v55 }
 0x211   : > { %v2125_v16 = vmax.f32 %v2123_v26, %v2124_v28  ;;  %v2472_v57 = vmax.f32 %v2470_v31, %v2471_v43  ;;  %v2475_v21 = vmax.f32 %v2473_v46, %v2474_v25  ;;  %v2190_v44 = vrot.slane %v2189_v12, 4  ;;  %v5896_v43 = vld [vmem:[%s7761_s2 + $0x30] sm:$0xff]   ;;  %v2695_v31 = vld [vmem:[#allocation2 + $0x1] sm:$0xff] }
 0x212   : > { %v2185_v38 = vrot.slane %v2184_v3, 2  ;;  %v2197_v4 = vrot.slane %v2196_v0, 4  ;;  %v2203_v63 = vsel %vm1425_vm1, %v1228_v5, -inf  ;;  %v714_v53 = vmax.f32 %v682_v54, 0.0  ;;  %5569 = vmatpush3.bf16.msra.mxu1 %v5896_v43  ;;  %v6937_v46 = vld [vmem:[#allocation2 + $0x11] sm:$0xff] }
 0x213   : > { %v2476_v62 = vsel %vm2322_vm2, %v2125_v16, -inf  ;;  %v2648_v29 = vsel %vm2599_vm3, %v2472_v57, %v2469_v58  ;;  %v2191_v6 = vmax.f32 %v2189_v12, %v2190_v44  ;;  %v2204_v9 = vrot.slane %v2203_v63, 4  ;;  %5570 = vmatprep.subr.bf16.mxu1 %v5897_v24 }
 0x214   : > { %v2478_v61 = vmax.f32 %v2476_v62, %v2477_v23  ;;  %v2649_v11 = vsel %vm2601_vm4, %v2475_v21, %v2648_v29  ;;  %v2186_v30 = vmax.f32 %v2184_v3, %v2185_v38  ;;  %v2198_v60 = vmax.f32 %v2196_v0, %v2197_v4 }
 0x215   : > { %v2192_v8 = vrot.slane %v2191_v6, 2  ;;  %v2205_v7 = vmax.f32 %v2203_v63, %v2204_v9  ;;  %v1178_v13 = vcombine.high %v714_v53, %v714_v53  ;;  %v1185_v25 = vrot.slane %v714_v53, %v6283_v32 }
 0x216   : > { %v2187_v39 = vrot.slane %v2186_v30, 1  ;;  %v2199_v19 = vrot.slane %v2198_v60, 2  ;;  %v6918_v27 = vsel %vm2603_vm5, %v2478_v61, %v2649_v11  ;;  %v2752_v47 = vpack.c.bf16 %v6902_v22, %v6915_v15  ;;  %5571 = vmatpush3.bf16.msra.mxu1 %v5898_v36 }
 0x217   : > { %v2193_v33 = vmax.f32 %v2191_v6, %v2192_v8  ;;  %v2206_v23 = vrot.slane %v2205_v7, 2  ;;  %v1192_v50 = vrot.slane %v1178_v13, %v6283_v32  ;;  %v1193_v1 = vcombine.high %v1185_v25, %v1185_v25 }
 0x218   : > { %v2188_v45 = vmax.f32 %v2186_v30, %v2187_v39  ;;  %v2200_v40 = vmax.f32 %v2198_v60, %v2199_v19  ;;  %v2126_v2 = vsel %vm1425_vm1, %v1185_v25, -inf  ;;  %2760 = vrot.lane.b32.xlu0 %v2752_v47, %s6094_s18  ;;  %v650_v14 = vmul.f32 %v6881_v20, %v6635_v35 }
 0x219   : > { %v2194_v42 = vrot.slane %v2193_v33, 1  ;;  %v2207_v59 = vmax.f32 %v2205_v7, %v2206_v23  ;;  %v1194_v49 = vcombine.high %v1192_v50, %v1192_v50  ;;  %v2127_v26 = vrot.slane %v2126_v2, 4 }
 0x21a   : > { %v2201_v10 = vrot.slane %v2200_v40, 1  ;;  %v6931_v54 = vsel %vm2322_vm2, %v2188_v45, -inf  ;;  %v2133_v56 = vsel %vm1425_vm1, %v1193_v1, -inf  ;;  %v2140_v17 = vsel %vm1425_vm1, %v1192_v50, -inf }
 0x21b   : > { %v2195_v5 = vmax.f32 %v2193_v33, %v2194_v42  ;;  %v2208_v55 = vrot.slane %v2207_v59, 1  ;;  %v2128_v28 = vmax.f32 %v2126_v2, %v2127_v26  ;;  %v2134_v51 = vrot.slane %v2133_v56, 4 }
 0x21c   : > { %v2202_v12 = vmax.f32 %v2200_v40, %v2201_v10  ;;  %v2141_v35 = vrot.slane %v2140_v17, 4  ;;  %v2147_v0 = vsel %vm1425_vm1, %v1194_v49, -inf  ;;  %v687_v58 = vadd.f32 %v6815_v34, %v650_v14 }
 0x21d   : > { %v2209_v3 = vmax.f32 %v2207_v59, %v2208_v55  ;;  %v2483_v16 = vsel %vm2322_vm2, %v2195_v5, -inf  ;;  %v2129_v57 = vrot.slane %v2128_v28, 2  ;;  %v2135_v21 = vmax.f32 %v2133_v56, %v2134_v51 }
 0x21e   : > { %v2486_v44 = vsel %vm2322_vm2, %v2202_v12, -inf  ;;  %v2142_v38 = vmax.f32 %v2140_v17, %v2141_v35  ;;  %v2148_v4 = vrot.slane %v2147_v0, 4  ;;  %v719_v63 = vmax.f32 %v687_v58, 0.0 }
 0x21f   : > { %v2489_v53 = vsel %vm2322_vm2, %v2209_v3, -inf  ;;  %v2130_v62 = vmax.f32 %v2128_v28, %v2129_v57  ;;  %v2136_v29 = vrot.slane %v2135_v21, 2  ;;  %v2703_v6 = vpack.c.bf16 %v6937_v46, %v2695_v31 }
 0x220   : > { %v2143_v9 = vrot.slane %v2142_v38, 2  ;;  %v2149_v61 = vmax.f32 %v2147_v0, %v2148_v4  ;;  %v1263_v11 = vcombine.high %v719_v63, %v719_v63  ;;  %v1270_v30 = vrot.slane %v719_v63, %v6283_v32 }
 0x221   : > { %v2131_v60 = vrot.slane %v2130_v62, 1  ;;  %v2137_v48 = vmax.f32 %v2135_v21, %v2136_v29  ;;  %2711 = vrot.lane.b32.xlu0 %v2703_v6, %s6094_s18  ;;  %v648_v43 = vmul.f32 %v6881_v20, %v6668_v52  ;;  %v651_v24 = vmul.f32 %v6881_v20, %v6677_v41 }
 0x222   : > { %v2144_v8 = vmax.f32 %v2142_v38, %v2143_v9  ;;  %v2150_v7 = vrot.slane %v2149_v61, 2  ;;  %v1277_v13 = vrot.slane %v1263_v11, %v6283_v32  ;;  %v1278_v25 = vcombine.high %v1270_v30, %v1270_v30 }
 0x223   : > { %v2132_v39 = vmax.f32 %v2130_v62, %v2131_v60  ;;  %v2138_v19 = vrot.slane %v2137_v48, 1  ;;  %v2266_v47 = vsel %vm1425_vm1, %v1270_v30, -inf  ;;  %v685_v33 = vadd.f32 %v6815_v34, %v648_v43 }
 0x224   : > { %v2145_v23 = vrot.slane %v2144_v8, 1  ;;  %v2151_v50 = vmax.f32 %v2149_v61, %v2150_v7  ;;  %v1279_v1 = vcombine.high %v1277_v13, %v1277_v13  ;;  %v2267_v36 = vrot.slane %v2266_v47, 4 }
 0x225   : > { %v2139_v45 = vmax.f32 %v2137_v48, %v2138_v19  ;;  %v2479_v52 = vsel %vm2322_vm2, %v2132_v39, -inf  ;;  %v2273_v41 = vsel %vm1425_vm1, %v1278_v25, -inf  ;;  %v2280_v40 = vsel %vm1425_vm1, %v1277_v13, -inf }
 0x226   : > { %v2146_v2 = vmax.f32 %v2144_v8, %v2145_v23  ;;  %v2152_v14 = vrot.slane %v2151_v50, 1  ;;  %v2481_v42 = vmax.f32 %v2479_v52, %v6931_v54  ;;  %v2268_v59 = vmax.f32 %v2266_v47, %v2267_v36 }
 0x227   : > { %v2482_v49 = vsel %vm2322_vm2, %v2139_v45, -inf  ;;  %v2274_v26 = vrot.slane %v2273_v41, 4  ;;  %v2281_v10 = vrot.slane %v2280_v40, 4  ;;  %v2287_v56 = vsel %vm1425_vm1, %v1279_v1, -inf }
 0x228   : > { %v2153_v17 = vmax.f32 %v2151_v50, %v2152_v14  ;;  %v2484_v5 = vmax.f32 %v2482_v49, %v2483_v16  ;;  %v2485_v55 = vsel %vm2322_vm2, %v2146_v2, -inf  ;;  %v2651_v28 = vsel %vm2605_vm6, %v2481_v42, %v6918_v27 }
 0x229   : > { %v2487_v51 = vmax.f32 %v2485_v55, %v2486_v44  ;;  %v2269_v12 = vrot.slane %v2268_v59, 2  ;;  %v2275_v35 = vmax.f32 %v2273_v41, %v2274_v26  ;;  %v2282_v0 = vmax.f32 %v2280_v40, %v2281_v10 }
 0x22a   : > { %v2488_v54 = vsel %vm2322_vm2, %v2153_v17, -inf  ;;  %v2652_v58 = vsel %vm2607_vm7, %v2484_v5, %v2651_v28  ;;  %v2288_v31 = vrot.slane %v2287_v56, 4  ;;  %v717_v3 = vmax.f32 %v685_v33, 0.0 }
 0x22b   : > { %v2490_v57 = vmax.f32 %v2488_v54, %v2489_v53  ;;  %v2653_v21 = vsel %vm2609_vm8, %v2487_v51, %v2652_v58  ;;  %v2270_v38 = vmax.f32 %v2268_v59, %v2269_v12  ;;  %v2276_v16 = vrot.slane %v2275_v35, 2 }
 0x22c   : > { %v2283_v4 = vrot.slane %v2282_v0, 2  ;;  %v2289_v63 = vmax.f32 %v2287_v56, %v2288_v31  ;;  %v1229_v62 = vcombine.high %v717_v3, %v717_v3  ;;  %v1236_v27 = vrot.slane %v717_v3, %v6283_v32 }
 0x22d   : > { %v2654_v44 = vsel %vm2611_vm9, %v2490_v57, %v2653_v21  ;;  %v2271_v29 = vrot.slane %v2270_v38, 1  ;;  %v2277_v6 = vmax.f32 %v2275_v35, %v2276_v16  ;;  %v688_v9 = vadd.f32 %v6815_v34, %v651_v24 }
 0x22e   : > { %2677 = vst.msk [vmem:[#allocation2 + $0x71] sm:$0xff] %vm2322_vm2, %v2654_v44  ;;  %v2284_v61 = vmax.f32 %v2282_v0, %v2283_v4  ;;  %v2290_v11 = vrot.slane %v2289_v63, 2  ;;  %v1243_v53 = vrot.slane %v1229_v62, %v6283_v32  ;;  %v1244_v30 = vcombine.high %v1236_v27, %v1236_v27 }
 0x22f   : > { %v2272_v60 = vmax.f32 %v2270_v38, %v2271_v29  ;;  %v2278_v48 = vrot.slane %v2277_v6, 1  ;;  %v2210_v43 = vsel %vm1425_vm1, %v1236_v27, -inf  ;;  %v720_v8 = vmax.f32 %v688_v9, 0.0 }
 0x230   : > { %v2285_v7 = vrot.slane %v2284_v61, 1  ;;  %v2291_v13 = vmax.f32 %v2289_v63, %v2290_v11  ;;  %v1245_v25 = vcombine.high %v1243_v53, %v1243_v53  ;;  %v2211_v39 = vrot.slane %v2210_v43, 4 }
 0x231   : > { %v2279_v19 = vmax.f32 %v2277_v6, %v2278_v48  ;;  %v6971_v47 = vsel %vm2322_vm2, %v2272_v60, -inf  ;;  %v2217_v24 = vsel %vm1425_vm1, %v1244_v30, -inf  ;;  %v2224_v33 = vsel %vm1425_vm1, %v1243_v53, -inf }
 0x232   : > { %v2286_v23 = vmax.f32 %v2284_v61, %v2285_v7  ;;  %v2292_v50 = vrot.slane %v2291_v13, 1  ;;  %v2212_v1 = vmax.f32 %v2210_v43, %v2211_v39  ;;  %v2218_v36 = vrot.slane %v2217_v24, 4 }
 0x233   : > { %v2495_v45 = vsel %vm2322_vm2, %v2279_v19, -inf  ;;  %v2225_v52 = vrot.slane %v2224_v33, 4  ;;  %v2231_v41 = vsel %vm1425_vm1, %v1245_v25, -inf  ;;  %v1280_v40 = vcombine.high %v720_v8, %v720_v8 }
 0x234   : > { %v2293_v2 = vmax.f32 %v2291_v13, %v2292_v50  ;;  %v2498_v14 = vsel %vm2322_vm2, %v2286_v23, -inf  ;;  %v2213_v42 = vrot.slane %v2212_v1, 2  ;;  %v2219_v59 = vmax.f32 %v2217_v24, %v2218_v36  ;;  %v6991_v23 = vld [vmem:[#allocation2 + $0x32] sm:$0xff] }
 0x235   : > { %v2226_v49 = vmax.f32 %v2224_v33, %v2225_v52  ;;  %v2232_v26 = vrot.slane %v2231_v41, 4  ;;  %v1287_v10 = vrot.slane %v720_v8, %v6283_v32  ;;  %v1294_v56 = vrot.slane %v1280_v40, %v6283_v32  ;;  %v6996_v52 = vld [vmem:[#allocation2 + $0x40] sm:$0xff] }
 0x236   : > { %v2501_v17 = vsel %vm2322_vm2, %v2293_v2, -inf  ;;  %v2214_v5 = vmax.f32 %v2212_v1, %v2213_v42  ;;  %v2220_v55 = vrot.slane %v2219_v59, 2  ;;  %v649_v28 = vmul.f32 %v6881_v20, %v6691_v37  ;;  %v6999_v42 = vld [vmem:[#allocation2 + $0x22] sm:$0xff] }
 0x237   : > { %v2227_v51 = vrot.slane %v2226_v49, 2  ;;  %v2233_v12 = vmax.f32 %v2231_v41, %v2232_v26  ;;  %v1295_v35 = vcombine.high %v1287_v10, %v1287_v10  ;;  %v1296_v0 = vcombine.high %v1294_v56, %v1294_v56  ;;  %v7003_v26 = vld [vmem:[#allocation2 + $0x30] sm:$0xff] }
 0x238   : > { %v2215_v54 = vrot.slane %v2214_v5, 1  ;;  %v2221_v58 = vmax.f32 %v2219_v59, %v2220_v55  ;;  %v2294_v31 = vsel %vm1425_vm1, %v1287_v10, -inf  ;;  %v2308_v3 = vsel %vm1425_vm1, %v1294_v56, -inf  ;;  %v7010_v56 = vld [vmem:[#allocation2 + $0x31] sm:$0xff] }
 0x239   : > { %v2228_v57 = vmax.f32 %v2226_v49, %v2227_v51  ;;  %v2234_v21 = vrot.slane %v2233_v12, 2  ;;  %v2295_v38 = vrot.slane %v2294_v31, 4  ;;  %v2301_v16 = vsel %vm1425_vm1, %v1295_v35, -inf  ;;  %v7016_v51 = vld [vmem:[#allocation2 + $0x60] sm:$0xff] }
 0x23a   : > { %v2216_v4 = vmax.f32 %v2214_v5, %v2215_v54  ;;  %v2222_v63 = vrot.slane %v2221_v58, 1  ;;  %v2302_v62 = vrot.slane %v2301_v16, 4  ;;  %v2309_v27 = vrot.slane %v2308_v3, 4  ;;  %v7023_v54 = vld [vmem:[#allocation2 + $0x21] sm:$0xff] }
 0x23b   : > { %v2229_v37 = vrot.slane %v2228_v57, 1  ;;  %v2235_v20 = vmax.f32 %v2233_v12, %v2234_v21  ;;  %v2296_v44 = vmax.f32 %v2294_v31, %v2295_v38  ;;  %v2315_v29 = vsel %vm1425_vm1, %v1296_v0, -inf  ;;  %v5899_v12 = vld [vmem:[%s7761_s2 + $0xc0] sm:$0xff]   ;;  %v7029_v21 = vld [vmem:[#allocation2 + $0x51] sm:$0xff] }
 0x23c   : > { %v2223_v6 = vmax.f32 %v2221_v58, %v2222_v63  ;;  %v2491_v9 = vsel %vm2322_vm2, %v2216_v4, -inf  ;;  %v2303_v61 = vmax.f32 %v2301_v16, %v2302_v62  ;;  %v2310_v11 = vmax.f32 %v2308_v3, %v2309_v27  ;;  %v7031_v38 = vld [vmem:[#allocation2 + $0x42] sm:$0xff]  ;;  %v2748_v16 = vld [vmem:[#allocation2 + $0x50] sm:$0xff]  ;;  %5596 = vmatprep.subr.bf16.mxu1 %v5899_v12 }
 0x23d   : > { %v2230_v53 = vmax.f32 %v2228_v57, %v2229_v37  ;;  %v2236_v30 = vrot.slane %v2235_v20, 1  ;;  %v2493_v60 = vmax.f32 %v2491_v9, %v6971_v47  ;;  %v2297_v48 = vrot.slane %v2296_v44, 2  ;;  %v7040_v37 = vld [vmem:[#allocation2 + $0x72] sm:$0xff]  ;;  %v7044_v9 = vld [vmem:[#allocation2 + $0x41] sm:$0xff] }
 0x23e   : > { %v2494_v43 = vsel %vm2322_vm2, %v2223_v6, -inf  ;;  %v2304_v8 = vrot.slane %v2303_v61, 2  ;;  %v2311_v7 = vrot.slane %v2310_v11, 2  ;;  %v2316_v13 = vrot.slane %v2315_v29, 4 }
 0x23f   : > { %v2237_v25 = vmax.f32 %v2235_v20, %v2236_v30  ;;  %v2496_v39 = vmax.f32 %v2494_v43, %v2495_v45  ;;  %v2497_v19 = vsel %vm2322_vm2, %v2230_v53, -inf  ;;  %v2298_v24 = vmax.f32 %v2296_v44, %v2297_v48  ;;  %v7056_v43 = vld [vmem:[#allocation2 + $0x71] sm:$0xff] }
 0x240   : > { %v2499_v33 = vmax.f32 %v2497_v19, %v2498_v14  ;;  %v2317_v36 = vmax.f32 %v2315_v29, %v2316_v13  ;;  %v686_v47 = vadd.f32 %v6815_v34, %v649_v28  ;;  %v2305_v2 = vmax.f32 %v2303_v61, %v2304_v8  ;;  %v7014_v28 = vld [vmem:[#allocation2 + $0x52] sm:$0xff]  ;;  %v7058_v8 = vld [vmem:[#allocation2 + $0x62] sm:$0xff] }
 0x241   : > { %v2500_v50 = vsel %vm2322_vm2, %v2237_v25, -inf  ;;  %v2655_v1 = vsel %vm2599_vm3, %v2496_v39, %v2493_v60  ;;  %v2312_v45 = vmax.f32 %v2310_v11, %v2311_v7  ;;  %v2299_v59 = vrot.slane %v2298_v24, 1  ;;  %v7046_v61 = vld [vmem:[#allocation2 + $0x12] sm:$0xff]  ;;  %v2728_v11 = vld [vmem:[#allocation2 + $0x2] sm:$0xff] }
 0x242   : > { %v2502_v41 = vmax.f32 %v2500_v50, %v2501_v17  ;;  %v2656_v40 = vsel %vm2601_vm4, %v2499_v33, %v2655_v1  ;;  %v718_v14 = vmax.f32 %v686_v47, 0.0  ;;  %v2881_v49 = vpack.c.bf16 %v6991_v23, %v6999_v42  ;;  %v2679_v7 = vld [vmem:[#allocation2] sm:$0xff] }
 0x243   : > { %v2753_v34 = vpack.c.bf16 %v6996_v52, %v7003_v26  ;;  %v2318_v17 = vrot.slane %v2317_v36, 2  ;;  %v2306_v35 = vrot.slane %v2305_v2, 1  ;;  %v2313_v0 = vrot.slane %v2312_v45, 1  ;;  %v2701_v47 = vld [vmem:[#allocation2 + $0x61] sm:$0xff] }
 0x244   : > { %v7006_v10 = vsel %vm2603_vm5, %v2502_v41, %v2656_v40  ;;  %v1246_v5 = vcombine.high %v718_v14, %v718_v14  ;;  %v1253_v55 = vrot.slane %v718_v14, %v6283_v32  ;;  %2885 = vst.msk [vmem:[#allocation3 + $0x20] sm:$0xff] %vm2322_vm2, %v2881_v49  ;;  %2741 = vst.msk [vmem:[#allocation3 + $0x30] sm:$0xff] %vm2322_vm2, %v2881_v49  ;;  %v7064_v41 = vld [vmem:[#allocation2 + $0x70] sm:$0xff] }
 0x245   : > { %2762 = vrot.lane.b32.xlu1 %v2753_v34, %s6094_s18  ;;  %v7025_v58 = vmax.f32 %v2298_v24, %v2299_v59  ;;  %v7035_v63 = vpack.c.bf16 %v7010_v56, %v7023_v54  ;;  %v2882_v62 = vpack.c.bf16 %v7014_v28, %v7031_v38  ;;  %v2754_v27 = vpack.c.bf16 %v7016_v51, %v2748_v16 }
 0x246   : > { %v1260_v31 = vrot.slane %v1246_v5, %v6283_v32  ;;  %v1261_v3 = vcombine.high %v1253_v55, %v1253_v55  ;;  %v2238_v57 = vsel %vm1425_vm1, %v1253_v55, -inf  ;;  %v2319_v20 = vmax.f32 %v2317_v36, %v2318_v17 }
 0x247   : > { %v2239_v4 = vrot.slane %v2238_v57, 4  ;;  %v7052_v48 = vpack.c.bf16 %v7029_v21, %v7044_v9  ;;  %2886 = vst.msk [vmem:[#allocation3 + $0x48] sm:$0xff] %vm2322_vm2, %v2882_v62  ;;  %2764 = vrot.lane.b32.xlu0 %v2754_v27, %s6094_s18  ;;  %2742 = vst.msk [vmem:[#allocation3 + $0x58] sm:$0xff] %vm2322_vm2, %v2882_v62  ;;  %v2307_v13 = vmax.f32 %v2305_v2, %v2306_v35 }
 0x248   : > { %v1262_v44 = vcombine.high %v1260_v31, %v1260_v31  ;;  %v2245_v29 = vsel %vm1425_vm1, %v1261_v3, -inf  ;;  %v2252_v6 = vsel %vm1425_vm1, %v1260_v31, -inf  ;;  %v2314_v25 = vmax.f32 %v2312_v45, %v2313_v0 }
 0x249   : > { %v2240_v53 = vmax.f32 %v2238_v57, %v2239_v4  ;;  %v2246_v30 = vrot.slane %v2245_v29, 4  ;;  %v2253_v60 = vrot.slane %v2252_v6, 4  ;;  %2713 = vrot.lane.b32.xlu1 %v7035_v63, %s6094_s18  ;;  %v2883_v19 = vpack.c.bf16 %v7040_v37, %v7058_v8 }
 0x24a   : > { %v2259_v39 = vsel %vm1425_vm1, %v1262_v44, -inf  ;;  %v2320_v40 = vrot.slane %v2319_v20, 1  ;;  %v7068_v59 = vpack.c.bf16 %v7056_v43, %v2701_v47  ;;  %v2736_v2 = vpack.c.bf16 %v7046_v61, %v2728_v11 }
 0x24b   : > { %v2241_v24 = vrot.slane %v2240_v53, 2  ;;  %v2247_v33 = vmax.f32 %v2245_v29, %v2246_v30  ;;  %v2254_v50 = vmax.f32 %v2252_v6, %v2253_v60  ;;  %v2260_v1 = vrot.slane %v2259_v39, 4  ;;  %v2893_v36 = vld [vmem:[#allocation3 + $0x20] sm:$0xff]  ;;  %2887 = vst.msk [vmem:[#allocation3 + $0x70] sm:$0xff] %vm2322_vm2, %v2883_v19  ;;  %2743 = vst.msk [vmem:[#allocation3 + $0x80] sm:$0xff] %vm2322_vm2, %v2883_v19 }
 0x24c   : > { %5786 = vmatprep.mubr.msk.bf16.mxu0 %vm2322_vm2, %v2893_v36  ;;  %v2687_v45 = vpack.c.bf16 %v6915_v15, %v2679_v7  ;;  %2740 = vst.msk [vmem:[#allocation3 + $0x8] sm:$0xff] %vm2322_vm2, %v2736_v2  ;;  %v2688_v5 = vpack.c.bf16 %v7003_v26, %v6902_v22  ;;  %v2689_v55 = vpack.c.bf16 %v2748_v16, %v6996_v52  ;;  %v2504_v4 = vsel %vm2322_vm2, %v7025_v58, -inf }
 0x24d   : > { %v2242_v14 = vmax.f32 %v2240_v53, %v2241_v24  ;;  %v2248_v49 = vrot.slane %v2247_v33, 2  ;;  %v2255_v34 = vrot.slane %v2254_v50, 2  ;;  %v2261_v17 = vmax.f32 %v2259_v39, %v2260_v1  ;;  %2715 = vrot.lane.b32.xlu1 %v7052_v48, %s6094_s18 }
 0x24e   : > { %2691 = vst.msk [vmem:[#allocation3] sm:$0xff] %vm2322_vm2, %v2687_v45  ;;  %v2690_v15 = vpack.c.bf16 %v7064_v41, %v7016_v51  ;;  %v2784_v12 = vpack.c.bf16 %v7023_v54, %v6937_v46  ;;  %v2321_v57 = vmax.f32 %v2319_v20, %v2320_v40  ;;  %v2898_v62 = vld [vmem:[#allocation3 + $0x48] sm:$0xff]  ;;  %2692 = vst.msk [vmem:[#allocation3 + $0x28] sm:$0xff] %vm2322_vm2, %v2688_v5  ;;  %v2507_v58 = vsel %vm2322_vm2, %v2307_v13, -inf }
 0x24f   : > { %v2243_v35 = vrot.slane %v2242_v14, 1  ;;  %v2249_v0 = vmax.f32 %v2247_v33, %v2248_v49  ;;  %v2256_v31 = vmax.f32 %v2254_v50, %v2255_v34  ;;  %v2262_v3 = vrot.slane %v2261_v17, 2  ;;  %2693 = vst.msk [vmem:[#allocation3 + $0x50] sm:$0xff] %vm2322_vm2, %v2689_v55  ;;  %2837 = vst.msk [vmem:[#allocation3 + $0x18] sm:$0xff] %vm2322_vm2, %v2688_v5  ;;  %5787 = vmatmul.mubr.msk.bf16.vlgmr.msra.gmra.mrb[32].mxu0 %vm2322_vm2, %v2898_v62  ;;  %v2832_v50 = vld [vmem:[#allocation2 + $0x90] sm:$0xff]  ;;  %v5902_v49 = vld [vmem:[%s7761_s2 + $0x88] sm:$0xff]  }
 0x250   : > { %2694 = vst.msk [vmem:[#allocation3 + $0x78] sm:$0xff] %vm2322_vm2, %v2690_v15  ;;  %2788 = vst.msk [vmem:[#allocation3 + $0x10] sm:$0xff] %vm2322_vm2, %v2784_v12  ;;  %v2785_v22 = vpack.c.bf16 %v7044_v9, %v7010_v56  ;;  %v2786_v46 = vpack.c.bf16 %v2701_v47, %v7029_v21  ;;  %v2510_v56 = vsel %vm2322_vm2, %v2314_v25, -inf  ;;  %v2800_v21 = vpack.c.bf16 %v6999_v42, %v7046_v61  ;;  %v5903_v34 = vld [vmem:[%s7761_s2 + $0xd0] sm:$0xff]   ;;  %v5905_v5 = vld [vmem:[%s7761_s2 + $0xd8] sm:$0xff]  }
 0x251   : > { %2838 = vst.msk [vmem:[#allocation3 + $0x40] sm:$0xff] %vm2322_vm2, %v2689_v55  ;;  %2839 = vst.msk [vmem:[#allocation3 + $0x68] sm:$0xff] %vm2322_vm2, %v2690_v15  ;;  %v2244_v52 = vmax.f32 %v2242_v14, %v2243_v35  ;;  %v2250_v26 = vrot.slane %v2249_v0, 1  ;;  %v2257_v51 = vrot.slane %v2256_v31, 1  ;;  %v2263_v54 = vmax.f32 %v2261_v17, %v2262_v3  ;;  %2717 = vrot.lane.b32.xlu1 %v7068_v59, %s6094_s18  ;;  %v5904_v17 = vld [vmem:[%s7761_s2 + $0x90] sm:$0xff]   ;;  %v5906_v55 = vld [vmem:[%s7761_s2 + $0x98] sm:$0xff]  }
 0x252   : > { %2789 = vst.msk [vmem:[#allocation3 + $0x38] sm:$0xff] %vm2322_vm2, %v2785_v22  ;;  %2790 = vst.msk [vmem:[#allocation3 + $0x60] sm:$0xff] %vm2322_vm2, %v2786_v46  ;;  %v2903_v29 = vld [vmem:[#allocation3 + $0x70] sm:$0xff]  ;;  %v2513_v9 = vsel %vm2322_vm2, %v2321_v57, -inf  ;;  %v2801_v13 = vpack.c.bf16 %v7031_v38, %v6991_v23  ;;  %v2802_v33 = vpack.c.bf16 %v7058_v8, %v7014_v28  ;;  %v5907_v15 = vld [vmem:[%s7761_s2 + $0xe0] sm:$0xff]  }
 0x253   : > { %v2251_v16 = vmax.f32 %v2249_v0, %v2250_v26  ;;  %v2258_v27 = vmax.f32 %v2256_v31, %v2257_v51  ;;  %v2264_v20 = vrot.slane %v2263_v54, 1  ;;  %v2503_v44 = vsel %vm2322_vm2, %v2244_v52, -inf  ;;  %5790 = vmatprep.mubr.msk.bf16.mxu0 %vm2322_vm2, %v2903_v29  ;;  %v5908_v12 = vld [vmem:[%s7761_s2 + $0xa0] sm:$0xff]   ;;  %v5909_v35 = vld [vmem:[%s7761_s2 + $0xe8] sm:$0xff]   ;;  %v5911_v31 = vld [vmem:[%s7761_s2 + $0xf0] sm:$0xff]  }
 0x254   : > { %v2505_v6 = vmax.f32 %v2503_v44, %v2504_v4  ;;  %v5910_v0 = vld [vmem:[%s7761_s2 + $0xa8] sm:$0xff]   ;;  %v5912_v3 = vld [vmem:[%s7761_s2 + $0xb0] sm:$0xff]   ;;  %v5913_v57 = vld [vmem:[%s7761_s2 + $0xf8] sm:$0xff]  }
 0x255   : > { %v2265_v11 = vmax.f32 %v2263_v54, %v2264_v20  ;;  %v2506_v53 = vsel %vm2322_vm2, %v2251_v16, -inf  ;;  %v2509_v42 = vsel %vm2322_vm2, %v2258_v27, -inf  ;;  %2808 = vrot.lane.b32.xlu1 %v2800_v21, %s6094_s18  ;;  %v5914_v4 = vld [vmem:[%s7761_s2 + $0xb8] sm:$0xff]  }
 0x256   : > { %v2508_v61 = vmax.f32 %v2506_v53, %v2507_v58  ;;  %v2511_v30 = vmax.f32 %v2509_v42, %v2510_v56  ;;  %v2658_v60 = vsel %vm2605_vm6, %v2505_v6, %v7006_v10  ;;  %v2880_v10 = vld [vmem:[#allocation2 + $0x92] sm:$0xff] }
 0x257   : > { %v2512_v7 = vsel %vm2322_vm2, %v2265_v11, -inf }
 0x258   : > { %v2514_v25 = vmax.f32 %v2512_v7, %v2513_v9  ;;  %v2659_v39 = vsel %vm2607_vm7, %v2508_v61, %v2658_v60 }
 0x259   : > { %v2660_v19 = vsel %vm2609_vm8, %v2511_v30, %v2659_v39  ;;  %2810 = vrot.lane.b32.xlu1 %v2801_v13, %s6094_s18 }
 0x25a   : > { %v2661_v24 = vsel %vm2611_vm9, %v2514_v25, %v2660_v19 }
 0x25b   : > { %2678 = vst.msk [vmem:[#allocation2 + $0x81] sm:$0xff] %vm2322_vm2, %v2661_v24 }
 0x25d   : > { %2812 = vrot.lane.b32.xlu1 %v2802_v33, %s6094_s18 }
 0x262   : > { %v2751_v1 = vld [vmem:[#allocation2 + $0x80] sm:$0xff] }
 0x263   : > { %v2879_v23 = vld [vmem:[#allocation2 + $0x82] sm:$0xff]  ;;  %v2755_v36 = vpack.c.bf16 %v2751_v1, %v7064_v41  ;;  %v2836_v45 = vpack.c.bf16 %v2832_v50, %v2751_v1 }
 0x264   : > { %v2847_v38 = vld [vmem:[#allocation2 + $0x81] sm:$0xff]  ;;  %v2884_v47 = vpack.c.bf16 %v2880_v10, %v2879_v23  ;;  %v2803_v40 = vpack.c.bf16 %v2879_v23, %v7040_v37  ;;  %v2848_v37 = vld [vmem:[#allocation2 + $0x91] sm:$0xff] }
 0x265   : > { %v2787_v2 = vpack.c.bf16 %v2847_v38, %v7056_v43  ;;  %2766 = vrot.lane.b32.xlu0 %v2755_v36, %s6094_s18  ;;  %2840 = vst.msk [vmem:[#allocation3 + $0x90] sm:$0xff] %vm2322_vm2, %v2836_v45  ;;  %v2852_v43 = vpack.c.bf16 %v2848_v37, %v2847_v38 }
 0x266   : > { %2888 = vst.msk [vmem:[#allocation3 + $0x98] sm:$0xff] %vm2322_vm2, %v2884_v47  ;;  %2814 = vrot.lane.b32.xlu1 %v2803_v40, %s6094_s18 }
 0x267   : > { %2791 = vst.msk [vmem:[#allocation3 + $0x88] sm:$0xff] %vm2322_vm2, %v2787_v2 }
 0x269   : > { %2857 = vrot.lane.b32.xlu0 %v7035_v63, %s6094_s18  ;;  %v5900_v63 = vld [vmem:[%s7761_s2 + $0x80] sm:$0xff]  }
 0x26d   : > { %v2908_v28 = vld [vmem:[#allocation3 + $0x98] sm:$0xff]  ;;  %2859 = vrot.lane.b32.xlu0 %v7052_v48, %s6094_s18  ;;  %v5901_v48 = vld [vmem:[%s7761_s2 + $0xc8] sm:$0xff]  }
 0x26e   : > { %5791 = vmatmul.mubr.msk.bf16.gmra.mrb[36].mxu0 %vm2322_vm2, %v2908_v28 }
 0x271   : > { %2861 = vrot.lane.b32.xlu0 %v7068_v59, %s6094_s18 }
 0x275   : > { %2863 = vrot.lane.b32.xlu0 %v2852_v43, %s6094_s18 }
 0x28a   : > { %v2761_v8 = vpop.permute.xlu0 %2760 }
 0x28b   : > { %2772 = vst.msk [vmem:[#allocation3 + $0x8] sm:$0xff] %vm2723_vm10, %v2761_v8 }
 0x292   : > { %v2890_v41 = vld [vmem:[#allocation3 + $0x8] sm:$0xff] }
 0x293   : > { %v2712_v14 = vpop.permute.xlu0 %2711  ;;  %3241 = vmatprep.mubr.bf16.mxu1 %v2890_v41 }
 0x294   : > { %2724 = vst.msk [vmem:[#allocation3] sm:$0xff] %vm2723_vm10, %v2712_v14 }
 0x29b   : > { %v2889_v59 = vld [vmem:[#allocation3] sm:$0xff] }
 0x29c   : > { %3242 = vmatmul.mubr.bf16.vlgmr.msra.gmra.mrb[0].mxu1 %v2889_v59 }
 0x29d   : > { %5597 = vmatpush3.bf16.msra.mxu1 %v5900_v63 }
 0x29e   : > { %5598 = vmatprep.subr.bf16.mxu1 %v5901_v48 }
 0x2a1   : > { %5599 = vmatpush3.bf16.msra.mxu1 %v5902_v49 }
 0x2a2   : > { %5600 = vmatprep.subr.bf16.mxu1 %v5903_v34 }
 0x2a5   : > { %5601 = vmatpush3.bf16.msra.mxu1 %v5904_v17 }
 0x2a6   : > { %5602 = vmatprep.subr.bf16.mxu1 %v5905_v5 }
 0x2a9   : > { %5603 = vmatpush3.bf16.msra.mxu1 %v5906_v55 }
 0x2aa   : > { %5604 = vmatprep.subr.bf16.mxu1 %v5907_v15 }
 0x2ad   : > { %5605 = vmatpush3.bf16.msra.mxu1 %v5908_v12 }
 0x2ae   : > { %5606 = vmatprep.subr.bf16.mxu1 %v5909_v35 }
 0x2b1   : > { %5607 = vmatpush3.bf16.msra.mxu1 %v5910_v0 }
 0x2b2   : > { %5608 = vmatprep.subr.bf16.mxu1 %v5911_v31 }
 0x2b5   : > { %5609 = vmatpush3.bf16.msra.mxu1 %v5912_v3 }
 0x2b6   : > { %5610 = vmatprep.subr.bf16.mxu1 %v5913_v57 }
 0x2b7   : > { %v2763_v62 = vpop.permute.xlu1 %2762 }
 0x2b8   : > { %2773 = vst.msk [vmem:[#allocation3 + $0x30] sm:$0xff] %vm2723_vm10, %v2763_v62  ;;  %v5923_v62 = vld [vmem:[%s7762_s3 + $0x40] sm:$0xff]  }
 0x2b9   : > { %5611 = vmatpush3.bf16.msra.mxu1 %v5914_v4  ;;  %v2765_v46 = vpop.permute.xlu0 %2764 }
 0x2ba   : > { %2774 = vst.msk [vmem:[#allocation3 + $0x58] sm:$0xff] %vm2723_vm10, %v2765_v46  ;;  %v5925_v46 = vld [vmem:[%s7762_s3 + $0x48] sm:$0xff]   ;;  %5644 = vmatprep.subr.bf16.mxu1 %v5923_v62 }
 0x2bb   : > { %v2714_v22 = vpop.permute.xlu1 %2713 }
 0x2bc   : > { %2725 = vst.msk [vmem:[#allocation3 + $0x28] sm:$0xff] %vm2723_vm10, %v2714_v22  ;;  %v5924_v22 = vld [vmem:[%s7762_s3] sm:$0xff]  }
 0x2bf   : > { %v2716_v52 = vpop.permute.xlu1 %2715  ;;  %v2895_v26 = vld [vmem:[#allocation3 + $0x30] sm:$0xff] }
 0x2c0   : > { %2726 = vst.msk [vmem:[#allocation3 + $0x50] sm:$0xff] %vm2723_vm10, %v2716_v52  ;;  %3249 = vmatprep.mubr.bf16.mxu1 %v2895_v26 }
 0x2c1   : > { %v2900_v58 = vld [vmem:[#allocation3 + $0x58] sm:$0xff] }
 0x2c3   : > { %v2894_v51 = vld [vmem:[#allocation3 + $0x28] sm:$0xff]  ;;  %v2718_v54 = vpop.permute.xlu1 %2717 }
 0x2c4   : > { %3250 = vmatmul.mubr.bf16.gmra.mrb[4].mxu1 %v2894_v51  ;;  %2727 = vst.msk [vmem:[#allocation3 + $0x78] sm:$0xff] %vm2723_vm10, %v2718_v54  ;;  %v5927_v51 = vld [vmem:[%s7762_s3 + $0xc0] sm:$0xff]  }
 0x2c5   : > { %3257 = vmatprep.mubr.bf16.mxu1 %v2900_v58  ;;  %v5928_v54 = vld [vmem:[%s7762_s3 + $0x80] sm:$0xff]   ;;  %5666 = vmatprep.subr.bf16.mxu0 %v5927_v51 }
 0x2c6   : > { %5667 = vmatpush3.bf16.msra.mxu0 %v5928_v54 }
 0x2c7   : > { %v2809_v56 = vpop.permute.xlu1 %2808  ;;  %v2899_v21 = vld [vmem:[#allocation3 + $0x50] sm:$0xff] }
 0x2c8   : > { %2820 = vst.msk [vmem:[#allocation3 + $0x10] sm:$0xff] %vm2723_vm10, %v2809_v56  ;;  %v5931_v56 = vld [vmem:[%s7762_s3 + $0xc8] sm:$0xff]  }
 0x2c9   : > { %5668 = vmatprep.subr.bf16.mxu0 %v5931_v56 }
 0x2cb   : > { %v2811_v16 = vpop.permute.xlu1 %2810  ;;  %v2904_v11 = vld [vmem:[#allocation3 + $0x78] sm:$0xff] }
 0x2cc   : > { %3258 = vmatmul.mubr.bf16.gmra.mrb[8].mxu1 %v2899_v21  ;;  %2821 = vst.msk [vmem:[#allocation3 + $0x38] sm:$0xff] %vm2723_vm10, %v2811_v16 }
 0x2cf   : > { %v2813_v27 = vpop.permute.xlu1 %2812  ;;  %v2891_v30 = vld [vmem:[#allocation3 + $0x10] sm:$0xff] }
 0x2d0   : > { %2822 = vst.msk [vmem:[#allocation3 + $0x60] sm:$0xff] %vm2723_vm10, %v2813_v27  ;;  %v5926_v27 = vld [vmem:[%s7762_s3 + $0x8] sm:$0xff]  }
 0x2d3   : > { %v2896_v7 = vld [vmem:[#allocation3 + $0x38] sm:$0xff] }
 0x2d7   : > { %v2767_v20 = vpop.permute.xlu0 %2766  ;;  %v2901_v25 = vld [vmem:[#allocation3 + $0x60] sm:$0xff] }
 0x2d8   : > { %v2815_v44 = vpop.permute.xlu1 %2814  ;;  %2775 = vst.msk [vmem:[#allocation3 + $0x80] sm:$0xff] %vm2723_vm10, %v2767_v20  ;;  %v7266_v20 = vld [vmem:[%s7764_s5 + $0x1] ss:$0 sm:$0xff] }
 0x2d9   : > { %2823 = vst.msk [vmem:[#allocation3 + $0x88] sm:$0xff] %vm2723_vm10, %v2815_v44  ;;  %v5929_v44 = vld [vmem:[%s7762_s3 + $0x50] sm:$0xff]  }
 0x2db   : > { %v2858_v29 = vpop.permute.xlu0 %2857 }
 0x2dc   : > { %2869 = vst.msk [vmem:[#allocation3 + $0x18] sm:$0xff] %vm2723_vm10, %v2858_v29  ;;  %v5932_v29 = vld [vmem:[%s7762_s3 + $0x88] sm:$0xff]  }
 0x2dd   : > { %5669 = vmatpush3.bf16.msra.mxu0 %v5932_v29 }
 0x2df   : > { %v2860_v6 = vpop.permute.xlu0 %2859  ;;  %v2905_v9 = vld [vmem:[#allocation3 + $0x80] sm:$0xff] }
 0x2e0   : > { %2870 = vst.msk [vmem:[#allocation3 + $0x40] sm:$0xff] %vm2723_vm10, %v2860_v6  ;;  %3265 = vmatprep.mubr.bf16.mxu1 %v2905_v9  ;;  %v2906_v19 = vld [vmem:[#allocation3 + $0x88] sm:$0xff] }
 0x2e1   : > { %3266 = vmatmul.mubr.bf16.gmra.mrb[12].mxu1 %v2904_v11  ;;  %v5935_v11 = vld [vmem:[%s7762_s3 + $0xd0] sm:$0xff]  }
 0x2e2   : > { %5670 = vmatprep.subr.bf16.mxu0 %v5935_v11 }
 0x2e3   : > { %v2862_v53 = vpop.permute.xlu0 %2861  ;;  %v2892_v42 = vld [vmem:[#allocation3 + $0x18] sm:$0xff] }
 0x2e4   : > { %2871 = vst.msk [vmem:[#allocation3 + $0x68] sm:$0xff] %vm2723_vm10, %v2862_v53  ;;  %3306 = vmatprep.mubr.bf16.mxu1 %v2892_v42  ;;  %v7281_v53 = vld [vmem:[%s7765_s6 + $0x1] ss:$0 sm:$0xff] }
 0x2e7   : > { %v2864_v61 = vpop.permute.xlu0 %2863  ;;  %v2897_v60 = vld [vmem:[#allocation3 + $0x40] sm:$0xff] }
 0x2e8   : > { %2872 = vst.msk [vmem:[#allocation3 + $0x90] sm:$0xff] %vm2723_vm10, %v2864_v61 }
 0x2e9   : > { %3307 = vmatmul.mubr.bf16.vlgmr.msra.gmra.mrb[16].mxu1 %v2891_v30 }
 0x2ea   : > { %3314 = vmatprep.mubr.bf16.mxu1 %v2897_v60  ;;  %5645 = vmatpush3.bf16.msra.mxu1 %v5924_v22  ;;  %v5930_v60 = vld [vmem:[%s7762_s3 + $0x10] sm:$0xff]  }
 0x2eb   : > { %v2902_v13 = vld [vmem:[#allocation3 + $0x68] sm:$0xff]  ;;  %5646 = vmatprep.subr.bf16.mxu1 %v5925_v46 }
 0x2ee   : > { %5647 = vmatpush3.bf16.msra.mxu1 %v5926_v27 }
 0x2ef   : > { %v2907_v39 = vld [vmem:[#allocation3 + $0x90] sm:$0xff]  ;;  %5648 = vmatprep.subr.bf16.mxu1 %v5929_v44 }
 0x2f1   : > { %3315 = vmatmul.mubr.bf16.gmra.mrb[20].mxu1 %v2896_v7 }
 0x2f2   : > { %3322 = vmatprep.mubr.bf16.mxu1 %v2902_v13  ;;  %v5933_v13 = vld [vmem:[%s7762_s3 + $0x58] sm:$0xff]   ;;  %5649 = vmatpush3.bf16.msra.mxu1 %v5930_v60 }
 0x2f3   : > { %5650 = vmatprep.subr.bf16.mxu1 %v5933_v13 }
 0x2f9   : > { %3323 = vmatmul.mubr.bf16.gmra.mrb[24].mxu1 %v2901_v25  ;;  %v5936_v25 = vld [vmem:[%s7762_s3 + $0x90] sm:$0xff]  }
 0x2fa   : > { %3330 = vmatprep.mubr.bf16.mxu1 %v2907_v39  ;;  %5671 = vmatpush3.bf16.msra.mxu0 %v5936_v25 }
 0x301   : > { %3331 = vmatmul.mubr.bf16.gmra.mrb[28].mxu1 %v2906_v19 }
 0x322   : > { %v7202_v24 = vpop.f32.mrb[32].mxu0 }
 0x323   : > { %v7204_v33 = vpop.f32.mrb[33].mxu0 }
 0x324   : > { %v7206_v10 = vpop.f32.mrb[34].mxu0 }
 0x325   : > { %v7208_v50 = vpop.f32.mrb[35].mxu0 }
 0x341   : > { %v7210_v1 = vpop.f32.mrb[36].mxu0 }
 0x342   : > { %v7212_v23 = vpop.f32.mrb[37].mxu0 }
 0x343   : > { %v7214_v38 = vpop.f32.mrb[38].mxu0 }
 0x344   : > { %v7216_v36 = vpop.f32.mrb[39].mxu0 }
 0x36f   : > { %v5572_v47 = vpop.f32.mrb[0].mxu1 }
 0x370   : > { %v5573_v40 = vpop.f32.mrb[1].mxu1 }
 0x371   : > { %v5574_v2 = vadd.f32 %v5573_v40, %v5572_v47  ;;  %v5575_v45 = vpop.f32.mrb[2].mxu1 }
 0x372   : > { %v5576_v28 = vpop.f32.mrb[3].mxu1 }
 0x373   : > { %v5577_v37 = vadd.f32 %v5576_v28, %v5575_v45 }
 0x397   : > { %v5578_v43 = vpop.f32.mrb[4].mxu1 }
 0x398   : > { %v5579_v8 = vpop.f32.mrb[5].mxu1 }
 0x399   : > { %v5580_v41 = vadd.f32 %v5579_v8, %v5578_v43  ;;  %v5581_v14 = vpop.f32.mrb[6].mxu1 }
 0x39a   : > { %v5582_v63 = vpop.f32.mrb[7].mxu1 }
 0x39b   : > { %v7232_v48 = vadd.f32 %v5582_v63, %v5581_v14 }
 0x39f   : > { %v5584_v59 = vpop.f32.mrb[8].mxu1 }
 0x3a0   : > { %v5585_v49 = vpop.f32.mrb[9].mxu1 }
 0x3a1   : > { %v7234_v34 = vadd.f32 %v5585_v49, %v5584_v59  ;;  %v5587_v17 = vpop.f32.mrb[10].mxu1 }
 0x3a2   : > { %v5588_v5 = vpop.f32.mrb[11].mxu1 }
 0x3a3   : > { %v7236_v55 = vadd.f32 %v5588_v5, %v5587_v17 }
 0x3b4   : > { %v5590_v15 = vpop.f32.mrb[12].mxu1 }
 0x3b5   : > { %v5591_v12 = vpop.f32.mrb[13].mxu1 }
 0x3b6   : > { %v7238_v35 = vadd.f32 %v5591_v12, %v5590_v15  ;;  %v5593_v0 = vpop.f32.mrb[14].mxu1 }
 0x3b7   : > { %v5594_v31 = vpop.f32.mrb[15].mxu1 }
 0x3b8   : > { %v7240_v3 = vadd.f32 %v5594_v31, %v5593_v0 }
 0x3bc   : > { %v5612_v57 = vpop.f32.mrb[16].mxu1 }
 0x3bd   : > { %v5613_v4 = vpop.f32.mrb[17].mxu1 }
 0x3be   : > { %v5614_v52 = vadd.f32 %v5613_v4, %v5612_v57  ;;  %v5615_v26 = vpop.f32.mrb[18].mxu1 }
 0x3bf   : > { %v5616_v58 = vpop.f32.mrb[19].mxu1 }
 0x3c0   : > { %v3309_v21 = vadd.f32 %v5614_v52, %v5574_v2  ;;  %v5617_v16 = vadd.f32 %v5616_v58, %v5615_v26 }
 0x3c2   : > { %v3374_v6 = vadd.f32 %v7204_v33, %v3309_v21  ;;  %v3312_v9 = vadd.f32 %v5617_v16, %v5577_v37  ;;  %v5934_v37 = vld [vmem:[%s7762_s3 + $0x18] sm:$0xff]  }
 0x3c3   : > { %5651 = vmatpush3.bf16.msra.mxu1 %v5934_v37 }
 0x3c4   : > { %v3409_v42 = vmul.f32 %v7266_v20, %v3374_v6  ;;  %v3377_v61 = vadd.f32 %v7208_v50, %v3312_v9  ;;  %v5618_v30 = vpop.f32.mrb[20].mxu1 }
 0x3c5   : > { %v5619_v7 = vpop.f32.mrb[21].mxu1 }
 0x3c6   : > { %v3422_v39 = vadd.f32 %v7281_v53, %v3409_v42  ;;  %v3410_v19 = vmul.f32 %v7266_v20, %v3377_v61  ;;  %v5620_v33 = vadd.f32 %v5619_v7, %v5618_v30  ;;  %v5621_v50 = vpop.f32.mrb[22].mxu1 }
 0x3c7   : > { %v5622_v47 = vpop.f32.mrb[23].mxu1 }
 0x3c8   : > { %v3430_v40 = vmax.f32 %v3422_v39, 0.0  ;;  %v3423_v2 = vadd.f32 %v7281_v53, %v3410_v19  ;;  %v3317_v45 = vadd.f32 %v5620_v33, %v5580_v41  ;;  %v5623_v28 = vadd.f32 %v5622_v47, %v5621_v50 }
 0x3ca   : > { %v3446_v43 = vcombine.high %v3430_v40, %v3430_v40  ;;  %v3453_v8 = vrot.slane %v3430_v40, %v6283_v32  ;;  %v3431_v14 = vmax.f32 %v3423_v2, 0.0  ;;  %v3382_v63 = vadd.f32 %v7202_v24, %v3317_v45 }
 0x3cb   : > { %v3320_v59 = vadd.f32 %v5623_v28, %v7232_v48 }
 0x3cc   : > { %v3460_v49 = vrot.slane %v3446_v43, %v6283_v32  ;;  %v3461_v17 = vcombine.high %v3453_v8, %v3453_v8  ;;  %v3614_v41 = vsel %vm1425_vm1, %v3453_v8, -inf  ;;  %v3463_v5 = vcombine.high %v3431_v14, %v3431_v14  ;;  %v7305_v15 = vpop.f32.mrb[24].mxu1 }
 0x3cd   : > { %v3615_v12 = vrot.slane %v3614_v41, 4  ;;  %v3470_v0 = vrot.slane %v3431_v14, %v6283_v32  ;;  %v7309_v31 = vmul.f32 %v7266_v20, %v3382_v63  ;;  %v7312_v57 = vadd.f32 %v7206_v10, %v3320_v59  ;;  %v7314_v24 = vpop.f32.mrb[25].mxu1 }
 0x3ce   : > { %v3462_v48 = vcombine.high %v3460_v49, %v3460_v49  ;;  %v3621_v4 = vsel %vm1425_vm1, %v3461_v17, -inf  ;;  %v3628_v62 = vsel %vm1425_vm1, %v3460_v49, -inf  ;;  %v3477_v22 = vrot.slane %v3463_v5, %v6283_v32  ;;  %v7319_v46 = vpop.f32.mrb[26].mxu1 }
 0x3cf   : > { %v3616_v52 = vmax.f32 %v3614_v41, %v3615_v12  ;;  %v3622_v26 = vrot.slane %v3621_v4, 4  ;;  %v3629_v51 = vrot.slane %v3628_v62, 4  ;;  %v3478_v54 = vcombine.high %v3470_v0, %v3470_v0  ;;  %v7321_v58 = vpop.f32.mrb[27].mxu1 }
 0x3d0   : > { %v3635_v10 = vsel %vm1425_vm1, %v3462_v48, -inf  ;;  %v3479_v56 = vcombine.high %v3477_v22, %v3477_v22  ;;  %v3642_v21 = vsel %vm1425_vm1, %v3470_v0, -inf  ;;  %v3656_v16 = vsel %vm1425_vm1, %v3477_v22, -inf }
 0x3d1   : > { %v3617_v27 = vrot.slane %v3616_v52, 2  ;;  %v3623_v44 = vmax.f32 %v3621_v4, %v3622_v26  ;;  %v3630_v29 = vmax.f32 %v3628_v62, %v3629_v51  ;;  %v3636_v6 = vrot.slane %v3635_v10, 4 }
 0x3d2   : > { %v3643_v9 = vrot.slane %v3642_v21, 4  ;;  %v3649_v11 = vsel %vm1425_vm1, %v3478_v54, -inf  ;;  %v3657_v42 = vrot.slane %v3656_v16, 4  ;;  %v3663_v61 = vsel %vm1425_vm1, %v3479_v56, -inf }
 0x3d3   : > { %v3618_v30 = vmax.f32 %v3616_v52, %v3617_v27  ;;  %v3624_v60 = vrot.slane %v3623_v44, 2  ;;  %v3631_v7 = vrot.slane %v3630_v29, 2  ;;  %v3637_v13 = vmax.f32 %v3635_v10, %v3636_v6 }
 0x3d4   : > { %v3644_v25 = vmax.f32 %v3642_v21, %v3643_v9  ;;  %v3650_v39 = vrot.slane %v3649_v11, 4  ;;  %v3658_v19 = vmax.f32 %v3656_v16, %v3657_v42  ;;  %v3664_v33 = vrot.slane %v3663_v61, 4  ;;  %v7328_v50 = vpop.f32.mrb[28].mxu1 }
 0x3d5   : > { %v3619_v47 = vrot.slane %v3618_v30, 1  ;;  %v3625_v40 = vmax.f32 %v3623_v44, %v3624_v60  ;;  %v3632_v2 = vmax.f32 %v3630_v29, %v3631_v7  ;;  %v3638_v45 = vrot.slane %v3637_v13, 2  ;;  %v7330_v28 = vpop.f32.mrb[29].mxu1 }
 0x3d6   : > { %v3645_v37 = vrot.slane %v3644_v25, 2  ;;  %v3651_v43 = vmax.f32 %v3649_v11, %v3650_v39  ;;  %v3659_v8 = vrot.slane %v3658_v19, 2  ;;  %v3665_v14 = vmax.f32 %v3663_v61, %v3664_v33  ;;  %v7332_v63 = vpop.f32.mrb[30].mxu1 }
 0x3d7   : > { %v3620_v59 = vmax.f32 %v3618_v30, %v3619_v47  ;;  %v3626_v49 = vrot.slane %v3625_v40, 1  ;;  %v3633_v17 = vrot.slane %v3632_v2, 1  ;;  %v3639_v41 = vmax.f32 %v3637_v13, %v3638_v45  ;;  %v7334_v5 = vpop.f32.mrb[31].mxu1 }
 0x3d8   : > { %v3646_v12 = vmax.f32 %v3644_v25, %v3645_v37  ;;  %v3652_v0 = vrot.slane %v3651_v43, 2  ;;  %v3660_v48 = vmax.f32 %v3658_v19, %v3659_v8  ;;  %v3666_v4 = vrot.slane %v3665_v14, 2 }
 0x3d9   : > { %v3627_v62 = vmax.f32 %v3625_v40, %v3626_v49  ;;  %v3634_v22 = vmax.f32 %v3632_v2, %v3633_v17  ;;  %v3640_v52 = vrot.slane %v3639_v41, 1  ;;  %v3838_v26 = vsel %vm2322_vm2, %v3620_v59, -inf }
 0x3da   : > { %v3647_v51 = vrot.slane %v3646_v12, 1  ;;  %v3653_v54 = vmax.f32 %v3651_v43, %v3652_v0  ;;  %v3661_v10 = vrot.slane %v3660_v48, 1  ;;  %v3667_v56 = vmax.f32 %v3665_v14, %v3666_v4 }
 0x3db   : > { %v3641_v21 = vmax.f32 %v3639_v41, %v3640_v52  ;;  %v3841_v16 = vsel %vm2322_vm2, %v3627_v62, -inf  ;;  %v3844_v27 = vsel %vm2322_vm2, %v3634_v22, -inf  ;;  %v3424_v44 = vadd.f32 %v7281_v53, %v7309_v31 }
 0x3dc   : > { %v3648_v29 = vmax.f32 %v3646_v12, %v3647_v51  ;;  %v3654_v6 = vrot.slane %v3653_v54, 1  ;;  %v3662_v9 = vmax.f32 %v3660_v48, %v3661_v10  ;;  %v3668_v11 = vrot.slane %v3667_v56, 1 }
 0x3dd   : > { %v3847_v42 = vsel %vm2322_vm2, %v3641_v21, -inf  ;;  %v3432_v61 = vmax.f32 %v3424_v44, 0.0  ;;  %v3412_v30 = vmul.f32 %v7266_v20, %v7312_v57  ;;  %v5626_v60 = vadd.f32 %v7314_v24, %v7305_v15 }
 0x3de   : > { %v3655_v7 = vmax.f32 %v3653_v54, %v3654_v6  ;;  %v3669_v13 = vmax.f32 %v3667_v56, %v3668_v11  ;;  %v3839_v25 = vsel %vm2322_vm2, %v3648_v29, -inf  ;;  %v3845_v39 = vsel %vm2322_vm2, %v3662_v9, -inf }
 0x3df   : > { %v3840_v31 = vmax.f32 %v3838_v26, %v3839_v25  ;;  %v3846_v19 = vmax.f32 %v3844_v27, %v3845_v39  ;;  %v3480_v33 = vcombine.high %v3432_v61, %v3432_v61  ;;  %v3487_v47 = vrot.slane %v3432_v61, %v6283_v32 }
 0x3e0   : > { %v3842_v40 = vsel %vm2322_vm2, %v3655_v7, -inf  ;;  %v3848_v2 = vsel %vm2322_vm2, %v3669_v13, -inf  ;;  %v3425_v57 = vadd.f32 %v7281_v53, %v3412_v30  ;;  %v3325_v45 = vadd.f32 %v5626_v60, %v7234_v34 }
 0x3e1   : > { %v3843_v15 = vmax.f32 %v3841_v16, %v3842_v40  ;;  %v3849_v24 = vmax.f32 %v3847_v42, %v3848_v2  ;;  %v3494_v37 = vrot.slane %v3480_v33, %v6283_v32  ;;  %v3495_v43 = vcombine.high %v3487_v47, %v3487_v47 }
 0x3e2   : > { %v3670_v8 = vsel %vm1425_vm1, %v3487_v47, -inf  ;;  %v3433_v14 = vmax.f32 %v3425_v57, 0.0  ;;  %v3390_v59 = vadd.f32 %v7212_v23, %v3325_v45  ;;  %v5629_v49 = vadd.f32 %v7321_v58, %v7319_v46 }
 0x3e3   : > { %v3909_v17 = vsel %vm2599_vm3, %v3843_v15, %v3840_v31  ;;  %v3496_v41 = vcombine.high %v3494_v37, %v3494_v37  ;;  %v3671_v12 = vrot.slane %v3670_v8, 4  ;;  %v3677_v0 = vsel %vm1425_vm1, %v3495_v43, -inf }
 0x3e4   : > { %v3910_v34 = vsel %vm2601_vm4, %v3846_v19, %v3909_v17  ;;  %v3678_v48 = vrot.slane %v3677_v0, 4  ;;  %v3684_v4 = vsel %vm1425_vm1, %v3494_v37, -inf  ;;  %v3497_v62 = vcombine.high %v3433_v14, %v3433_v14 }
 0x3e5   : > { %v3911_v22 = vsel %vm2603_vm5, %v3849_v24, %v3910_v34  ;;  %v3672_v52 = vmax.f32 %v3670_v8, %v3671_v12  ;;  %v3685_v26 = vrot.slane %v3684_v4, 4  ;;  %v3691_v23 = vsel %vm1425_vm1, %v3496_v41, -inf }
 0x3e6   : > { %3927 = vst.msk [vmem:[#allocation4 + $0x9] sm:$0xf] %vm3926_vm12, %v3911_v22  ;;  %v3679_v46 = vmax.f32 %v3677_v0, %v3678_v48  ;;  %v3692_v58 = vrot.slane %v3691_v23, 4  ;;  %v3504_v51 = vrot.slane %v3433_v14, %v6283_v32  ;;  %v3511_v54 = vrot.slane %v3497_v62, %v6283_v32 }
 0x3e7   : > { %v3673_v10 = vrot.slane %v3672_v52, 2  ;;  %v3686_v56 = vmax.f32 %v3684_v4, %v3685_v26  ;;  %v3413_v21 = vmul.f32 %v7266_v20, %v3390_v59  ;;  %v3328_v16 = vadd.f32 %v5629_v49, %v7236_v55 }
 0x3e8   : > { %v3680_v27 = vrot.slane %v3679_v46, 2  ;;  %v3693_v44 = vmax.f32 %v3691_v23, %v3692_v58  ;;  %v3512_v29 = vcombine.high %v3504_v51, %v3504_v51  ;;  %v3513_v6 = vcombine.high %v3511_v54, %v3511_v54 }
 0x3e9   : > { %v3674_v9 = vmax.f32 %v3672_v52, %v3673_v10  ;;  %v3687_v11 = vrot.slane %v3686_v56, 2  ;;  %v3698_v42 = vsel %vm1425_vm1, %v3504_v51, -inf  ;;  %v3712_v61 = vsel %vm1425_vm1, %v3511_v54, -inf }
 0x3ea   : > { %v3681_v30 = vmax.f32 %v3679_v46, %v3680_v27  ;;  %v3694_v60 = vrot.slane %v3693_v44, 2  ;;  %v3699_v7 = vrot.slane %v3698_v42, 4  ;;  %v3705_v13 = vsel %vm1425_vm1, %v3512_v29, -inf }
 0x3eb   : > { %v3675_v25 = vrot.slane %v3674_v9, 1  ;;  %v3688_v39 = vmax.f32 %v3686_v56, %v3687_v11  ;;  %v3706_v31 = vrot.slane %v3705_v13, 4  ;;  %v3713_v19 = vrot.slane %v3712_v61, 4 }
 0x3ec   : > { %v3682_v55 = vrot.slane %v3681_v30, 1  ;;  %v3695_v33 = vmax.f32 %v3693_v44, %v3694_v60  ;;  %v3700_v47 = vmax.f32 %v3698_v42, %v3699_v7  ;;  %v3719_v40 = vsel %vm1425_vm1, %v3513_v6, -inf }
 0x3ed   : > { %v3676_v2 = vmax.f32 %v3674_v9, %v3675_v25  ;;  %v3689_v57 = vrot.slane %v3688_v39, 1  ;;  %v3707_v45 = vmax.f32 %v3705_v13, %v3706_v31  ;;  %v3714_v15 = vmax.f32 %v3712_v61, %v3713_v19 }
 0x3ee   : > { %v3683_v24 = vmax.f32 %v3681_v30, %v3682_v55  ;;  %v3696_v37 = vrot.slane %v3695_v33, 1  ;;  %v3701_v43 = vrot.slane %v3700_v47, 2  ;;  %v3720_v8 = vrot.slane %v3719_v40, 4 }
 0x3ef   : > { %v3690_v14 = vmax.f32 %v3688_v39, %v3689_v57  ;;  %v3850_v59 = vsel %vm2322_vm2, %v3676_v2, -inf  ;;  %v3708_v49 = vrot.slane %v3707_v45, 2  ;;  %v3715_v17 = vrot.slane %v3714_v15, 2 }
 0x3f0   : > { %v3697_v41 = vmax.f32 %v3695_v33, %v3696_v37  ;;  %v3853_v12 = vsel %vm2322_vm2, %v3683_v24, -inf  ;;  %v3702_v0 = vmax.f32 %v3700_v47, %v3701_v43  ;;  %v3721_v34 = vmax.f32 %v3719_v40, %v3720_v8 }
 0x3f1   : > { %v3856_v48 = vsel %vm2322_vm2, %v3690_v14, -inf  ;;  %v3709_v4 = vmax.f32 %v3707_v45, %v3708_v49  ;;  %v3716_v62 = vmax.f32 %v3714_v15, %v3715_v17  ;;  %v3426_v22 = vadd.f32 %v7281_v53, %v3413_v21 }
 0x3f2   : > { %v3859_v52 = vsel %vm2322_vm2, %v3697_v41, -inf  ;;  %v3703_v26 = vrot.slane %v3702_v0, 1  ;;  %v3722_v23 = vrot.slane %v3721_v34, 2  ;;  %v3393_v46 = vadd.f32 %v7216_v36, %v3328_v16 }
 0x3f3   : > { %v3710_v58 = vrot.slane %v3709_v4, 1  ;;  %v3717_v51 = vrot.slane %v3716_v62, 1  ;;  %v3434_v54 = vmax.f32 %v3426_v22, 0.0  ;;  %v5632_v10 = vadd.f32 %v7330_v28, %v7328_v50 }
 0x3f4   : > { %v3704_v56 = vmax.f32 %v3702_v0, %v3703_v26  ;;  %v3723_v27 = vmax.f32 %v3721_v34, %v3722_v23  ;;  %v3414_v44 = vmul.f32 %v7266_v20, %v3393_v46  ;;  %v7384_v29 = vadd.f32 %v7334_v5, %v7332_v63 }
 0x3f5   : > { %v3711_v21 = vmax.f32 %v3709_v4, %v3710_v58  ;;  %v3718_v6 = vmax.f32 %v3716_v62, %v3717_v51  ;;  %v3514_v9 = vcombine.high %v3434_v54, %v3434_v54  ;;  %v3521_v11 = vrot.slane %v3434_v54, %v6283_v32 }
 0x3f6   : > { %v3724_v36 = vrot.slane %v3723_v27, 1  ;;  %v3851_v16 = vsel %vm2322_vm2, %v3704_v56, -inf  ;;  %v3427_v42 = vadd.f32 %v7281_v53, %v3414_v44  ;;  %v7390_v50 = vadd.f32 %v5632_v10, %v7238_v35 }
 0x3f7   : > { %v3852_v28 = vmax.f32 %v3850_v59, %v3851_v16  ;;  %v3854_v61 = vsel %vm2322_vm2, %v3711_v21, -inf  ;;  %v3857_v30 = vsel %vm2322_vm2, %v3718_v6, -inf  ;;  %v3528_v63 = vrot.slane %v3514_v9, %v6283_v32 }
 0x3f8   : > { %v3725_v5 = vmax.f32 %v3723_v27, %v3724_v36  ;;  %v3855_v60 = vmax.f32 %v3853_v12, %v3854_v61  ;;  %v3858_v7 = vmax.f32 %v3856_v48, %v3857_v30  ;;  %v3529_v13 = vcombine.high %v3521_v11, %v3521_v11 }
 0x3f9   : > { %v3530_v25 = vcombine.high %v3528_v63, %v3528_v63  ;;  %v3726_v39 = vsel %vm1425_vm1, %v3521_v11, -inf  ;;  %v3740_v31 = vsel %vm1425_vm1, %v3528_v63, -inf  ;;  %v3435_v19 = vmax.f32 %v3427_v42, 0.0 }
 0x3fa   : > { %v3860_v35 = vsel %vm2322_vm2, %v3725_v5, -inf  ;;  %v3912_v55 = vsel %vm2599_vm3, %v3855_v60, %v3852_v28  ;;  %v3727_v33 = vrot.slane %v3726_v39, 4  ;;  %v3733_v47 = vsel %vm1425_vm1, %v3529_v13, -inf }
 0x3fb   : > { %v3861_v40 = vmax.f32 %v3859_v52, %v3860_v35  ;;  %v3913_v2 = vsel %vm2601_vm4, %v3858_v7, %v3912_v55  ;;  %v3734_v57 = vrot.slane %v3733_v47, 4  ;;  %v3741_v45 = vrot.slane %v3740_v31, 4 }
 0x3fc   : > { %v3728_v15 = vmax.f32 %v3726_v39, %v3727_v33  ;;  %v3747_v24 = vsel %vm1425_vm1, %v3530_v25, -inf  ;;  %v3531_v37 = vcombine.high %v3435_v19, %v3435_v19  ;;  %v3538_v43 = vrot.slane %v3435_v19, %v6283_v32 }
 0x3fd   : > { %v3914_v8 = vsel %vm2603_vm5, %v3861_v40, %v3913_v2  ;;  %v3735_v14 = vmax.f32 %v3733_v47, %v3734_v57  ;;  %v3742_v59 = vmax.f32 %v3740_v31, %v3741_v45  ;;  %v3748_v49 = vrot.slane %v3747_v24, 4 }
 0x3fe   : > { %3928 = vst.msk [vmem:[#allocation4 + $0x11] sm:$0xf] %vm3926_vm12, %v3914_v8  ;;  %v3729_v17 = vrot.slane %v3728_v15, 2  ;;  %v3545_v41 = vrot.slane %v3531_v37, %v6283_v32  ;;  %v3546_v12 = vcombine.high %v3538_v43, %v3538_v43  ;;  %v3754_v0 = vsel %vm1425_vm1, %v3538_v43, -inf }
 0x3ff   : > { %v3736_v34 = vrot.slane %v3735_v14, 2  ;;  %v3743_v48 = vrot.slane %v3742_v59, 2  ;;  %v3749_v4 = vmax.f32 %v3747_v24, %v3748_v49  ;;  %v3755_v62 = vrot.slane %v3754_v0, 4 }
 0x400   : > { %v3730_v22 = vmax.f32 %v3728_v15, %v3729_v17  ;;  %v3547_v52 = vcombine.high %v3545_v41, %v3545_v41  ;;  %v3761_v26 = vsel %vm1425_vm1, %v3546_v12, -inf  ;;  %v3768_v23 = vsel %vm1425_vm1, %v3545_v41, -inf }
 0x401   : > { %v3737_v46 = vmax.f32 %v3735_v14, %v3736_v34  ;;  %v3744_v58 = vmax.f32 %v3742_v59, %v3743_v48  ;;  %v3750_v51 = vrot.slane %v3749_v4, 2  ;;  %v3756_v54 = vmax.f32 %v3754_v0, %v3755_v62 }
 0x402   : > { %v3762_v10 = vrot.slane %v3761_v26, 4  ;;  %v3769_v56 = vrot.slane %v3768_v23, 4  ;;  %v3775_v27 = vsel %vm1425_vm1, %v3547_v52, -inf  ;;  %v3731_v44 = vrot.slane %v3730_v22, 1 }
 0x403   : > { %v3751_v21 = vmax.f32 %v3749_v4, %v3750_v51  ;;  %v3757_v6 = vrot.slane %v3756_v54, 2  ;;  %v3776_v36 = vrot.slane %v3775_v27, 4  ;;  %v3738_v16 = vrot.slane %v3737_v46, 1 }
 0x404   : > { %v3763_v9 = vmax.f32 %v3761_v26, %v3762_v10  ;;  %v3770_v11 = vmax.f32 %v3768_v23, %v3769_v56  ;;  %v3745_v42 = vrot.slane %v3744_v58, 1  ;;  %v3732_v5 = vmax.f32 %v3730_v22, %v3731_v44 }
 0x405   : > { %v3758_v28 = vmax.f32 %v3756_v54, %v3757_v6  ;;  %v3777_v63 = vmax.f32 %v3775_v27, %v3776_v36  ;;  %v3752_v60 = vrot.slane %v3751_v21, 1  ;;  %v3398_v31 = vadd.f32 %v7210_v1, %v7390_v50 }
 0x406   : > { %v3764_v61 = vrot.slane %v3763_v9, 2  ;;  %v3771_v30 = vrot.slane %v3770_v11, 2  ;;  %v3739_v19 = vmax.f32 %v3737_v46, %v3738_v16  ;;  %v3746_v35 = vmax.f32 %v3744_v58, %v3745_v42 }
 0x407   : > { %v3759_v7 = vrot.slane %v3758_v28, 1  ;;  %v3778_v39 = vrot.slane %v3777_v63, 2  ;;  %v3336_v33 = vadd.f32 %v7384_v29, %v7240_v3  ;;  %v3415_v57 = vmul.f32 %v7266_v20, %v3398_v31 }
 0x408   : > { %v3765_v13 = vmax.f32 %v3763_v9, %v3764_v61  ;;  %v3772_v25 = vmax.f32 %v3770_v11, %v3771_v30  ;;  %v3753_v45 = vmax.f32 %v3751_v21, %v3752_v60  ;;  %v3862_v15 = vsel %vm2322_vm2, %v3732_v5, -inf  ;;  %v5939_v61 = vld [vmem:[%s7762_s3 + $0x60] sm:$0xff]  }
 0x409   : > { %v3760_v55 = vmax.f32 %v3758_v28, %v3759_v7  ;;  %v3779_v2 = vmax.f32 %v3777_v63, %v3778_v39  ;;  %v3401_v37 = vadd.f32 %v7214_v38, %v3336_v33  ;;  %v3865_v14 = vsel %vm2322_vm2, %v3739_v19, -inf  ;;  %v5940_v30 = vld [vmem:[%s7762_s3 + $0x20] sm:$0xff]   ;;  %v5941_v63 = vld [vmem:[%s7762_s3 + $0xd8] sm:$0xff]   ;;  %v5943_v39 = vld [vmem:[%s7762_s3 + $0x68] sm:$0xff]   ;;  %5652 = vmatprep.subr.bf16.mxu1 %v5939_v61 }
 0x40a   : > { %v3766_v47 = vrot.slane %v3765_v13, 1  ;;  %v3773_v40 = vrot.slane %v3772_v25, 1  ;;  %v3428_v3 = vadd.f32 %v7281_v53, %v3415_v57  ;;  %v3868_v59 = vsel %vm2322_vm2, %v3746_v35, -inf  ;;  %5672 = vmatprep.subr.bf16.mxu0 %v5941_v63  ;;  %v5945_v33 = vld [vmem:[%s7762_s3 + $0xe0] sm:$0xff]   ;;  %5653 = vmatpush3.bf16.msra.mxu1 %v5940_v30 }
 0x40b   : > { %v3863_v24 = vsel %vm2322_vm2, %v3760_v55, -inf  ;;  %v3780_v50 = vrot.slane %v3779_v2, 1  ;;  %v3416_v29 = vmul.f32 %v7266_v20, %v3401_v37  ;;  %v3871_v48 = vsel %vm2322_vm2, %v3753_v45, -inf  ;;  %v5944_v45 = vld [vmem:[%s7762_s3 + $0x28] sm:$0xff]   ;;  %5654 = vmatprep.subr.bf16.mxu1 %v5943_v39 }
 0x40c   : > { %v3767_v43 = vmax.f32 %v3765_v13, %v3766_v47  ;;  %v3774_v1 = vmax.f32 %v3772_v25, %v3773_v40  ;;  %v3864_v8 = vmax.f32 %v3862_v15, %v3863_v24  ;;  %v3436_v38 = vmax.f32 %v3428_v3, 0.0  ;;  %v5942_v25 = vld [vmem:[%s7762_s3 + $0x98] sm:$0xff]   ;;  %v5946_v15 = vld [vmem:[%s7762_s3 + $0xa0] sm:$0xff]  }
 0x40d   : > { %v3781_v49 = vmax.f32 %v3779_v2, %v3780_v50  ;;  %v3429_v34 = vadd.f32 %v7281_v53, %v3416_v29  ;;  %5673 = vmatpush3.bf16.msra.mxu0 %v5942_v25 }
 0x40e   : > { %v3866_v17 = vsel %vm2322_vm2, %v3767_v43, -inf  ;;  %v3869_v41 = vsel %vm2322_vm2, %v3774_v1, -inf  ;;  %v3548_v20 = vcombine.high %v3436_v38, %v3436_v38  ;;  %v3555_v52 = vrot.slane %v3436_v38, %v6283_v32  ;;  %5674 = vmatprep.subr.bf16.mxu0 %v5945_v33  ;;  %v5915_v38 = vld [vmem:[#allocation4 + $0x1] ss:$8 sps:$4 sm:$0xff]   ;;  %5655 = vmatpush3.bf16.msra.mxu1 %v5944_v45 }
 0x40f   : > { %v3867_v12 = vmax.f32 %v3865_v14, %v3866_v17  ;;  %v3870_v0 = vmax.f32 %v3868_v59, %v3869_v41  ;;  %v3872_v4 = vsel %vm2322_vm2, %v3781_v49, -inf  ;;  %v3437_v23 = vmax.f32 %v3429_v34, 0.0 }
 0x410   : > { %v3873_v62 = vmax.f32 %v3871_v48, %v3872_v4  ;;  %v3562_v58 = vrot.slane %v3548_v20, %v6283_v32  ;;  %v3563_v51 = vcombine.high %v3555_v52, %v3555_v52  ;;  %v3782_v53 = vsel %vm1425_vm1, %v3555_v52, -inf }
 0x411   : > { %v3915_v22 = vsel %vm2599_vm3, %v3867_v12, %v3864_v8  ;;  %v3783_v54 = vrot.slane %v3782_v53, 4  ;;  %v3565_v10 = vcombine.high %v3437_v23, %v3437_v23  ;;  %v3572_v56 = vrot.slane %v3437_v23, %v6283_v32  ;;  %5675 = vmatpush3.bf16.msra.mxu0 %v5946_v15  ;;  %v5952_v15 = vld [vmem:[%s7762_s3 + $0x30] sm:$0xff]  }
 0x412   : > { %v3916_v26 = vsel %vm2601_vm4, %v3870_v0, %v3915_v22  ;;  %v3564_v27 = vcombine.high %v3562_v58, %v3562_v58  ;;  %v3789_v44 = vsel %vm1425_vm1, %v3563_v51, -inf  ;;  %v3796_v21 = vsel %vm1425_vm1, %v3562_v58, -inf }
 0x413   : > { %v3917_v46 = vsel %vm2603_vm5, %v3873_v62, %v3916_v26  ;;  %v3784_v6 = vmax.f32 %v3782_v53, %v3783_v54  ;;  %v3790_v9 = vrot.slane %v3789_v44, 4  ;;  %v3797_v11 = vrot.slane %v3796_v21, 4 }
 0x414   : > { %3929 = vst.msk [vmem:[#allocation4 + $0x19] sm:$0xf] %vm3926_vm12, %v3917_v46  ;;  %v3579_v36 = vrot.slane %v3565_v10, %v6283_v32  ;;  %v3803_v16 = vsel %vm1425_vm1, %v3564_v27, -inf  ;;  %v3580_v42 = vcombine.high %v3572_v56, %v3572_v56  ;;  %v3810_v28 = vsel %vm1425_vm1, %v3572_v56, -inf  ;;  %v5937_v27 = vld [vmem:[#allocation4] ss:$8 sps:$4 sm:$0xff]  }
 0x415   : > { %v3785_v5 = vrot.slane %v3784_v6, 2  ;;  %v3791_v60 = vmax.f32 %v3789_v44, %v3790_v9  ;;  %v3798_v7 = vmax.f32 %v3796_v21, %v3797_v11  ;;  %v3804_v13 = vrot.slane %v3803_v16, 4  ;;  %v5949_v44 = vld [vmem:[#allocation4 + $0x2] ss:$8 sps:$4 sm:$0xff]  }
 0x416   : > { %v3581_v31 = vcombine.high %v3579_v36, %v3579_v36  ;;  %v3811_v19 = vrot.slane %v3810_v28, 4  ;;  %v3817_v35 = vsel %vm1425_vm1, %v3580_v42, -inf  ;;  %v3824_v55 = vsel %vm1425_vm1, %v3579_v36, -inf }
 0x417   : > { %v3786_v47 = vmax.f32 %v3784_v6, %v3785_v5  ;;  %v3792_v40 = vrot.slane %v3791_v60, 2  ;;  %v3799_v2 = vrot.slane %v3798_v7, 2  ;;  %v3805_v57 = vmax.f32 %v3803_v16, %v3804_v13 }
 0x418   : > { %v3812_v24 = vmax.f32 %v3810_v28, %v3811_v19  ;;  %v3818_v37 = vrot.slane %v3817_v35, 4  ;;  %v3825_v43 = vrot.slane %v3824_v55, 4  ;;  %v3831_v1 = vsel %vm1425_vm1, %v3581_v31, -inf }
 0x419   : > { %v3787_v50 = vrot.slane %v3786_v47, 1  ;;  %v3793_v8 = vmax.f32 %v3791_v60, %v3792_v40  ;;  %v3800_v14 = vmax.f32 %v3798_v7, %v3799_v2  ;;  %v3806_v3 = vrot.slane %v3805_v57, 2 }
 0x41a   : > { %v3813_v29 = vrot.slane %v3812_v24, 2  ;;  %v3819_v59 = vmax.f32 %v3817_v35, %v3818_v37  ;;  %v3826_v49 = vmax.f32 %v3824_v55, %v3825_v43  ;;  %v3832_v17 = vrot.slane %v3831_v1, 4  ;;  %v5954_v37 = vld [vmem:[%s7762_s3 + $0xa8] sm:$0xff]   ;;  %v5957_v43 = vld [vmem:[%s7762_s3 + $0x78] sm:$0xff]  }
 0x41b   : > { %v3794_v41 = vrot.slane %v3793_v8, 1  ;;  %v3801_v12 = vrot.slane %v3800_v14, 1  ;;  %v3807_v0 = vmax.f32 %v3805_v57, %v3806_v3  ;;  %v5916_v34 = vld [vmem:[#allocation4 + $0x11] ss:$8 sps:$4 sm:$0xff]   ;;  %v3788_v52 = vmax.f32 %v3786_v47, %v3787_v50 }
 0x41c   : > { %v3814_v48 = vmax.f32 %v3812_v24, %v3813_v29  ;;  %v3820_v4 = vrot.slane %v3819_v59, 2  ;;  %v3827_v62 = vrot.slane %v3826_v49, 2  ;;  %v3833_v22 = vmax.f32 %v3831_v1, %v3832_v17  ;;  %v5938_v20 = vld [vmem:[#allocation4 + $0x10] ss:$8 sps:$4 sm:$0xff]   ;;  %v5953_v24 = vld [vmem:[%s7762_s3 + $0xe8] sm:$0xff]  }
 0x41d   : > { %v3808_v26 = vrot.slane %v3807_v0, 1  ;;  %v5950_v23 = vld [vmem:[#allocation4 + $0x12] ss:$8 sps:$4 sm:$0xff]   ;;  %v3795_v54 = vmax.f32 %v3793_v8, %v3794_v41  ;;  %v3802_v10 = vmax.f32 %v3800_v14, %v3801_v12  ;;  %v3957_v56 = vpack.c.bf16 %v5916_v34, %v5915_v38  ;;  %5676 = vmatprep.subr.bf16.mxu0 %v5953_v24 }
 0x41e   : > { %v3815_v46 = vrot.slane %v3814_v48, 1  ;;  %v3821_v58 = vmax.f32 %v3819_v59, %v3820_v4  ;;  %v3828_v51 = vmax.f32 %v3826_v49, %v3827_v62  ;;  %v3834_v53 = vrot.slane %v3833_v22, 2  ;;  %v5951_v57 = vld [vmem:[%s7762_s3 + $0x70] sm:$0xff]   ;;  %5677 = vmatpush3.bf16.msra.mxu0 %v5954_v37  ;;  %v5958_v1 = vld [vmem:[%s7762_s3 + $0x38] sm:$0xff]  }
 0x41f   : > { %v3809_v36 = vmax.f32 %v3807_v0, %v3808_v26  ;;  %v3874_v16 = vsel %vm2322_vm2, %v3788_v52, -inf  ;;  %3959 = vrot.lane.b32.xlu1 %v3957_v56, %s6094_s18  ;;  %v3943_v42 = vpack.c.bf16 %v5938_v20, %v5937_v27  ;;  %v3975_v28 = vpack.c.bf16 %v5950_v23, %v5949_v44  ;;  %5656 = vmatprep.subr.bf16.mxu1 %v5951_v57  ;;  %v5959_v50 = vld [vmem:[%s7762_s3 + $0xf0] sm:$0xff]   ;;  %v5961_v4 = vld [vmem:[%s7762_s3 + $0xf8] sm:$0xff]   ;;  %v5964_v44 = vld [vmem:[%s7762_s3 + $0x108] sm:$0xff]  }
 0x420   : > { %v3816_v21 = vmax.f32 %v3814_v48, %v3815_v46  ;;  %v3822_v6 = vrot.slane %v3821_v58, 1  ;;  %v3829_v9 = vrot.slane %v3828_v51, 1  ;;  %v3835_v11 = vmax.f32 %v3833_v22, %v3834_v53  ;;  %5657 = vmatpush3.bf16.msra.mxu1 %v5952_v15  ;;  %v5960_v8 = vld [vmem:[%s7762_s3 + $0xb0] sm:$0xff]   ;;  %5678 = vmatprep.subr.bf16.mxu0 %v5959_v50  ;;  %v5963_v22 = vld [vmem:[%s7762_s3 + $0xb8] sm:$0xff]  }
 0x421   : > { %v3877_v60 = vsel %vm2322_vm2, %v3795_v54, -inf  ;;  %3944 = vst.msk [vmem:[#allocation5] sm:$0xff] %vm2322_vm2, %v3943_v42  ;;  %3976 = vst.msk [vmem:[#allocation5 + $0x8] sm:$0xff] %vm2322_vm2, %v3975_v28  ;;  %v3880_v13 = vsel %vm2322_vm2, %v3802_v10, -inf  ;;  %v3883_v55 = vsel %vm2322_vm2, %v3809_v36, -inf  ;;  %5658 = vmatprep.subr.bf16.mxu1 %v5957_v43  ;;  %v5962_v10 = vld [vmem:[%s7762_s3 + $0x100] sm:$0xff]  }
 0x422   : > { %v3823_v61 = vmax.f32 %v3821_v58, %v3822_v6  ;;  %v3830_v30 = vmax.f32 %v3828_v51, %v3829_v9  ;;  %v3836_v63 = vrot.slane %v3835_v11, 1  ;;  %v3875_v5 = vsel %vm2322_vm2, %v3816_v21, -inf  ;;  %v5917_v14 = vld [vmem:[#allocation4 + $0xa] ss:$8 sps:$4 sm:$0xff]   ;;  %5679 = vmatpush3.bf16.msra.mxu0 %v5960_v8  ;;  %v5974_v42 = vld [vmem:[%s7763_s4] sm:$0xff]  }
 0x423   : > { %v3876_v7 = vmax.f32 %v3874_v16, %v3875_v5  ;;  %v5919_v3 = vld [vmem:[#allocation4 + $0x8] ss:$8 sps:$4 sm:$0xff]   ;;  %5680 = vmatprep.subr.bf16.mxu0 %v5961_v4  ;;  %v5973_v16 = vld [vmem:[%s7763_s4 + $0x40] sm:$0xff]  }
 0x424   : > { %v3837_v25 = vmax.f32 %v3835_v11, %v3836_v63  ;;  %v3878_v39 = vsel %vm2322_vm2, %v3823_v61, -inf  ;;  %v3881_v31 = vsel %vm2322_vm2, %v3830_v30, -inf  ;;  %5659 = vmatpush3.bf16.msra.mxu1 %v5958_v1  ;;  %v5947_v59 = vld [vmem:[#allocation4 + $0x9] ss:$8 sps:$4 sm:$0xff]   ;;  %v5966_v11 = vld [vmem:[%s7762_s3 + $0x118] sm:$0xff]   ;;  %v5975_v28 = vld [vmem:[%s7763_s4 + $0xc0] sm:$0xff]  }
 0x425   : > { %v3879_v19 = vmax.f32 %v3877_v60, %v3878_v39  ;;  %v3882_v35 = vmax.f32 %v3880_v13, %v3881_v31  ;;  %5794 = vmatprep.subr.bf16.mxu1 %v6092_v18  ;;  %v5955_v17 = vld [vmem:[#allocation4 + $0x10] ss:$8 sps:$4 sm:$0xff]   ;;  %v5976_v61 = vld [vmem:[%s7763_s4 + $0x48] sm:$0xff]   ;;  %v5977_v30 = vld [vmem:[%s7763_s4 + $0x80] sm:$0xff]  }
 0x426   : > { %v3884_v33 = vsel %vm2322_vm2, %v3837_v25, -inf  ;;  %v5967_v0 = vld [vmem:[#allocation4 + $0x12] ss:$8 sps:$4 sm:$0xff]   ;;  %5681 = vmatpush3.bf16.msra.mxu0 %v5963_v22  ;;  %v5979_v63 = vld [vmem:[%s7763_s4 + $0xc8] sm:$0xff]  }
 0x427   : > { %v3885_v47 = vmax.f32 %v3883_v55, %v3884_v33  ;;  %v3918_v40 = vsel %vm2599_vm3, %v3879_v19, %v3876_v7  ;;  %v5921_v52 = vld [vmem:[#allocation4 + $0x11] ss:$8 sps:$4 sm:$0xff]   ;;  %5693 = vmatprep.subr.bf16.mxu0 %v5973_v16  ;;  %v5978_v5 = vld [vmem:[%s7763_s4 + $0x8] sm:$0xff]  }
 0x428   : > { %v3919_v2 = vsel %vm2601_vm4, %v3882_v35, %v3918_v40  ;;  %v5965_v9 = vld [vmem:[%s7762_s3 + $0x110] sm:$0xff]   ;;  %v5981_v60 = vld [vmem:[%s7763_s4 + $0x88] sm:$0xff]   ;;  %v5984_v31 = vld [vmem:[%s7763_s4 + $0x58] sm:$0xff]  }
 0x429   : > { %v3920_v45 = vsel %vm2603_vm5, %v3885_v47, %v3919_v2  ;;  %v5980_v7 = vld [vmem:[%s7763_s4 + $0x50] sm:$0xff]   ;;  %v5986_v19 = vld [vmem:[%s7763_s4 + $0x18] sm:$0xff]  }
 0x42a   : > { %3930 = vst.msk [vmem:[#allocation4 + $0x21] sm:$0xf] %vm3926_vm12, %v3920_v45  ;;  %v5983_v13 = vld [vmem:[%s7763_s4 + $0xd0] sm:$0xff]  }
 0x42b   : > { %v5982_v25 = vld [vmem:[%s7763_s4 + $0x10] sm:$0xff]  }
 0x42c   : > { %v5985_v39 = vld [vmem:[%s7763_s4 + $0x90] sm:$0xff]  }
 0x431   : > { %v5918_v29 = vld [vmem:[#allocation4 + $0x1a] ss:$8 sps:$4 sm:$0xff]  }
 0x432   : > { %v5920_v49 = vld [vmem:[#allocation4 + $0x18] ss:$8 sps:$4 sm:$0xff]   ;;  %v4021_v41 = vpack.c.bf16 %v5918_v29, %v5917_v14 }
 0x433   : > { %v5948_v12 = vld [vmem:[#allocation4 + $0x19] ss:$8 sps:$4 sm:$0xff]   ;;  %v3989_v38 = vpack.c.bf16 %v5920_v49, %v5919_v3 }
 0x434   : > { %v5922_v34 = vld [vmem:[#allocation4 + $0x21] ss:$8 sps:$4 sm:$0xff]   ;;  %4023 = vrot.lane.b32.xlu1 %v4021_v41, %s6094_s18  ;;  %v4007_v62 = vpack.c.bf16 %v5948_v12, %v5947_v59 }
 0x435   : > { %v5956_v48 = vld [vmem:[#allocation4 + $0x20] ss:$8 sps:$4 sm:$0xff]   ;;  %3991 = vrot.lane.b32.xlu0 %v3989_v38, %s6094_s18  ;;  %v4054_v46 = vpack.c.bf16 %v5922_v34, %v5921_v52 }
 0x436   : > { %v5968_v20 = vld [vmem:[#allocation4 + $0x22] ss:$8 sps:$4 sm:$0xff]   ;;  %v4040_v26 = vpack.c.bf16 %v5956_v48, %v5955_v17  ;;  %4008 = vst.msk [vmem:[#allocation5 + $0x10] sm:$0xff] %vm2322_vm2, %v4007_v62 }
 0x437   : > { %v4072_v23 = vpack.c.bf16 %v5968_v20, %v5967_v0  ;;  %v5492_v14 = vld [vmem:[%s7764_s5 + $0x2] ss:$0 sm:$0xff] }
 0x438   : > { %4041 = vst.msk [vmem:[#allocation5 + $0x18] sm:$0xff] %vm2322_vm2, %v4040_v26  ;;  %v5493_v59 = vld [vmem:[%s7765_s6 + $0x2] ss:$0 sm:$0xff] }
 0x439   : > { %4073 = vst.msk [vmem:[#allocation5 + $0x20] sm:$0xff] %vm2322_vm2, %v4072_v23  ;;  %4056 = vrot.lane.b32.xlu0 %v4054_v46, %s6094_s18 }
 0x440   : > { %v4078_v36 = vld [vmem:[#allocation5 + $0x20] sm:$0xff] }
 0x491   : > { %v3960_v58 = vpop.permute.xlu1 %3959 }
 0x492   : > { %3962 = vst.msk [vmem:[#allocation5] sm:$0xff] %vm2723_vm10, %v3960_v58 }
 0x499   : > { %v4074_v27 = vld [vmem:[#allocation5] sm:$0xff] }
 0x4a6   : > { %v4024_v51 = vpop.permute.xlu1 %4023 }
 0x4a7   : > { %4026 = vst.msk [vmem:[#allocation5 + $0x10] sm:$0xff] %vm2723_vm10, %v4024_v51  ;;  %v3992_v53 = vpop.permute.xlu0 %3991 }
 0x4a8   : > { %3994 = vst.msk [vmem:[#allocation5 + $0x8] sm:$0xff] %vm2723_vm10, %v3992_v53 }
 0x4ab   : > { %v4057_v54 = vpop.permute.xlu0 %4056 }
 0x4ac   : > { %4059 = vst.msk [vmem:[#allocation5 + $0x18] sm:$0xff] %vm2723_vm10, %v4057_v54 }
 0x4ae   : > { %v4076_v6 = vld [vmem:[#allocation5 + $0x10] sm:$0xff] }
 0x4af   : > { %v4075_v56 = vld [vmem:[#allocation5 + $0x8] sm:$0xff] }
 0x4b0   : > { %4402 = vmatprep.mubr.bf16.mxu1 %v4075_v56 }
 0x4b1   : > { %4403 = vmatmul.mubr.bf16.vlgmr.msra.gmra.mrb[32].mxu1 %v4074_v27 }
 0x4b2   : > { %5795 = vmatpush3.bf16.msra.mxu1 %v5962_v10  ;;  %5802 = vmatprep.mubr.msk.bf16.mxu1 %vm6095_vm13, %v6092_v18 }
 0x4b3   : > { %v4077_v21 = vld [vmem:[#allocation5 + $0x18] sm:$0xff]  ;;  %5796 = vmatprep.subr.bf16.mxu1 %v6092_v18 }
 0x4b4   : > { %4443 = vmatprep.mubr.bf16.mxu0 %v4077_v21 }
 0x4b5   : > { %4444 = vmatmul.mubr.bf16.vlgmr.msra.gmra.mrb[40].mxu0 %v4076_v6 }
 0x4b6   : > { %5797 = vmatpush3.bf16.msra.mxu1 %v5964_v44  ;;  %5694 = vmatpush3.bf16.msra.mxu0 %v5974_v42 }
 0x4b7   : > { %5798 = vmatprep.subr.bf16.mxu1 %v6092_v18  ;;  %5695 = vmatprep.subr.bf16.mxu0 %v5976_v61 }
 0x4ba   : > { %5799 = vmatpush3.bf16.msra.mxu1 %v5965_v9  ;;  %5696 = vmatpush3.bf16.msra.mxu0 %v5978_v5 }
 0x4bb   : > { %5800 = vmatprep.subr.bf16.mxu1 %v6092_v18  ;;  %5697 = vmatprep.subr.bf16.mxu0 %v5980_v7 }
 0x4be   : > { %5801 = vmatpush3.bf16.msra.mxu1 %v5966_v11  ;;  %5698 = vmatpush3.bf16.msra.mxu0 %v5982_v25 }
 0x4bf   : > { %5715 = vmatprep.subr.bf16.mxu1 %v5975_v28  ;;  %5699 = vmatprep.subr.bf16.mxu0 %v5984_v31 }
 0x4c1   : > { %5803 = vmatmul.mubr.msk.bf16.vlgmr.msra.gmra.mrb[36].mxu1 %vm2322_vm2, %v4078_v36 }
 0x4c2   : > { %5716 = vmatpush3.bf16.msra.mxu1 %v5977_v30  ;;  %5700 = vmatpush3.bf16.msra.mxu0 %v5986_v19 }
 0x4c3   : > { %5717 = vmatprep.subr.bf16.mxu1 %v5979_v63 }
 0x4c6   : > { %5718 = vmatpush3.bf16.msra.mxu1 %v5981_v60 }
 0x4c7   : > { %5719 = vmatprep.subr.bf16.mxu1 %v5983_v13 }
 0x4ca   : > { %5720 = vmatpush3.bf16.msra.mxu1 %v5985_v39 }
 0x584   : > { %v5660_v35 = vpop.f32.mrb[32].mxu1 }
 0x585   : > { %v5661_v55 = vpop.f32.mrb[33].mxu1 }
 0x586   : > { %v5662_v33 = vadd.f32 %v5661_v55, %v5660_v35  ;;  %v5663_v47 = vpop.f32.mrb[34].mxu1 }
 0x587   : > { %v5664_v40 = vpop.f32.mrb[35].mxu1 }
 0x588   : > { %v5665_v2 = vadd.f32 %v5664_v40, %v5663_v47  ;;  %v5682_v57 = vpop.f32.mrb[40].mxu0 }
 0x589   : > { %v5683_v45 = vpop.f32.mrb[41].mxu0 }
 0x58a   : > { %v5684_v15 = vadd.f32 %v5683_v45, %v5682_v57  ;;  %v5685_v24 = vpop.f32.mrb[42].mxu0 }
 0x58b   : > { %v5686_v37 = vpop.f32.mrb[43].mxu0 }
 0x58c   : > { %v5687_v43 = vadd.f32 %v5686_v37, %v5685_v24  ;;  %v4446_v1 = vadd.f32 %v5684_v15, %v5662_v33 }
 0x58e   : > { %v4449_v50 = vadd.f32 %v5687_v43, %v5665_v2 }
 0x594   : > { %v4486_v8 = vpop.f32.mrb[36].mxu1 }
 0x595   : > { %v4487_v3 = vadd.f32 %v4486_v8, %v4446_v1  ;;  %v5804_v29 = vpop.f32.mrb[37].mxu1 }
 0x596   : > { %v4489_v49 = vpop.f32.mrb[38].mxu1 }
 0x597   : > { %v4498_v17 = vmul.f32 %v5492_v14, %v4487_v3  ;;  %v4490_v41 = vadd.f32 %v4489_v49, %v4449_v50  ;;  %v5805_v12 = vpop.f32.mrb[39].mxu1 }
 0x599   : > { %v4505_v0 = vadd.f32 %v5493_v59, %v4498_v17  ;;  %v4499_v38 = vmul.f32 %v5492_v14, %v4490_v41 }
 0x59b   : > { %v4507_v34 = vmax.f32 %v4505_v0, 0.0  ;;  %v4506_v48 = vadd.f32 %v5493_v59, %v4499_v38 }
 0x59d   : > { %v4511_v4 = vcombine.high %v4507_v34, %v4507_v34  ;;  %v4518_v62 = vrot.slane %v4507_v34, %v6283_v32  ;;  %v4508_v22 = vmax.f32 %v4506_v48, 0.0 }
 0x59f   : > { %v4525_v20 = vrot.slane %v4511_v4, %v6283_v32  ;;  %v4526_v52 = vcombine.high %v4518_v62, %v4518_v62  ;;  %v4553_v26 = vsel %vm1425_vm1, %v4518_v62, -inf  ;;  %v4528_v23 = vcombine.high %v4508_v22, %v4508_v22 }
 0x5a0   : > { %v4554_v46 = vrot.slane %v4553_v26, 4  ;;  %v4535_v58 = vrot.slane %v4508_v22, %v6283_v32 }
 0x5a1   : > { %v4527_v51 = vcombine.high %v4525_v20, %v4525_v20  ;;  %v4560_v53 = vsel %vm1425_vm1, %v4526_v52, -inf  ;;  %v4567_v54 = vsel %vm1425_vm1, %v4525_v20, -inf  ;;  %v4542_v10 = vrot.slane %v4528_v23, %v6283_v32 }
 0x5a2   : > { %v4555_v56 = vmax.f32 %v4553_v26, %v4554_v46  ;;  %v4561_v27 = vrot.slane %v4560_v53, 4  ;;  %v4568_v44 = vrot.slane %v4567_v54, 4  ;;  %v4543_v21 = vcombine.high %v4535_v58, %v4535_v58 }
 0x5a3   : > { %v4574_v6 = vsel %vm1425_vm1, %v4527_v51, -inf  ;;  %v4544_v9 = vcombine.high %v4542_v10, %v4542_v10  ;;  %v4581_v11 = vsel %vm1425_vm1, %v4535_v58, -inf  ;;  %v4595_v36 = vsel %vm1425_vm1, %v4542_v10, -inf }
 0x5a4   : > { %v4556_v16 = vrot.slane %v4555_v56, 2  ;;  %v4562_v42 = vmax.f32 %v4560_v53, %v4561_v27  ;;  %v4569_v28 = vmax.f32 %v4567_v54, %v4568_v44  ;;  %v4575_v61 = vrot.slane %v4574_v6, 4 }
 0x5a5   : > { %v4582_v30 = vrot.slane %v4581_v11, 4  ;;  %v4588_v63 = vsel %vm1425_vm1, %v4543_v21, -inf  ;;  %v4596_v5 = vrot.slane %v4595_v36, 4  ;;  %v4602_v60 = vsel %vm1425_vm1, %v4544_v9, -inf  ;;  %v5988_v9 = vld [vmem:[%s7763_s4 + $0xd8] sm:$0xff]  }
 0x5a6   : > { %v4557_v7 = vmax.f32 %v4555_v56, %v4556_v16  ;;  %v4563_v13 = vrot.slane %v4562_v42, 2  ;;  %v4570_v25 = vrot.slane %v4569_v28, 2  ;;  %v4576_v39 = vmax.f32 %v4574_v6, %v4575_v61  ;;  %5721 = vmatprep.subr.bf16.mxu1 %v5988_v9  ;;  %v5991_v16 = vld [vmem:[%s7763_s4 + $0x98] sm:$0xff]  }
 0x5a7   : > { %v4583_v31 = vmax.f32 %v4581_v11, %v4582_v30  ;;  %v4589_v19 = vrot.slane %v4588_v63, 4  ;;  %v4597_v35 = vmax.f32 %v4595_v36, %v4596_v5  ;;  %v4603_v55 = vrot.slane %v4602_v60, 4  ;;  %v5990_v36 = vld [vmem:[%s7763_s4 + $0x60] sm:$0xff]   ;;  %5722 = vmatpush3.bf16.msra.mxu1 %v5991_v16  ;;  %v5996_v5 = vld [vmem:[%s7763_s4 + $0x68] sm:$0xff]  }
 0x5a8   : > { %v4558_v33 = vrot.slane %v4557_v7, 1  ;;  %v4564_v47 = vmax.f32 %v4562_v42, %v4563_v13  ;;  %v4571_v40 = vmax.f32 %v4569_v28, %v4570_v25  ;;  %v4577_v2 = vrot.slane %v4576_v39, 2  ;;  %v5992_v42 = vld [vmem:[%s7763_s4 + $0x20] sm:$0xff]   ;;  %5701 = vmatprep.subr.bf16.mxu0 %v5990_v36 }
 0x5a9   : > { %v4584_v57 = vrot.slane %v4583_v31, 2  ;;  %v4590_v45 = vmax.f32 %v4588_v63, %v4589_v19  ;;  %v4598_v15 = vrot.slane %v4597_v35, 2  ;;  %v4604_v24 = vmax.f32 %v4602_v60, %v4603_v55  ;;  %5702 = vmatpush3.bf16.msra.mxu0 %v5992_v42  ;;  %v5994_v63 = vld [vmem:[%s7763_s4 + $0xe0] sm:$0xff]  }
 0x5aa   : > { %v4559_v37 = vmax.f32 %v4557_v7, %v4558_v33  ;;  %v4565_v43 = vrot.slane %v4564_v47, 1  ;;  %v4572_v1 = vrot.slane %v4571_v40, 1  ;;  %v4578_v50 = vmax.f32 %v4576_v39, %v4577_v2  ;;  %v5997_v60 = vld [vmem:[%s7763_s4 + $0xa0] sm:$0xff]   ;;  %5723 = vmatprep.subr.bf16.mxu1 %v5994_v63  ;;  %5703 = vmatprep.subr.bf16.mxu0 %v5996_v5 }
 0x5ab   : > { %v4585_v8 = vmax.f32 %v4583_v31, %v4584_v57  ;;  %v4591_v14 = vrot.slane %v4590_v45, 2  ;;  %v4599_v3 = vmax.f32 %v4597_v35, %v4598_v15  ;;  %v4605_v29 = vrot.slane %v4604_v24, 2  ;;  %5724 = vmatpush3.bf16.msra.mxu1 %v5997_v60  ;;  %v6000_v57 = vld [vmem:[%s7763_s4 + $0x70] sm:$0xff]   ;;  %v5533_v63 = vld [vmem:[%s7765_s6 + $0x3] ss:$0 sm:$0xff] }
 0x5ac   : > { %v4566_v59 = vmax.f32 %v4564_v47, %v4565_v43  ;;  %v4573_v49 = vmax.f32 %v4571_v40, %v4572_v1  ;;  %v4579_v17 = vrot.slane %v4578_v50, 1  ;;  %v4609_v4 = vsel %vm2322_vm2, %v4559_v37, -inf  ;;  %v5998_v47 = vld [vmem:[%s7763_s4 + $0x28] sm:$0xff]   ;;  %v6003_v37 = vld [vmem:[%s7763_s4 + $0xf0] sm:$0xff]  }
 0x5ad   : > { %v4586_v41 = vrot.slane %v4585_v8, 1  ;;  %v4592_v12 = vmax.f32 %v4590_v45, %v4591_v14  ;;  %v4600_v0 = vrot.slane %v4599_v3, 1  ;;  %v4606_v38 = vmax.f32 %v4604_v24, %v4605_v29  ;;  %v5999_v40 = vld [vmem:[%s7763_s4 + $0xe8] sm:$0xff]   ;;  %5704 = vmatpush3.bf16.msra.mxu0 %v5998_v47  ;;  %v6002_v24 = vld [vmem:[%s7763_s4 + $0x30] sm:$0xff]  }
 0x5ae   : > { %v4580_v34 = vmax.f32 %v4578_v50, %v4579_v17  ;;  %v4610_v48 = vsel %vm2322_vm2, %v4573_v49, -inf  ;;  %v4612_v20 = vsel %vm2322_vm2, %v4566_v59, -inf  ;;  %v6001_v45 = vld [vmem:[%s7763_s4 + $0xa8] sm:$0xff]   ;;  %5725 = vmatprep.subr.bf16.mxu1 %v5999_v40  ;;  %5705 = vmatprep.subr.bf16.mxu0 %v6000_v57  ;;  %v6005_v14 = vld [vmem:[%s7763_s4 + $0xb0] sm:$0xff]   ;;  %v6007_v59 = vld [vmem:[%s7763_s4 + $0xf8] sm:$0xff]  }
 0x5af   : > { %v4593_v62 = vrot.slane %v4592_v12, 1  ;;  %v4601_v22 = vmax.f32 %v4599_v3, %v4600_v0  ;;  %v4587_v26 = vmax.f32 %v4585_v8, %v4586_v41  ;;  %v4607_v23 = vrot.slane %v4606_v38, 1  ;;  %5726 = vmatpush3.bf16.msra.mxu1 %v6001_v45  ;;  %v6004_v8 = vld [vmem:[%s7763_s4 + $0x78] sm:$0xff]  }
 0x5b0   : > { %v4613_v52 = vsel %vm2322_vm2, %v4580_v34, -inf  ;;  %v4611_v46 = vmax.f32 %v4609_v4, %v4610_v48  ;;  %5727 = vmatprep.subr.bf16.mxu1 %v6003_v37  ;;  %v6006_v17 = vld [vmem:[%s7763_s4 + $0x38] sm:$0xff]  }
 0x5b1   : > { %v4614_v58 = vmax.f32 %v4612_v20, %v4613_v52  ;;  %v4594_v51 = vmax.f32 %v4592_v12, %v4593_v62  ;;  %v4608_v53 = vmax.f32 %v4606_v38, %v4607_v23  ;;  %v4616_v54 = vsel %vm2322_vm2, %v4601_v22, -inf  ;;  %5706 = vmatpush3.bf16.msra.mxu0 %v6002_v24  ;;  %v6008_v12 = vld [vmem:[%s7763_s4 + $0xb8] sm:$0xff]  }
 0x5b2   : > { %v4615_v56 = vsel %vm2322_vm2, %v4587_v26, -inf  ;;  %5707 = vmatprep.subr.bf16.mxu0 %v6004_v8  ;;  %v6009_v26 = vld [vmem:[%s7763_s4 + $0x100] sm:$0xff]  }
 0x5b3   : > { %v4629_v10 = vsel %vm2599_vm3, %v4614_v58, %v4611_v46  ;;  %v4618_v27 = vsel %vm2322_vm2, %v4594_v51, -inf  ;;  %v4619_v44 = vsel %vm2322_vm2, %v4608_v53, -inf  ;;  %v4617_v21 = vmax.f32 %v4615_v56, %v4616_v54  ;;  %5728 = vmatpush3.bf16.msra.mxu1 %v6005_v14  ;;  %v6011_v58 = vld [vmem:[%s7763_s4 + $0x108] sm:$0xff]   ;;  %v6012_v51 = vld [vmem:[%s7763_s4 + $0x110] sm:$0xff]   ;;  %v6013_v53 = vld [vmem:[%s7763_s4 + $0x118] sm:$0xff]  }
 0x5b4   : > { %4634 = vst.msk [vmem:[#allocation6 + $0x5] sm:$0x3] %vm1425_vm1, %v4629_v10  ;;  %v4620_v6 = vmax.f32 %v4618_v27, %v4619_v44  ;;  %5729 = vmatprep.subr.bf16.mxu1 %v6007_v59 }
 0x5b5   : > { %5708 = vmatpush3.bf16.msra.mxu0 %v6006_v17 }
 0x5b6   : > { %v4630_v11 = vsel %vm2599_vm3, %v4620_v6, %v4617_v21  ;;  %5806 = vmatprep.subr.bf16.mxu0 %v6092_v18 }
 0x5b7   : > { %4635 = vst.msk [vmem:[#allocation6 + $0x9] sm:$0x3] %vm1425_vm1, %v4630_v11  ;;  %5730 = vmatpush3.bf16.msra.mxu1 %v6008_v12 }
 0x5bb   : > { %v6019_v28 = vld.sshfl [vmem:[#allocation6 + $0x1] sm:$0xf pattern:$0x76325410] }
 0x5bc   : > { %v6020_v61 = vld.sshfl [vmem:[#allocation6] sm:$0xf pattern:$0x76325410]  ;;  %v4664_v7 = vpack.c.bf16 %v6019_v28, %v6019_v28 }
 0x5bd   : > { %v6021_v30 = vld.sshfl [vmem:[#allocation6 + $0x2] sm:$0xf pattern:$0x76325410]  ;;  %v4649_v31 = vpack.c.bf16 %v6020_v61, %v6020_v61 }
 0x5be   : > { %v6022_v13 = vld.sshfl [vmem:[#allocation6 + $0x4] sm:$0xf pattern:$0x76325410]  ;;  %v4672_v19 = vrot.slane %v4664_v7, %v6283_v32  ;;  %v4691_v35 = vpack.c.bf16 %v6021_v30, %v6021_v30 }
 0x5bf   : > { %v6023_v25 = vld.sshfl [vmem:[#allocation6 + $0x6] sm:$0xf pattern:$0x76325410]  ;;  %4650 = vst.msk [vmem:[#allocation7] sm:$0x3] %vm1425_vm1, %v4649_v31  ;;  %v4706_v2 = vpack.c.bf16 %v6022_v13, %v6022_v13 }
 0x5c0   : > { %v6024_v39 = vld.sshfl [vmem:[#allocation6 + $0x9] sm:$0xf pattern:$0x76325410]  ;;  %4673 = vrot.lane.b32.xlu0 %v4672_v19, %s6094_s18  ;;  %4692 = vst.msk [vmem:[#allocation7 + $0x2] sm:$0x3] %vm1425_vm1, %v4691_v35  ;;  %v4747_v15 = vpack.c.bf16 %v6023_v25, %v6023_v25 }
 0x5c1   : > { %v6025_v55 = vld.sshfl [vmem:[#allocation6 + $0x5] sm:$0xf pattern:$0x76325410]  ;;  %v4714_v43 = vrot.slane %v4706_v2, %v6283_v32  ;;  %v4789_v1 = vpack.c.bf16 %v6024_v39, %v6024_v39 }
 0x5c2   : > { %v6026_v33 = vld.sshfl [vmem:[#allocation6 + $0x8] sm:$0xf pattern:$0x76325410]  ;;  %v4732_v50 = vpack.c.bf16 %v6025_v55, %v6025_v55  ;;  %v4755_v3 = vrot.slane %v4747_v15, %v6283_v32 }
 0x5c3   : > { %v4774_v29 = vpack.c.bf16 %v6026_v33, %v6026_v33  ;;  %v6027_v49 = vld.sshfl [vmem:[#allocation6 + $0xa] sm:$0xf pattern:$0x76325410]  ;;  %4715 = vrot.lane.b32.xlu1 %v4714_v43, %s6094_s18  ;;  %v4797_v41 = vrot.slane %v4789_v1, %v6283_v32 }
 0x5c4   : > { %4733 = vst.msk [vmem:[#allocation7 + $0x4] sm:$0x3] %vm1425_vm1, %v4732_v50  ;;  %4756 = vrot.lane.b32.xlu0 %v4755_v3, %s6094_s18  ;;  %v4815_v0 = vpack.c.bf16 %v6027_v49, %v6027_v49 }
 0x5c5   : > { %4775 = vst.msk [vmem:[#allocation7 + $0x6] sm:$0x3] %vm1425_vm1, %v4774_v29 }
 0x5c6   : > { %4816 = vst.msk [vmem:[#allocation7 + $0x8] sm:$0x3] %vm1425_vm1, %v4815_v0 }
 0x5c7   : > { %4798 = vrot.lane.b32.xlu1 %v4797_v41, %s6094_s18  ;;  %s270_s18 = scalar_lea.vmem [#allocation8], %s269_s29 }
 0x5c8   : > { %s5316_s9 = sshll.u32 %s270_s18, 4  ;;  %s7719_s9 = int_to_ptr.vmem [resolvable:$true] %s5316_s9 }
 0x5c9   : > { %s6028_s16 = scalar_lea.vmem %s7719_s9, 16  ;;  %p6035_p0 = scmp.lt.s32.totalorder %s7719_s9, %s6033_s19 }
 0x5ca   : > { %p6029_p11 = scmp.ne.s32.totalorder %s7719_s9, %s6028_s16  ;;  %p6036_p1 = scmp.lt.s32.totalorder %s6034_s20, %s6028_s16 }
 0x5cc   : > { %p6030_p12 = pnand %p6029_p11, %p6175_p5  ;;  %p6037_p2 = por %p6036_p1, %p6035_p0 }
 0x5cd   : > { %v5494_v54 = vld.sshfl [vmem:[#allocation7 + $0x8] sm:$0x3 pattern:$0x76325410] }
 0x5ce   : > { %p6031_p13 = pneg %p6030_p12 }
 0x5d0   : > { %p6038_p3 = pnand %p6037_p2, %p6031_p13 }
 0x632   : > { %v4674_v38 = vpop.permute.xlu0 %4673 }
 0x633   : > { %4677 = vst.msk [vmem:[#allocation7] sm:$0x3] %vm4676_vm14, %v4674_v38 }
 0x635   : > { %v4716_v34 = vpop.permute.xlu1 %4715 }
 0x636   : > { %4718 = vst.msk [vmem:[#allocation7 + $0x2] sm:$0x3] %vm4676_vm14, %v4716_v34  ;;  %v4757_v48 = vpop.permute.xlu0 %4756 }
 0x637   : > { %4759 = vst.msk [vmem:[#allocation7 + $0x4] sm:$0x3] %vm4676_vm14, %v4757_v48 }
 0x639   : > { %v4799_v4 = vpop.permute.xlu1 %4798 }
 0x63a   : > { %4801 = vst.msk [vmem:[#allocation7 + $0x6] sm:$0x3] %vm4676_vm14, %v4799_v4 }
 0x641   : > { %v4817_v62 = vld [vmem:[#allocation7] sm:$0xff] }
 0x642   : > { %v4900_v22 = vrot.slane %v4817_v62, %v6283_v32  ;;  %v4893_v20 = vcombine.high %v4817_v62, %v4817_v62 }
 0x644   : > { %v4908_v52 = vcombine.high %v4900_v22, %v4900_v22  ;;  %v4907_v23 = vrot.slane %v4893_v20, %v6283_v32 }
 0x646   : > { %5172 = vmatprep.mubr.bf16.mxu0 %v4908_v52  ;;  %v4909_v46 = vcombine.high %v4907_v23, %v4907_v23 }
 0x647   : > { %5173 = vmatmul.mubr.bf16.vlgmr.msra.gmra.mrb[44].mxu0 %v4900_v22 }
 0x648   : > { %5807 = vmatpush3.bf16.msra.mxu0 %v6009_v26  ;;  %5212 = vmatprep.mubr.bf16.mxu1 %v4909_v46 }
 0x649   : > { %5213 = vmatmul.mubr.bf16.vlgmr.msra.gmra.mrb[40].mxu1 %v4907_v23  ;;  %5808 = vmatprep.subr.bf16.mxu0 %v6092_v18 }
 0x64a   : > { %5814 = vmatprep.mubr.msk.bf16.mxu0 %vm6095_vm13, %v6092_v18 }
 0x64c   : > { %5809 = vmatpush3.bf16.msra.mxu0 %v6011_v58 }
 0x64d   : > { %5810 = vmatprep.subr.bf16.mxu0 %v6092_v18 }
 0x650   : > { %5811 = vmatpush3.bf16.msra.mxu0 %v6012_v51 }
 0x651   : > { %5812 = vmatprep.subr.bf16.mxu0 %v6092_v18  ;;  %v5532_v18 = vld [vmem:[%s7764_s5 + $0x3] ss:$0 sm:$0xff] }
 0x654   : > { %5813 = vmatpush3.bf16.msra.mxu0 %v6013_v53 }
 0x657   : > { %5815 = vmatmul.mubr.msk.bf16.vlgmr.msra.gmra.mrb[48].mxu0 %vm2322_vm2, %v5494_v54 }
 0x71a   : > { %v5709_v10 = vpop.f32.mrb[44].mxu0 }
 0x71b   : > { %v5710_v56 = vpop.f32.mrb[45].mxu0 }
 0x71c   : > { %v5711_v27 = vadd.f32 %v5710_v56, %v5709_v10  ;;  %v5712_v44 = vpop.f32.mrb[46].mxu0  ;;  %v5731_v21 = vpop.f32.mrb[40].mxu1 }
 0x71d   : > { %v5713_v6 = vpop.f32.mrb[47].mxu0  ;;  %v5732_v9 = vpop.f32.mrb[41].mxu1 }
 0x71e   : > { %v5733_v11 = vadd.f32 %v5732_v9, %v5731_v21  ;;  %v5734_v36 = vpop.f32.mrb[42].mxu1 }
 0x71f   : > { %v5735_v16 = vpop.f32.mrb[43].mxu1 }
 0x720   : > { %v5215_v42 = vadd.f32 %v5733_v11, %v5711_v27 }
 0x72a   : > { %v5254_v28 = vpop.f32.mrb[48].mxu0 }
 0x72b   : > { %v5255_v61 = vadd.f32 %v5254_v28, %v5215_v42  ;;  %v5816_v30 = vpop.f32.mrb[49].mxu0 }
 0x72c   : > { %v5257_v5 = vpop.f32.mrb[50].mxu0 }
 0x72d   : > { %v5265_v60 = vmul.f32 %v5532_v18, %v5255_v61  ;;  %v5817_v7 = vpop.f32.mrb[51].mxu0 }
 0x72f   : > { %v5271_v13 = vadd.f32 %v5533_v63, %v5265_v60 }
 0x731   : > { %v5272_v25 = vmax.f32 %v5271_v13, 0.0 }
 0x733   : > { %v5280_v39 = vrot.slane %v5272_v25, %v6283_v32 }
 0x735   : > { %v5281_v31 = vcombine.high %v5280_v39, %v5280_v39  ;;  %v5284_v19 = vsel %vm1425_vm1, %v5280_v39, -inf }
 0x736   : > { %v5285_v35 = vrot.slane %v5284_v19, 4 }
 0x737   : > { %v5291_v55 = vsel %vm1425_vm1, %v5281_v31, -inf }
 0x738   : > { %v5286_v33 = vmax.f32 %v5284_v19, %v5285_v35  ;;  %v5292_v47 = vrot.slane %v5291_v55, 4 }
 0x73a   : > { %v5287_v40 = vrot.slane %v5286_v33, 2  ;;  %v5293_v2 = vmax.f32 %v5291_v55, %v5292_v47 }
 0x73c   : > { %v5288_v57 = vmax.f32 %v5286_v33, %v5287_v40  ;;  %v5294_v45 = vrot.slane %v5293_v2, 2 }
 0x73e   : > { %v5289_v15 = vrot.slane %v5288_v57, 1  ;;  %v5295_v24 = vmax.f32 %v5293_v2, %v5294_v45 }
 0x740   : > { %v5290_v37 = vmax.f32 %v5288_v57, %v5289_v15  ;;  %v5296_v43 = vrot.slane %v5295_v24, 1 }
 0x742   : > { %v5297_v32 = vmax.f32 %v5295_v24, %v5296_v43  ;;  %v5298_v1 = vsel %vm2322_vm2, %v5290_v37, -inf }
 0x744   : > { %v5299_v50 = vsel %vm2322_vm2, %v5297_v32, -inf }
 0x745   : > { %v5300_v8 = vmax.f32 %v5298_v1, %v5299_v50 }
 0x747   : > { %5302 = vst.msk [vmem:[%s270_s18] sm:$0x1] %vm5301_vm15, %v5300_v8 }
 0x748   : > { %6041 = shalt.err (!%p6038_p3)
}
 0x749   : > { %s6042_s21 = scalar_lea.hbm %s7717_s15, 16  ;;  %s6046_s29 = scalar_lea.hbm %s7766_s7, 32 }
 0x74a   : > { %p6043_p4 = scmp.ne.s32.totalorder %s7717_s15, %s6042_s21  ;;  %p6047_p9 = scmp.lt.u32.totalorder %s7717_s15, %s7766_s7 }
 0x74b   : > { %p6048_p10 = scmp.lt.u32.totalorder %s6046_s29, %s6042_s21  ;;  %p6050_p12 = scmp.lt.u32.totalorder %s6042_s21, %s7717_s15 }
 0x74c   : > { %p6044_p7 = pnand %p6043_p4, %p6175_p5 }
 0x74d   : > { %p6049_p11 = por %p6048_p10, %p6047_p9 }
 0x74e   : > { %p6045_p8 = pneg %p6044_p7 }
 0x74f   : > { %p6051_p13 = por %p6050_p12, %p6049_p11 }
 0x751   : > { %p6052_p0 = pnand %p6051_p13, %p6045_p8 }
 0x753   : > { %6055 = shalt.err (!%p6052_p0)
}
 0x754   : > { %5818 = dma.vmem_to_hbm [thread:$0]  (%p6175_p5), %s7719_s9, 16, %s7717_s15, %s5304_s28  }
 0x755 PF: > { %p5824_p1 = scmp.ge.s32.totalorder %s6090_s27, 2  ;;  %s5328_s13 = sand.u32 1, %s6078_s24  }
 0x756   : > { %s5329_s14 = scalar_lea.sflag [#allocation9], %s5328_s13 }
 0x757   : > { %p5821_p2 = pnand %p5824_p1, %p6179_p6 }
 0x759   : > { %6073 = dma.done.wait (!%p5821_p2), %s5329_s14, 16  }
 0x75a   : > { %6075 = vsyncadd (!%p5821_p2), %s5329_s14, 4294967280  ;;  %p17_p3 = scmp.ge.s32.totalorder %s6162_s30, 4   ;;  %s7769_s24 = smov %s6082_s25 }
 0x75b   : > { %s7770_s25 = smov %s6086_s26  ;;  %s7771_s26 = smov %s6173_s10 }
 0x75c   : > { %s7772_s27 = smov %s6162_s30  ;;  %19 = sbr.rel (!%p17_p3) target bundleno = 3 (0x3), region = 89 }
 0x763   :  { %5333 = vsyncpa [#allocation9], 1 }
 0x764   :  { %5335 = vsyncpa [#allocation9 + $0x1], 1 }

</bundles_post_ra>
